<compile_context>
chip_gen: v5e
topology: v5e:2x2
jax: 0.10.0
libtpu: 0.0.40
codegen_flags: <defaults>
</compile_context>

<pallas_src>
import functools

import jax
import jax.numpy as jnp
from jax import lax
from jax.experimental import pallas as pl
from jax.experimental.pallas import tpu as pltpu


# ----------------------------------------------------------------------------
# Kernel A: 1x1 conv (matmul over channels) + folded-BN affine (+ optional ReLU)
# ----------------------------------------------------------------------------
def _pw_affine_kernel(x_ref, w_ref, scale_ref, bias_ref, o_ref, *, relu):
    # x_ref: (Cin, t)  w_ref: (Cout, Cin)  scale/bias: (Cout, 1)  o_ref: (Cout, t)
    acc = jnp.dot(w_ref[...], x_ref[...], preferred_element_type=jnp.float32)
    out = acc * scale_ref[...] + bias_ref[...]
    if relu:
        out = jnp.maximum(out, 0.0)
    o_ref[...] = out.astype(o_ref.dtype)


def _pointwise_conv_bn(x, w, scale, bias, *, relu, out_dtype, t_hw):
    # x: (N, Cin, HW)  w: (Cout, Cin)  scale/bias: (Cout, 1)
    n, cin, hw = x.shape
    cout = w.shape[0]
    grid = (n, pl.cdiv(hw, t_hw))
    flops = 2 * n * hw * cin * cout
    bytes_accessed = (x.size * x.dtype.itemsize + w.size * w.dtype.itemsize
                      + n * cout * hw * jnp.dtype(out_dtype).itemsize)
    return pl.pallas_call(
        functools.partial(_pw_affine_kernel, relu=relu),
        out_shape=jax.ShapeDtypeStruct((n, cout, hw), out_dtype),
        grid_spec=pltpu.PrefetchScalarGridSpec(
            num_scalar_prefetch=0,
            grid=grid,
            in_specs=[
                pl.BlockSpec((None, cin, t_hw), lambda i, j: (i, 0, j)),
                pl.BlockSpec((cout, cin), lambda i, j: (0, 0)),
                pl.BlockSpec((cout, 1), lambda i, j: (0, 0)),
                pl.BlockSpec((cout, 1), lambda i, j: (0, 0)),
            ],
            out_specs=pl.BlockSpec((None, cout, t_hw), lambda i, j: (i, 0, j)),
        ),
        compiler_params=pltpu.CompilerParams(
            dimension_semantics=("parallel", "parallel")),
        cost_estimate=pl.CostEstimate(flops=flops, transcendentals=0,
                                      bytes_accessed=bytes_accessed),
    )(x, w, scale, bias)


# ----------------------------------------------------------------------------
# Kernel B: LightConv3x3 = 1x1 conv + depthwise 3x3 (pad=1) + BN + ReLU,
#           also emits the per-channel spatial mean for the ChannelGate.
# Depthwise conv is done on the flattened (C, H*W) tile with 9 static lane rolls
# and precomputed border masks (no padded copy, fully lane-dense).
# ----------------------------------------------------------------------------
def _light_conv_kernel(x_ref, wpw_ref, wdw_ref, m_ref, scale_ref, bias_ref,
                       o_ref, mean_ref, *, width):
    # x_ref: (C, HW)  wpw_ref: (C, C)  wdw_ref: (9, C, 1)  m_ref: (9, 1, HW)
    t = jnp.dot(wpw_ref[...], x_ref[...], preferred_element_type=jnp.float32)
    hw = t.shape[-1]
    wdw = wdw_ref[...]            # (9, C, 1)  f32
    m = m_ref[...]                # (9, 1, HW) f32
    acc = jnp.zeros_like(t)
    k = 0
    for dy in (-1, 0, 1):
        for dx in (-1, 0, 1):
            off = dy * width + dx
            shifted = t if off == 0 else pltpu.roll(t, shift=(-off) % hw, axis=1)
            acc = acc + wdw[k] * (shifted * m[k])
            k += 1
    out = acc * scale_ref[...] + bias_ref[...]
    out = jnp.maximum(out, 0.0)
    o_ref[...] = out.astype(o_ref.dtype)
    mean_ref[...] = jnp.mean(out, axis=-1, keepdims=True)


def _light_conv3x3(x, w_pw, w_dw9, masks, scale, bias, *, width, out_dtype):
    # x: (N, C, HW)  w_pw: (C, C)  w_dw9: (9, C, 1)  masks: (9, 1, HW)
    n, c, hw = x.shape
    flops = n * hw * (2 * c * c + 2 * 9 * c + 4 * c)
    bytes_accessed = (x.size * x.dtype.itemsize
                      + n * c * hw * jnp.dtype(out_dtype).itemsize
                      + w_pw.size * w_pw.dtype.itemsize + masks.size * 4)
    return pl.pallas_call(
        functools.partial(_light_conv_kernel, width=width),
        out_shape=(jax.ShapeDtypeStruct((n, c, hw), out_dtype),
                   jax.ShapeDtypeStruct((n, c, 1), jnp.float32)),
        grid_spec=pltpu.PrefetchScalarGridSpec(
            num_scalar_prefetch=0,
            grid=(n,),
            in_specs=[
                pl.BlockSpec((None, c, hw), lambda i: (i, 0, 0)),
                pl.BlockSpec((c, c), lambda i: (0, 0)),
                pl.BlockSpec((9, c, 1), lambda i: (0, 0, 0)),
                pl.BlockSpec((9, 1, hw), lambda i: (0, 0, 0)),
                pl.BlockSpec((c, 1), lambda i: (0, 0)),
                pl.BlockSpec((c, 1), lambda i: (0, 0)),
            ],
            out_specs=(pl.BlockSpec((None, c, hw), lambda i: (i, 0, 0)),
                       pl.BlockSpec((None, c, 1), lambda i: (i, 0, 0))),
        ),
        compiler_params=pltpu.CompilerParams(dimension_semantics=("parallel",)),
        cost_estimate=pl.CostEstimate(flops=flops, transcendentals=0,
                                      bytes_accessed=bytes_accessed),
    )(x, w_pw, w_dw9, masks, scale, bias)


# ----------------------------------------------------------------------------
# Kernel C: gate-weighted sum of 4 branches + conv3 (1x1) + BN + residual + ReLU
# ----------------------------------------------------------------------------
def _gated_conv3_residual_kernel(g_ref, xa_ref, xb_ref, xc_ref, xd_ref,
                                 w_ref, scale_ref, bias_ref, id_ref, o_ref):
    g = g_ref[...]                                   # (4, C, 1) f32
    x2 = (g[0] * xa_ref[...].astype(jnp.float32)
          + g[1] * xb_ref[...].astype(jnp.float32)
          + g[2] * xc_ref[...].astype(jnp.float32)
          + g[3] * xd_ref[...].astype(jnp.float32))  # (C, t)
    acc = jnp.dot(w_ref[...], x2.astype(w_ref.dtype),
                  preferred_element_type=jnp.float32)
    out = acc * scale_ref[...] + bias_ref[...]
    out = out + id_ref[...].astype(jnp.float32)
    out = jnp.maximum(out, 0.0)
    o_ref[...] = out.astype(o_ref.dtype)


def _gated_conv3_residual(gates, xa, xb, xc, xd, w3, scale, bias, identity,
                          *, out_dtype, t_hw):
    n, c, hw = xa.shape
    cout = w3.shape[0]
    grid = (n, pl.cdiv(hw, t_hw))
    flops = 2 * n * hw * c * cout + 9 * n * c * hw + 2 * n * cout * hw
    bytes_accessed = (4 * xa.size * xa.dtype.itemsize
                      + identity.size * identity.dtype.itemsize
                      + w3.size * w3.dtype.itemsize
                      + n * cout * hw * jnp.dtype(out_dtype).itemsize)
    return pl.pallas_call(
        _gated_conv3_residual_kernel,
        out_shape=jax.ShapeDtypeStruct((n, cout, hw), out_dtype),
        grid_spec=pltpu.PrefetchScalarGridSpec(
            num_scalar_prefetch=0,
            grid=grid,
            in_specs=[
                pl.BlockSpec((None, 4, c, 1), lambda i, j: (i, 0, 0, 0)),
                pl.BlockSpec((None, c, t_hw), lambda i, j: (i, 0, j)),
                pl.BlockSpec((None, c, t_hw), lambda i, j: (i, 0, j)),
                pl.BlockSpec((None, c, t_hw), lambda i, j: (i, 0, j)),
                pl.BlockSpec((None, c, t_hw), lambda i, j: (i, 0, j)),
                pl.BlockSpec((cout, c), lambda i, j: (0, 0)),
                pl.BlockSpec((cout, 1), lambda i, j: (0, 0)),
                pl.BlockSpec((cout, 1), lambda i, j: (0, 0)),
                pl.BlockSpec((None, cout, t_hw), lambda i, j: (i, 0, j)),
            ],
            out_specs=pl.BlockSpec((None, cout, t_hw), lambda i, j: (i, 0, j)),
        ),
        compiler_params=pltpu.CompilerParams(
            dimension_semantics=("parallel", "parallel")),
        cost_estimate=pl.CostEstimate(flops=flops, transcendentals=0,
                                      bytes_accessed=bytes_accessed),
    )(gates, xa, xb, xc, xd, w3, scale, bias, identity)


# ----------------------------------------------------------------------------
# Glue helpers
# ----------------------------------------------------------------------------
def _fold_bn(gamma, beta, mean, var, *, eps):
    scale = gamma / jnp.sqrt(var + eps)
    bias = beta - mean * scale
    return (scale.reshape(-1, 1).astype(jnp.float32),
            bias.reshape(-1, 1).astype(jnp.float32))


def _dw_masks(h, w):
    """(9, 1, H*W) border-validity masks for 3x3 depthwise conv, pad=1."""
    p = jnp.arange(h * w, dtype=jnp.int32)
    hh, ww = p // w, p % w
    rows = []
    for dy in (-1, 0, 1):
        for dx in (-1, 0, 1):
            rows.append((hh + dy >= 0) & (hh + dy < h) &
                        (ww + dx >= 0) & (ww + dx < w))
    return jnp.stack(rows).astype(jnp.float32).reshape(9, 1, h * w)


def _pick_hw_tile(hw, max_tile):
    if hw <= max_tile:
        return hw                      # full extent: always a legal block dim
    return max(128, (max_tile // 128) * 128)   # lane-dense tile; ragged tail OK


# ----------------------------------------------------------------------------
# Full OSBlock forward (inference: BN uses running stats, folded into affine)
# ----------------------------------------------------------------------------
@functools.partial(jax.jit, static_argnames=("compute_dtype", "t_hw_max", "eps"))
def osblock_forward(x, params, *, compute_dtype=jnp.bfloat16, t_hw_max=2048,
                    eps=1e-5):
    n, cin, h, w = x.shape
    hw = h * w
    cdt = compute_dtype
    mid = params['conv1']['w'].shape[0]
    cout = params['conv3']['w'].shape[0]
    t_hw = _pick_hw_tile(hw, t_hw_max)

    # NCHW-direct: free reshape, no transpose / pad / strided copy.
    x_f = x.reshape(n, cin, hw)
    x_c = x_f.astype(cdt)

    # conv1: 1x1 + BN + ReLU
    s1, b1 = _fold_bn(*params['conv1']['bn'], eps=eps)
    w1 = params['conv1']['w'].reshape(mid, cin).astype(cdt)
    x1 = _pointwise_conv_bn(x_c, w1, s1, b1, relu=True, out_dtype=cdt, t_hw=t_hw)

    masks = _dw_masks(h, w)   # tiny constant, folded by XLA

    # the four omni-scale branches (1, 2, 3, 4 LightConv3x3 layers)
    branch_acts, branch_means = [], []
    for branch in params['branches']:
        cur, mean = x1, None
        for lc in branch:
            wpw = lc['w_pw'].reshape(mid, mid).astype(cdt)
            wdw = lc['w_dw'].reshape(mid, 9).T.reshape(9, mid, 1).astype(jnp.float32)
            s, b = _fold_bn(*lc['bn'], eps=eps)
            cur, mean = _light_conv3x3(cur, wpw, wdw, masks, s, b,
                                       width=w, out_dtype=cdt)
        branch_acts.append(cur)
        branch_means.append(mean.reshape(n, mid))

    # ChannelGate MLP (shared weights across branches) -- tiny, left to XLA.
    gw1 = params['gate']['w1'].reshape(-1, mid)
    gw2 = params['gate']['w2'].reshape(mid, -1)
    gb1, gb2 = params['gate']['b1'], params['gate']['b2']

    def _gate_vec(m_nc):
        hid = jnp.maximum(m_nc @ gw1.T + gb1, 0.0)
        return jax.nn.sigmoid(hid @ gw2.T + gb2)

    gates = jnp.stack([_gate_vec(m) for m in branch_means], axis=1)   # (N,4,mid)
    gates = gates.reshape(n, 4, mid, 1).astype(jnp.float32)

    # identity path
    if params['downsample'] is not None:
        sd, bd = _fold_bn(*params['downsample']['bn'], eps=eps)
        wd = params['downsample']['w'].reshape(cout, cin).astype(cdt)
        identity = _pointwise_conv_bn(x_c, wd, sd, bd, relu=False,
                                      out_dtype=cdt, t_hw=t_hw)
    else:
        identity = x_f

    # fused tail: gated sum + conv3(1x1) + BN + residual add + ReLU
    s3, b3 = _fold_bn(*params['conv3']['bn'], eps=eps)
    w3 = params['conv3']['w'].reshape(cout, mid).astype(cdt)
    out = _gated_conv3_residual(gates, branch_acts[0], branch_acts[1],
                                branch_acts[2], branch_acts[3],
                                w3, s3, b3, identity,
                                out_dtype=x.dtype, t_hw=t_hw)
    # TODO(synk): optional InstanceNorm epilogue (IN=True) not implemented;
    # OSBlock default is IN=False.
    return out.reshape(n, cout, h, w)


# ----------------------------------------------------------------------------
# Pure-JAX reference (mirrors the PyTorch module, eval mode) + param builder
# ----------------------------------------------------------------------------
_PREC = lax.Precision.HIGHEST


def _bn_ref(x, gamma, beta, mean, var, eps=1e-5):
    inv = gamma / jnp.sqrt(var + eps)
    return (x - mean[None, :, None, None]) * inv[None, :, None, None] \
        + beta[None, :, None, None]


def _conv1x1_ref(x, w):
    return jnp.einsum('nchw,oc->nohw', x, w[:, :, 0, 0], precision=_PREC)


def _dwconv3x3_ref(x, w):
    return lax.conv_general_dilated(
        x, w, (1, 1), ((1, 1), (1, 1)),
        dimension_numbers=('NCHW', 'OIHW', 'NCHW'),
        feature_group_count=x.shape[1], precision=_PREC)


def _light_ref(x, lc):
    y = _conv1x1_ref(x, lc['w_pw'])
    y = _dwconv3x3_ref(y, lc['w_dw'])
    return jnp.maximum(_bn_ref(y, *lc['bn']), 0.0)


def _gate_ref(x, gp):
    v = jnp.mean(x, axis=(2, 3))                                   # (N, C)
    w1 = gp['w1'][:, :, 0, 0]
    w2 = gp['w2'][:, :, 0, 0]
    hid = jnp.maximum(jnp.einsum('nc,hc->nh', v, w1, precision=_PREC) + gp['b1'], 0.0)
    g = jax.nn.sigmoid(jnp.einsum('nh,ch->nc', hid, w2, precision=_PREC) + gp['b2'])
    return x * g[:, :, None, None]


def osblock_reference(x, params):
    x1 = jnp.maximum(_bn_ref(_conv1x1_ref(x, params['conv1']['w']),
                             *params['conv1']['bn']), 0.0)
    branch_y = []
    for branch in params['branches']:
        cur = x1
        for lc in branch:
            cur = _light_ref(cur, lc)
        branch_y.append(cur)
    x2 = sum(_gate_ref(y, params['gate']) for y in branch_y)
    x3 = _bn_ref(_conv1x1_ref(x2, params['conv3']['w']), *params['conv3']['bn'])
    if params['downsample'] is not None:
        identity = _bn_ref(_conv1x1_ref(x, params['downsample']['w']),
                           *params['downsample']['bn'])
    else:
        identity = x
    return jnp.maximum(x3 + identity, 0.0)


def _bn_params(key, c):
    k1, k2, k3, k4 = jax.random.split(key, 4)
    return (1.0 + 0.1 * jax.random.normal(k1, (c,), jnp.float32),
            0.1 * jax.random.normal(k2, (c,), jnp.float32),
            0.1 * jax.random.normal(k3, (c,), jnp.float32),
            jax.random.uniform(k4, (c,), jnp.float32, minval=0.5, maxval=1.5))


def _lc_params(key, c):
    k1, k2, k3 = jax.random.split(key, 3)
    return {'w_pw': 0.25 * jax.random.normal(k1, (c, c, 1, 1), jnp.float32),
            'w_dw': 0.3 * jax.random.normal(k2, (c, 1, 3, 3), jnp.float32),
            'bn': _bn_params(k3, c)}


def make_osblock_params(key, cin, cout, bottleneck_reduction=4, gate_reduction=16):
    mid = cout // bottleneck_reduction
    hid = max(1, mid // gate_reduction)
    keys = iter(jax.random.split(key, 32))
    params = {
        'conv1': {'w': 0.25 * jax.random.normal(next(keys), (mid, cin, 1, 1), jnp.float32),
                  'bn': _bn_params(next(keys), mid)},
        'branches': [[_lc_params(next(keys), mid) for _ in range(depth)]
                     for depth in (1, 2, 3, 4)],
        'gate': {'w1': 0.3 * jax.random.normal(next(keys), (hid, mid, 1, 1), jnp.float32),
                 'b1': 0.1 * jax.random.normal(next(keys), (hid,), jnp.float32),
                 'w2': 0.3 * jax.random.normal(next(keys), (mid, hid, 1, 1), jnp.float32),
                 'b2': 0.1 * jax.random.normal(next(keys), (mid,), jnp.float32)},
        'conv3': {'w': 0.25 * jax.random.normal(next(keys), (cout, mid, 1, 1), jnp.float32),
                  'bn': _bn_params(next(keys), cout)},
        'downsample': None,
    }
    if cin != cout:
        params['downsample'] = {
            'w': 0.25 * jax.random.normal(next(keys), (cout, cin, 1, 1), jnp.float32),
            'bn': _bn_params(next(keys), cout)}
    return params


if __name__ == "__main__":
    key = jax.random.PRNGKey(0)
    kx, kp = jax.random.split(key)

    N, C_IN, C_OUT, H, W = 2, 16, 64, 16, 16        # mid = 16, gate hidden = 1
    x = jax.random.normal(kx, (N, C_IN, H, W), dtype=jnp.float32)
    params = make_osblock_params(kp, C_IN, C_OUT)

    ref = osblock_reference(x, params)

    # f32 path: tight(ish) check of the kernel math itself.
    out_f32 = jax.block_until_ready(
        osblock_forward(x, params, compute_dtype=jnp.float32))
    assert out_f32.shape == ref.shape == (N, C_OUT, H, W)
    assert jnp.allclose(out_f32, ref, atol=2e-2, rtol=2e-2), \
        float(jnp.max(jnp.abs(out_f32 - ref)))

    # bf16 fast path (default): loose tolerance, sized for bf16 rounding of the
    # intermediate activations across the ~12 fused layers of the block.
    out_bf16 = jax.block_until_ready(osblock_forward(x, params))
    assert out_bf16.shape == ref.shape
    assert jnp.allclose(out_bf16, ref, atol=1e-1, rtol=1e-1), \
        float(jnp.max(jnp.abs(out_bf16 - ref)))

    print("KERNEL_OK")
</pallas_src>

<mosaic_0001>
module attributes {stable_mosaic.version = 11 : i64} {
  func.func @_pw_affine_kernel(%arg0: i32, %arg1: i32, %arg2: memref<1x16x256xf32, #tpu.memory_space<vmem>>, %arg3: memref<16x16xf32, #tpu.memory_space<vmem>>, %arg4: memref<16x1xf32, #tpu.memory_space<vmem>>, %arg5: memref<16x1xf32, #tpu.memory_space<vmem>>, %arg6: memref<1x16x256xf32, #tpu.memory_space<vmem>>) attributes {dimension_semantics = [#tpu.dimension_semantics<parallel>, #tpu.dimension_semantics<parallel>], iteration_bounds = array<i64: 2, 1>, scalar_prefetch = 0 : i64, scratch_operands = 0 : i64, tpu.core_type = #tpu.core_type<tc>, window_params = [{transform_indices = @transform_0, window_bounds = array<i64: 1, 16, 256>}, {pipeline_mode = #tpu.pipeline_mode<synchronous>, transform_indices = @transform_1, window_bounds = array<i64: 16, 16>}, {pipeline_mode = #tpu.pipeline_mode<synchronous>, transform_indices = @transform_2, window_bounds = array<i64: 16, 1>}, {pipeline_mode = #tpu.pipeline_mode<synchronous>, transform_indices = @transform_3, window_bounds = array<i64: 16, 1>}, {transform_indices = @transform_4, window_bounds = array<i64: 1, 16, 256>}]} {
    %c0 = arith.constant 0 : index
    %c0_0 = arith.constant 0 : index
    %0 = vector.load %arg3[%c0, %c0_0] : memref<16x16xf32, #tpu.memory_space<vmem>>, vector<16x16xf32>
    %c0_1 = arith.constant 0 : index
    %c0_2 = arith.constant 0 : index
    %c0_3 = arith.constant 0 : index
    %1 = vector.load %arg2[%c0_1, %c0_2, %c0_3] : memref<1x16x256xf32, #tpu.memory_space<vmem>>, vector<1x16x256xf32>
    %2 = vector.shape_cast %1 : vector<1x16x256xf32> to vector<16x256xf32>
    %cst = arith.constant dense<0.000000e+00> : vector<16x256xf32>
    %3 = tpu.matmul %0, %2, %cst {dimension_numbers = #tpu.dot_dimension_numbers<[1], [0], [0], [1], [0, 0, 1, 1], [], []>} : vector<16x16xf32>, vector<16x256xf32>, vector<16x256xf32> -> vector<16x256xf32>
    %c0_4 = arith.constant 0 : index
    %c0_5 = arith.constant 0 : index
    %4 = vector.load %arg4[%c0_4, %c0_5] : memref<16x1xf32, #tpu.memory_space<vmem>>, vector<16x1xf32>
    %5 = vector.broadcast %4 : vector<16x1xf32> to vector<16x256xf32>
    %6 = arith.mulf %3, %5 : vector<16x256xf32>
    %c0_6 = arith.constant 0 : index
    %c0_7 = arith.constant 0 : index
    %7 = vector.load %arg5[%c0_6, %c0_7] : memref<16x1xf32, #tpu.memory_space<vmem>>, vector<16x1xf32>
    %8 = vector.broadcast %7 : vector<16x1xf32> to vector<16x256xf32>
    %9 = arith.addf %6, %8 : vector<16x256xf32>
    %cst_8 = arith.constant 0.000000e+00 : f32
    %10 = vector.broadcast %cst_8 : f32 to vector<16x256xf32>
    %11 = arith.maximumf %9, %10 : vector<16x256xf32>
    %c0_9 = arith.constant 0 : index
    %c0_10 = arith.constant 0 : index
    %c0_11 = arith.constant 0 : index
    %12 = vector.load %arg6[%c0_9, %c0_10, %c0_11] : memref<1x16x256xf32, #tpu.memory_space<vmem>>, vector<1x16x256xf32>
    %13 = vector.shape_cast %12 : vector<1x16x256xf32> to vector<16x256xf32>
    %14 = vector.shape_cast %11 : vector<16x256xf32> to vector<1x16x256xf32>
    tpu.vector_store %arg6[%c0_9, %c0_10, %c0_11], %14 {strides = array<i32>} : memref<1x16x256xf32, #tpu.memory_space<vmem>>, vector<1x16x256xf32>,
    return
  }
  func.func @transform_0(%arg0: i32, %arg1: i32) -> (i32, i32, i32) {
    %c0_i32 = arith.constant 0 : i32
    %c0_i32_0 = arith.constant 0 : i32
    return %arg0, %c0_i32, %arg1 : i32, i32, i32
  }
  func.func @transform_1(%arg0: i32, %arg1: i32) -> (i32, i32) {
    %c0_i32 = arith.constant 0 : i32
    %c0_i32_0 = arith.constant 0 : i32
    %c0_i32_1 = arith.constant 0 : i32
    return %c0_i32, %c0_i32_0 : i32, i32
  }
  func.func @transform_2(%arg0: i32, %arg1: i32) -> (i32, i32) {
    %c0_i32 = arith.constant 0 : i32
    %c0_i32_0 = arith.constant 0 : i32
    %c0_i32_1 = arith.constant 0 : i32
    return %c0_i32, %c0_i32_0 : i32, i32
  }
  func.func @transform_3(%arg0: i32, %arg1: i32) -> (i32, i32) {
    %c0_i32 = arith.constant 0 : i32
    %c0_i32_0 = arith.constant 0 : i32
    %c0_i32_1 = arith.constant 0 : i32
    return %c0_i32, %c0_i32_0 : i32, i32
  }
  func.func @transform_4(%arg0: i32, %arg1: i32) -> (i32, i32, i32) {
    %c0_i32 = arith.constant 0 : i32
    %c0_i32_0 = arith.constant 0 : i32
    return %arg0, %c0_i32, %arg1 : i32, i32, i32
  }
}

module attributes {stable_mosaic.version = 11 : i64} {
  func.func @_light_conv_kernel(%arg0: i32, %arg1: memref<1x16x256xf32, #tpu.memory_space<vmem>>, %arg2: memref<16x16xf32, #tpu.memory_space<vmem>>, %arg3: memref<9x16x1xf32, #tpu.memory_space<vmem>>, %arg4: memref<9x1x256xf32, #tpu.memory_space<vmem>>, %arg5: memref<16x1xf32, #tpu.memory_space<vmem>>, %arg6: memref<16x1xf32, #tpu.memory_space<vmem>>, %arg7: memref<1x16x256xf32, #tpu.memory_space<vmem>>, %arg8: memref<1x16x1xf32, #tpu.memory_space<vmem>>) attributes {dimension_semantics = [#tpu.dimension_semantics<parallel>], iteration_bounds = array<i64: 2>, scalar_prefetch = 0 : i64, scratch_operands = 0 : i64, tpu.core_type = #tpu.core_type<tc>, window_params = [{transform_indices = @transform_0, window_bounds = array<i64: 1, 16, 256>}, {pipeline_mode = #tpu.pipeline_mode<synchronous>, transform_indices = @transform_1, window_bounds = array<i64: 16, 16>}, {pipeline_mode = #tpu.pipeline_mode<synchronous>, transform_indices = @transform_2, window_bounds = array<i64: 9, 16, 1>}, {pipeline_mode = #tpu.pipeline_mode<synchronous>, transform_indices = @transform_3, window_bounds = array<i64: 9, 1, 256>}, {pipeline_mode = #tpu.pipeline_mode<synchronous>, transform_indices = @transform_4, window_bounds = array<i64: 16, 1>}, {pipeline_mode = #tpu.pipeline_mode<synchronous>, transform_indices = @transform_5, window_bounds = array<i64: 16, 1>}, {transform_indices = @transform_6, window_bounds = array<i64: 1, 16, 256>}, {transform_indices = @transform_7, window_bounds = array<i64: 1, 16, 1>}]} {
    %c0 = arith.constant 0 : index
    %c0_0 = arith.constant 0 : index
    %0 = vector.load %arg2[%c0, %c0_0] : memref<16x16xf32, #tpu.memory_space<vmem>>, vector<16x16xf32>
    %c0_1 = arith.constant 0 : index
    %c0_2 = arith.constant 0 : index
    %c0_3 = arith.constant 0 : index
    %1 = vector.load %arg1[%c0_1, %c0_2, %c0_3] : memref<1x16x256xf32, #tpu.memory_space<vmem>>, vector<1x16x256xf32>
    %2 = vector.shape_cast %1 : vector<1x16x256xf32> to vector<16x256xf32>
    %cst = arith.constant dense<0.000000e+00> : vector<16x256xf32>
    %3 = tpu.matmul %0, %2, %cst {dimension_numbers = #tpu.dot_dimension_numbers<[1], [0], [0], [1], [0, 0, 1, 1], [], []>} : vector<16x16xf32>, vector<16x256xf32>, vector<16x256xf32> -> vector<16x256xf32>
    %c0_4 = arith.constant 0 : index
    %c0_5 = arith.constant 0 : index
    %c0_6 = arith.constant 0 : index
    %4 = vector.load %arg3[%c0_4, %c0_5, %c0_6] : memref<9x16x1xf32, #tpu.memory_space<vmem>>, vector<9x16x1xf32>
    %c0_7 = arith.constant 0 : index
    %c0_8 = arith.constant 0 : index
    %c0_9 = arith.constant 0 : index
    %5 = vector.load %arg4[%c0_7, %c0_8, %c0_9] : memref<9x1x256xf32, #tpu.memory_space<vmem>>, vector<9x1x256xf32>
    %cst_10 = arith.constant 0.000000e+00 : f32
    %6 = vector.broadcast %cst_10 : f32 to vector<16x256xf32>
    %c17_i32 = arith.constant 17 : i32
    %7 = tpu.dynamic_rotate %3 by %c17_i32 dim 1 : vector<16x256xf32>, i32 -> vector<16x256xf32>
    %8 = vector.extract_strided_slice %4 {offsets = [0, 0, 0], sizes = [1, 16, 1], strides = [1, 1, 1]} : vector<9x16x1xf32> to vector<1x16x1xf32>
    %9 = vector.shape_cast %8 : vector<1x16x1xf32> to vector<16x1xf32>
    %10 = vector.extract_strided_slice %5 {offsets = [0, 0, 0], sizes = [1, 1, 256], strides = [1, 1, 1]} : vector<9x1x256xf32> to vector<1x1x256xf32>
    %11 = vector.shape_cast %10 : vector<1x1x256xf32> to vector<1x256xf32>
    %12 = vector.broadcast %11 : vector<1x256xf32> to vector<16x256xf32>
    %13 = arith.mulf %7, %12 : vector<16x256xf32>
    %14 = vector.broadcast %9 : vector<16x1xf32> to vector<16x256xf32>
    %15 = arith.mulf %14, %13 : vector<16x256xf32>
    %16 = arith.addf %6, %15 : vector<16x256xf32>
    %c16_i32 = arith.constant 16 : i32
    %17 = tpu.dynamic_rotate %3 by %c16_i32 dim 1 : vector<16x256xf32>, i32 -> vector<16x256xf32>
    %18 = vector.extract_strided_slice %4 {offsets = [1, 0, 0], sizes = [1, 16, 1], strides = [1, 1, 1]} : vector<9x16x1xf32> to vector<1x16x1xf32>
    %19 = vector.shape_cast %18 : vector<1x16x1xf32> to vector<16x1xf32>
    %20 = vector.extract_strided_slice %5 {offsets = [1, 0, 0], sizes = [1, 1, 256], strides = [1, 1, 1]} : vector<9x1x256xf32> to vector<1x1x256xf32>
    %21 = vector.shape_cast %20 : vector<1x1x256xf32> to vector<1x256xf32>
    %22 = vector.broadcast %21 : vector<1x256xf32> to vector<16x256xf32>
    %23 = arith.mulf %17, %22 : vector<16x256xf32>
    %24 = vector.broadcast %19 : vector<16x1xf32> to vector<16x256xf32>
    %25 = arith.mulf %24, %23 : vector<16x256xf32>
    %26 = arith.addf %16, %25 : vector<16x256xf32>
    %c15_i32 = arith.constant 15 : i32
    %27 = tpu.dynamic_rotate %3 by %c15_i32 dim 1 : vector<16x256xf32>, i32 -> vector<16x256xf32>
    %28 = vector.extract_strided_slice %4 {offsets = [2, 0, 0], sizes = [1, 16, 1], strides = [1, 1, 1]} : vector<9x16x1xf32> to vector<1x16x1xf32>
    %29 = vector.shape_cast %28 : vector<1x16x1xf32> to vector<16x1xf32>
    %30 = vector.extract_strided_slice %5 {offsets = [2, 0, 0], sizes = [1, 1, 256], strides = [1, 1, 1]} : vector<9x1x256xf32> to vector<1x1x256xf32>
    %31 = vector.shape_cast %30 : vector<1x1x256xf32> to vector<1x256xf32>
    %32 = vector.broadcast %31 : vector<1x256xf32> to vector<16x256xf32>
    %33 = arith.mulf %27, %32 : vector<16x256xf32>
    %34 = vector.broadcast %29 : vector<16x1xf32> to vector<16x256xf32>
    %35 = arith.mulf %34, %33 : vector<16x256xf32>
    %36 = arith.addf %26, %35 : vector<16x256xf32>
    %c1_i32 = arith.constant 1 : i32
    %37 = tpu.dynamic_rotate %3 by %c1_i32 dim 1 : vector<16x256xf32>, i32 -> vector<16x256xf32>
    %38 = vector.extract_strided_slice %4 {offsets = [3, 0, 0], sizes = [1, 16, 1], strides = [1, 1, 1]} : vector<9x16x1xf32> to vector<1x16x1xf32>
    %39 = vector.shape_cast %38 : vector<1x16x1xf32> to vector<16x1xf32>
    %40 = vector.extract_strided_slice %5 {offsets = [3, 0, 0], sizes = [1, 1, 256], strides = [1, 1, 1]} : vector<9x1x256xf32> to vector<1x1x256xf32>
    %41 = vector.shape_cast %40 : vector<1x1x256xf32> to vector<1x256xf32>
    %42 = vector.broadcast %41 : vector<1x256xf32> to vector<16x256xf32>
    %43 = arith.mulf %37, %42 : vector<16x256xf32>
    %44 = vector.broadcast %39 : vector<16x1xf32> to vector<16x256xf32>
    %45 = arith.mulf %44, %43 : vector<16x256xf32>
    %46 = arith.addf %36, %45 : vector<16x256xf32>
    %47 = vector.extract_strided_slice %4 {offsets = [4, 0, 0], sizes = [1, 16, 1], strides = [1, 1, 1]} : vector<9x16x1xf32> to vector<1x16x1xf32>
    %48 = vector.shape_cast %47 : vector<1x16x1xf32> to vector<16x1xf32>
    %49 = vector.extract_strided_slice %5 {offsets = [4, 0, 0], sizes = [1, 1, 256], strides = [1, 1, 1]} : vector<9x1x256xf32> to vector<1x1x256xf32>
    %50 = vector.shape_cast %49 : vector<1x1x256xf32> to vector<1x256xf32>
    %51 = vector.broadcast %50 : vector<1x256xf32> to vector<16x256xf32>
    %52 = arith.mulf %3, %51 : vector<16x256xf32>
    %53 = vector.broadcast %48 : vector<16x1xf32> to vector<16x256xf32>
    %54 = arith.mulf %53, %52 : vector<16x256xf32>
    %55 = arith.addf %46, %54 : vector<16x256xf32>
    %c255_i32 = arith.constant 255 : i32
    %56 = tpu.dynamic_rotate %3 by %c255_i32 dim 1 : vector<16x256xf32>, i32 -> vector<16x256xf32>
    %57 = vector.extract_strided_slice %4 {offsets = [5, 0, 0], sizes = [1, 16, 1], strides = [1, 1, 1]} : vector<9x16x1xf32> to vector<1x16x1xf32>
    %58 = vector.shape_cast %57 : vector<1x16x1xf32> to vector<16x1xf32>
    %59 = vector.extract_strided_slice %5 {offsets = [5, 0, 0], sizes = [1, 1, 256], strides = [1, 1, 1]} : vector<9x1x256xf32> to vector<1x1x256xf32>
    %60 = vector.shape_cast %59 : vector<1x1x256xf32> to vector<1x256xf32>
    %61 = vector.broadcast %60 : vector<1x256xf32> to vector<16x256xf32>
    %62 = arith.mulf %56, %61 : vector<16x256xf32>
    %63 = vector.broadcast %58 : vector<16x1xf32> to vector<16x256xf32>
    %64 = arith.mulf %63, %62 : vector<16x256xf32>
    %65 = arith.addf %55, %64 : vector<16x256xf32>
    %c241_i32 = arith.constant 241 : i32
    %66 = tpu.dynamic_rotate %3 by %c241_i32 dim 1 : vector<16x256xf32>, i32 -> vector<16x256xf32>
    %67 = vector.extract_strided_slice %4 {offsets = [6, 0, 0], sizes = [1, 16, 1], strides = [1, 1, 1]} : vector<9x16x1xf32> to vector<1x16x1xf32>
    %68 = vector.shape_cast %67 : vector<1x16x1xf32> to vector<16x1xf32>
    %69 = vector.extract_strided_slice %5 {offsets = [6, 0, 0], sizes = [1, 1, 256], strides = [1, 1, 1]} : vector<9x1x256xf32> to vector<1x1x256xf32>
    %70 = vector.shape_cast %69 : vector<1x1x256xf32> to vector<1x256xf32>
    %71 = vector.broadcast %70 : vector<1x256xf32> to vector<16x256xf32>
    %72 = arith.mulf %66, %71 : vector<16x256xf32>
    %73 = vector.broadcast %68 : vector<16x1xf32> to vector<16x256xf32>
    %74 = arith.mulf %73, %72 : vector<16x256xf32>
    %75 = arith.addf %65, %74 : vector<16x256xf32>
    %c240_i32 = arith.constant 240 : i32
    %76 = tpu.dynamic_rotate %3 by %c240_i32 dim 1 : vector<16x256xf32>, i32 -> vector<16x256xf32>
    %77 = vector.extract_strided_slice %4 {offsets = [7, 0, 0], sizes = [1, 16, 1], strides = [1, 1, 1]} : vector<9x16x1xf32> to vector<1x16x1xf32>
    %78 = vector.shape_cast %77 : vector<1x16x1xf32> to vector<16x1xf32>
    %79 = vector.extract_strided_slice %5 {offsets = [7, 0, 0], sizes = [1, 1, 256], strides = [1, 1, 1]} : vector<9x1x256xf32> to vector<1x1x256xf32>
    %80 = vector.shape_cast %79 : vector<1x1x256xf32> to vector<1x256xf32>
    %81 = vector.broadcast %80 : vector<1x256xf32> to vector<16x256xf32>
    %82 = arith.mulf %76, %81 : vector<16x256xf32>
    %83 = vector.broadcast %78 : vector<16x1xf32> to vector<16x256xf32>
    %84 = arith.mulf %83, %82 : vector<16x256xf32>
    %85 = arith.addf %75, %84 : vector<16x256xf32>
    %c239_i32 = arith.constant 239 : i32
    %86 = tpu.dynamic_rotate %3 by %c239_i32 dim 1 : vector<16x256xf32>, i32 -> vector<16x256xf32>
    %87 = vector.extract_strided_slice %4 {offsets = [8, 0, 0], sizes = [1, 16, 1], strides = [1, 1, 1]} : vector<9x16x1xf32> to vector<1x16x1xf32>
    %88 = vector.shape_cast %87 : vector<1x16x1xf32> to vector<16x1xf32>
    %89 = vector.extract_strided_slice %5 {offsets = [8, 0, 0], sizes = [1, 1, 256], strides = [1, 1, 1]} : vector<9x1x256xf32> to vector<1x1x256xf32>
    %90 = vector.shape_cast %89 : vector<1x1x256xf32> to vector<1x256xf32>
    %91 = vector.broadcast %90 : vector<1x256xf32> to vector<16x256xf32>
    %92 = arith.mulf %86, %91 : vector<16x256xf32>
    %93 = vector.broadcast %88 : vector<16x1xf32> to vector<16x256xf32>
    %94 = arith.mulf %93, %92 : vector<16x256xf32>
    %95 = arith.addf %85, %94 : vector<16x256xf32>
    %c0_11 = arith.constant 0 : index
    %c0_12 = arith.constant 0 : index
    %96 = vector.load %arg5[%c0_11, %c0_12] : memref<16x1xf32, #tpu.memory_space<vmem>>, vector<16x1xf32>
    %97 = vector.broadcast %96 : vector<16x1xf32> to vector<16x256xf32>
    %98 = arith.mulf %95, %97 : vector<16x256xf32>
    %c0_13 = arith.constant 0 : index
    %c0_14 = arith.constant 0 : index
    %99 = vector.load %arg6[%c0_13, %c0_14] : memref<16x1xf32, #tpu.memory_space<vmem>>, vector<16x1xf32>
    %100 = vector.broadcast %99 : vector<16x1xf32> to vector<16x256xf32>
    %101 = arith.addf %98, %100 : vector<16x256xf32>
    %cst_15 = arith.constant 0.000000e+00 : f32
    %102 = vector.broadcast %cst_15 : f32 to vector<16x256xf32>
    %103 = arith.maximumf %101, %102 : vector<16x256xf32>
    %c0_16 = arith.constant 0 : index
    %c0_17 = arith.constant 0 : index
    %c0_18 = arith.constant 0 : index
    %104 = vector.load %arg7[%c0_16, %c0_17, %c0_18] : memref<1x16x256xf32, #tpu.memory_space<vmem>>, vector<1x16x256xf32>
    %105 = vector.shape_cast %104 : vector<1x16x256xf32> to vector<16x256xf32>
    %106 = vector.shape_cast %103 : vector<16x256xf32> to vector<1x16x256xf32>
    tpu.vector_store %arg7[%c0_16, %c0_17, %c0_18], %106 {strides = array<i32>} : memref<1x16x256xf32, #tpu.memory_space<vmem>>, vector<1x16x256xf32>,
    %cst_19 = arith.constant dense<0.000000e+00> : vector<16xf32>
    %107 = vector.multi_reduction <add>, %103, %cst_19 [1] : vector<16x256xf32> to vector<16xf32>
    %108 = vector.shape_cast %107 : vector<16xf32> to vector<16x1xf32>
    %cst_20 = arith.constant 2.560000e+02 : f32
    %109 = vector.broadcast %cst_20 : f32 to vector<16x1xf32>
    %110 = arith.divf %108, %109 : vector<16x1xf32>
    %c0_21 = arith.constant 0 : index
    %c0_22 = arith.constant 0 : index
    %c0_23 = arith.constant 0 : index
    %111 = vector.load %arg8[%c0_21, %c0_22, %c0_23] : memref<1x16x1xf32, #tpu.memory_space<vmem>>, vector<1x16x1xf32>
    %112 = vector.shape_cast %111 : vector<1x16x1xf32> to vector<16x1xf32>
    %113 = vector.shape_cast %110 : vector<16x1xf32> to vector<1x16x1xf32>
    tpu.vector_store %arg8[%c0_21, %c0_22, %c0_23], %113 {strides = array<i32>} : memref<1x16x1xf32, #tpu.memory_space<vmem>>, vector<1x16x1xf32>,
    return
  }
  func.func @transform_0(%arg0: i32) -> (i32, i32, i32) {
    %c0_i32 = arith.constant 0 : i32
    %c0_i32_0 = arith.constant 0 : i32
    %c0_i32_1 = arith.constant 0 : i32
    return %arg0, %c0_i32, %c0_i32_0 : i32, i32, i32
  }
  func.func @transform_1(%arg0: i32) -> (i32, i32) {
    %c0_i32 = arith.constant 0 : i32
    %c0_i32_0 = arith.constant 0 : i32
    %c0_i32_1 = arith.constant 0 : i32
    return %c0_i32, %c0_i32_0 : i32, i32
  }
  func.func @transform_2(%arg0: i32) -> (i32, i32, i32) {
    %c0_i32 = arith.constant 0 : i32
    %c0_i32_0 = arith.constant 0 : i32
    %c0_i32_1 = arith.constant 0 : i32
    %c0_i32_2 = arith.constant 0 : i32
    return %c0_i32, %c0_i32_0, %c0_i32_1 : i32, i32, i32
  }
  func.func @transform_3(%arg0: i32) -> (i32, i32, i32) {
    %c0_i32 = arith.constant 0 : i32
    %c0_i32_0 = arith.constant 0 : i32
    %c0_i32_1 = arith.constant 0 : i32
    %c0_i32_2 = arith.constant 0 : i32
    return %c0_i32, %c0_i32_0, %c0_i32_1 : i32, i32, i32
  }
  func.func @transform_4(%arg0: i32) -> (i32, i32) {
    %c0_i32 = arith.constant 0 : i32
    %c0_i32_0 = arith.constant 0 : i32
    %c0_i32_1 = arith.constant 0 : i32
    return %c0_i32, %c0_i32_0 : i32, i32
  }
  func.func @transform_5(%arg0: i32) -> (i32, i32) {
    %c0_i32 = arith.constant 0 : i32
    %c0_i32_0 = arith.constant 0 : i32
    %c0_i32_1 = arith.constant 0 : i32
    return %c0_i32, %c0_i32_0 : i32, i32
  }
  func.func @transform_6(%arg0: i32) -> (i32, i32, i32) {
    %c0_i32 = arith.constant 0 : i32
    %c0_i32_0 = arith.constant 0 : i32
    %c0_i32_1 = arith.constant 0 : i32
    return %arg0, %c0_i32, %c0_i32_0 : i32, i32, i32
  }
  func.func @transform_7(%arg0: i32) -> (i32, i32, i32) {
    %c0_i32 = arith.constant 0 : i32
    %c0_i32_0 = arith.constant 0 : i32
    %c0_i32_1 = arith.constant 0 : i32
    return %arg0, %c0_i32, %c0_i32_0 : i32, i32, i32
  }
}

module attributes {stable_mosaic.version = 11 : i64} {
  func.func @_light_conv_kernel(%arg0: i32, %arg1: memref<1x16x256xf32, #tpu.memory_space<vmem>>, %arg2: memref<16x16xf32, #tpu.memory_space<vmem>>, %arg3: memref<9x16x1xf32, #tpu.memory_space<vmem>>, %arg4: memref<9x1x256xf32, #tpu.memory_space<vmem>>, %arg5: memref<16x1xf32, #tpu.memory_space<vmem>>, %arg6: memref<16x1xf32, #tpu.memory_space<vmem>>, %arg7: memref<1x16x256xf32, #tpu.memory_space<vmem>>, %arg8: memref<1x16x1xf32, #tpu.memory_space<vmem>>) attributes {dimension_semantics = [#tpu.dimension_semantics<parallel>], iteration_bounds = array<i64: 2>, scalar_prefetch = 0 : i64, scratch_operands = 0 : i64, tpu.core_type = #tpu.core_type<tc>, window_params = [{transform_indices = @transform_0, window_bounds = array<i64: 1, 16, 256>}, {pipeline_mode = #tpu.pipeline_mode<synchronous>, transform_indices = @transform_1, window_bounds = array<i64: 16, 16>}, {pipeline_mode = #tpu.pipeline_mode<synchronous>, transform_indices = @transform_2, window_bounds = array<i64: 9, 16, 1>}, {pipeline_mode = #tpu.pipeline_mode<synchronous>, transform_indices = @transform_3, window_bounds = array<i64: 9, 1, 256>}, {pipeline_mode = #tpu.pipeline_mode<synchronous>, transform_indices = @transform_4, window_bounds = array<i64: 16, 1>}, {pipeline_mode = #tpu.pipeline_mode<synchronous>, transform_indices = @transform_5, window_bounds = array<i64: 16, 1>}, {transform_indices = @transform_6, window_bounds = array<i64: 1, 16, 256>}, {transform_indices = @transform_7, window_bounds = array<i64: 1, 16, 1>}]} {
    %c0 = arith.constant 0 : index
    %c0_0 = arith.constant 0 : index
    %0 = vector.load %arg2[%c0, %c0_0] : memref<16x16xf32, #tpu.memory_space<vmem>>, vector<16x16xf32>
    %c0_1 = arith.constant 0 : index
    %c0_2 = arith.constant 0 : index
    %c0_3 = arith.constant 0 : index
    %1 = vector.load %arg1[%c0_1, %c0_2, %c0_3] : memref<1x16x256xf32, #tpu.memory_space<vmem>>, vector<1x16x256xf32>
    %2 = vector.shape_cast %1 : vector<1x16x256xf32> to vector<16x256xf32>
    %cst = arith.constant dense<0.000000e+00> : vector<16x256xf32>
    %3 = tpu.matmul %0, %2, %cst {dimension_numbers = #tpu.dot_dimension_numbers<[1], [0], [0], [1], [0, 0, 1, 1], [], []>} : vector<16x16xf32>, vector<16x256xf32>, vector<16x256xf32> -> vector<16x256xf32>
    %c0_4 = arith.constant 0 : index
    %c0_5 = arith.constant 0 : index
    %c0_6 = arith.constant 0 : index
    %4 = vector.load %arg3[%c0_4, %c0_5, %c0_6] : memref<9x16x1xf32, #tpu.memory_space<vmem>>, vector<9x16x1xf32>
    %c0_7 = arith.constant 0 : index
    %c0_8 = arith.constant 0 : index
    %c0_9 = arith.constant 0 : index
    %5 = vector.load %arg4[%c0_7, %c0_8, %c0_9] : memref<9x1x256xf32, #tpu.memory_space<vmem>>, vector<9x1x256xf32>
    %cst_10 = arith.constant 0.000000e+00 : f32
    %6 = vector.broadcast %cst_10 : f32 to vector<16x256xf32>
    %c17_i32 = arith.constant 17 : i32
    %7 = tpu.dynamic_rotate %3 by %c17_i32 dim 1 : vector<16x256xf32>, i32 -> vector<16x256xf32>
    %8 = vector.extract_strided_slice %4 {offsets = [0, 0, 0], sizes = [1, 16, 1], strides = [1, 1, 1]} : vector<9x16x1xf32> to vector<1x16x1xf32>
    %9 = vector.shape_cast %8 : vector<1x16x1xf32> to vector<16x1xf32>
    %10 = vector.extract_strided_slice %5 {offsets = [0, 0, 0], sizes = [1, 1, 256], strides = [1, 1, 1]} : vector<9x1x256xf32> to vector<1x1x256xf32>
    %11 = vector.shape_cast %10 : vector<1x1x256xf32> to vector<1x256xf32>
    %12 = vector.broadcast %11 : vector<1x256xf32> to vector<16x256xf32>
    %13 = arith.mulf %7, %12 : vector<16x256xf32>
    %14 = vector.broadcast %9 : vector<16x1xf32> to vector<16x256xf32>
    %15 = arith.mulf %14, %13 : vector<16x256xf32>
    %16 = arith.addf %6, %15 : vector<16x256xf32>
    %c16_i32 = arith.constant 16 : i32
    %17 = tpu.dynamic_rotate %3 by %c16_i32 dim 1 : vector<16x256xf32>, i32 -> vector<16x256xf32>
    %18 = vector.extract_strided_slice %4 {offsets = [1, 0, 0], sizes = [1, 16, 1], strides = [1, 1, 1]} : vector<9x16x1xf32> to vector<1x16x1xf32>
    %19 = vector.shape_cast %18 : vector<1x16x1xf32> to vector<16x1xf32>
    %20 = vector.extract_strided_slice %5 {offsets = [1, 0, 0], sizes = [1, 1, 256], strides = [1, 1, 1]} : vector<9x1x256xf32> to vector<1x1x256xf32>
    %21 = vector.shape_cast %20 : vector<1x1x256xf32> to vector<1x256xf32>
    %22 = vector.broadcast %21 : vector<1x256xf32> to vector<16x256xf32>
    %23 = arith.mulf %17, %22 : vector<16x256xf32>
    %24 = vector.broadcast %19 : vector<16x1xf32> to vector<16x256xf32>
    %25 = arith.mulf %24, %23 : vector<16x256xf32>
    %26 = arith.addf %16, %25 : vector<16x256xf32>
    %c15_i32 = arith.constant 15 : i32
    %27 = tpu.dynamic_rotate %3 by %c15_i32 dim 1 : vector<16x256xf32>, i32 -> vector<16x256xf32>
    %28 = vector.extract_strided_slice %4 {offsets = [2, 0, 0], sizes = [1, 16, 1], strides = [1, 1, 1]} : vector<9x16x1xf32> to vector<1x16x1xf32>
    %29 = vector.shape_cast %28 : vector<1x16x1xf32> to vector<16x1xf32>
    %30 = vector.extract_strided_slice %5 {offsets = [2, 0, 0], sizes = [1, 1, 256], strides = [1, 1, 1]} : vector<9x1x256xf32> to vector<1x1x256xf32>
    %31 = vector.shape_cast %30 : vector<1x1x256xf32> to vector<1x256xf32>
    %32 = vector.broadcast %31 : vector<1x256xf32> to vector<16x256xf32>
    %33 = arith.mulf %27, %32 : vector<16x256xf32>
    %34 = vector.broadcast %29 : vector<16x1xf32> to vector<16x256xf32>
    %35 = arith.mulf %34, %33 : vector<16x256xf32>
    %36 = arith.addf %26, %35 : vector<16x256xf32>
    %c1_i32 = arith.constant 1 : i32
    %37 = tpu.dynamic_rotate %3 by %c1_i32 dim 1 : vector<16x256xf32>, i32 -> vector<16x256xf32>
    %38 = vector.extract_strided_slice %4 {offsets = [3, 0, 0], sizes = [1, 16, 1], strides = [1, 1, 1]} : vector<9x16x1xf32> to vector<1x16x1xf32>
    %39 = vector.shape_cast %38 : vector<1x16x1xf32> to vector<16x1xf32>
    %40 = vector.extract_strided_slice %5 {offsets = [3, 0, 0], sizes = [1, 1, 256], strides = [1, 1, 1]} : vector<9x1x256xf32> to vector<1x1x256xf32>
    %41 = vector.shape_cast %40 : vector<1x1x256xf32> to vector<1x256xf32>
    %42 = vector.broadcast %41 : vector<1x256xf32> to vector<16x256xf32>
    %43 = arith.mulf %37, %42 : vector<16x256xf32>
    %44 = vector.broadcast %39 : vector<16x1xf32> to vector<16x256xf32>
    %45 = arith.mulf %44, %43 : vector<16x256xf32>
    %46 = arith.addf %36, %45 : vector<16x256xf32>
    %47 = vector.extract_strided_slice %4 {offsets = [4, 0, 0], sizes = [1, 16, 1], strides = [1, 1, 1]} : vector<9x16x1xf32> to vector<1x16x1xf32>
    %48 = vector.shape_cast %47 : vector<1x16x1xf32> to vector<16x1xf32>
    %49 = vector.extract_strided_slice %5 {offsets = [4, 0, 0], sizes = [1, 1, 256], strides = [1, 1, 1]} : vector<9x1x256xf32> to vector<1x1x256xf32>
    %50 = vector.shape_cast %49 : vector<1x1x256xf32> to vector<1x256xf32>
    %51 = vector.broadcast %50 : vector<1x256xf32> to vector<16x256xf32>
    %52 = arith.mulf %3, %51 : vector<16x256xf32>
    %53 = vector.broadcast %48 : vector<16x1xf32> to vector<16x256xf32>
    %54 = arith.mulf %53, %52 : vector<16x256xf32>
    %55 = arith.addf %46, %54 : vector<16x256xf32>
    %c255_i32 = arith.constant 255 : i32
    %56 = tpu.dynamic_rotate %3 by %c255_i32 dim 1 : vector<16x256xf32>, i32 -> vector<16x256xf32>
    %57 = vector.extract_strided_slice %4 {offsets = [5, 0, 0], sizes = [1, 16, 1], strides = [1, 1, 1]} : vector<9x16x1xf32> to vector<1x16x1xf32>
    %58 = vector.shape_cast %57 : vector<1x16x1xf32> to vector<16x1xf32>
    %59 = vector.extract_strided_slice %5 {offsets = [5, 0, 0], sizes = [1, 1, 256], strides = [1, 1, 1]} : vector<9x1x256xf32> to vector<1x1x256xf32>
    %60 = vector.shape_cast %59 : vector<1x1x256xf32> to vector<1x256xf32>
    %61 = vector.broadcast %60 : vector<1x256xf32> to vector<16x256xf32>
    %62 = arith.mulf %56, %61 : vector<16x256xf32>
    %63 = vector.broadcast %58 : vector<16x1xf32> to vector<16x256xf32>
    %64 = arith.mulf %63, %62 : vector<16x256xf32>
    %65 = arith.addf %55, %64 : vector<16x256xf32>
    %c241_i32 = arith.constant 241 : i32
    %66 = tpu.dynamic_rotate %3 by %c241_i32 dim 1 : vector<16x256xf32>, i32 -> vector<16x256xf32>
    %67 = vector.extract_strided_slice %4 {offsets = [6, 0, 0], sizes = [1, 16, 1], strides = [1, 1, 1]} : vector<9x16x1xf32> to vector<1x16x1xf32>
    %68 = vector.shape_cast %67 : vector<1x16x1xf32> to vector<16x1xf32>
    %69 = vector.extract_strided_slice %5 {offsets = [6, 0, 0], sizes = [1, 1, 256], strides = [1, 1, 1]} : vector<9x1x256xf32> to vector<1x1x256xf32>
    %70 = vector.shape_cast %69 : vector<1x1x256xf32> to vector<1x256xf32>
    %71 = vector.broadcast %70 : vector<1x256xf32> to vector<16x256xf32>
    %72 = arith.mulf %66, %71 : vector<16x256xf32>
    %73 = vector.broadcast %68 : vector<16x1xf32> to vector<16x256xf32>
    %74 = arith.mulf %73, %72 : vector<16x256xf32>
    %75 = arith.addf %65, %74 : vector<16x256xf32>
    %c240_i32 = arith.constant 240 : i32
    %76 = tpu.dynamic_rotate %3 by %c240_i32 dim 1 : vector<16x256xf32>, i32 -> vector<16x256xf32>
    %77 = vector.extract_strided_slice %4 {offsets = [7, 0, 0], sizes = [1, 16, 1], strides = [1, 1, 1]} : vector<9x16x1xf32> to vector<1x16x1xf32>
    %78 = vector.shape_cast %77 : vector<1x16x1xf32> to vector<16x1xf32>
    %79 = vector.extract_strided_slice %5 {offsets = [7, 0, 0], sizes = [1, 1, 256], strides = [1, 1, 1]} : vector<9x1x256xf32> to vector<1x1x256xf32>
    %80 = vector.shape_cast %79 : vector<1x1x256xf32> to vector<1x256xf32>
    %81 = vector.broadcast %80 : vector<1x256xf32> to vector<16x256xf32>
    %82 = arith.mulf %76, %81 : vector<16x256xf32>
    %83 = vector.broadcast %78 : vector<16x1xf32> to vector<16x256xf32>
    %84 = arith.mulf %83, %82 : vector<16x256xf32>
    %85 = arith.addf %75, %84 : vector<16x256xf32>
    %c239_i32 = arith.constant 239 : i32
    %86 = tpu.dynamic_rotate %3 by %c239_i32 dim 1 : vector<16x256xf32>, i32 -> vector<16x256xf32>
    %87 = vector.extract_strided_slice %4 {offsets = [8, 0, 0], sizes = [1, 16, 1], strides = [1, 1, 1]} : vector<9x16x1xf32> to vector<1x16x1xf32>
    %88 = vector.shape_cast %87 : vector<1x16x1xf32> to vector<16x1xf32>
    %89 = vector.extract_strided_slice %5 {offsets = [8, 0, 0], sizes = [1, 1, 256], strides = [1, 1, 1]} : vector<9x1x256xf32> to vector<1x1x256xf32>
    %90 = vector.shape_cast %89 : vector<1x1x256xf32> to vector<1x256xf32>
    %91 = vector.broadcast %90 : vector<1x256xf32> to vector<16x256xf32>
    %92 = arith.mulf %86, %91 : vector<16x256xf32>
    %93 = vector.broadcast %88 : vector<16x1xf32> to vector<16x256xf32>
    %94 = arith.mulf %93, %92 : vector<16x256xf32>
    %95 = arith.addf %85, %94 : vector<16x256xf32>
    %c0_11 = arith.constant 0 : index
    %c0_12 = arith.constant 0 : index
    %96 = vector.load %arg5[%c0_11, %c0_12] : memref<16x1xf32, #tpu.memory_space<vmem>>, vector<16x1xf32>
    %97 = vector.broadcast %96 : vector<16x1xf32> to vector<16x256xf32>
    %98 = arith.mulf %95, %97 : vector<16x256xf32>
    %c0_13 = arith.constant 0 : index
    %c0_14 = arith.constant 0 : index
    %99 = vector.load %arg6[%c0_13, %c0_14] : memref<16x1xf32, #tpu.memory_space<vmem>>, vector<16x1xf32>
    %100 = vector.broadcast %99 : vector<16x1xf32> to vector<16x256xf32>
    %101 = arith.addf %98, %100 : vector<16x256xf32>
    %cst_15 = arith.constant 0.000000e+00 : f32
    %102 = vector.broadcast %cst_15 : f32 to vector<16x256xf32>
    %103 = arith.maximumf %101, %102 : vector<16x256xf32>
    %c0_16 = arith.constant 0 : index
    %c0_17 = arith.constant 0 : index
    %c0_18 = arith.constant 0 : index
    %104 = vector.load %arg7[%c0_16, %c0_17, %c0_18] : memref<1x16x256xf32, #tpu.memory_space<vmem>>, vector<1x16x256xf32>
    %105 = vector.shape_cast %104 : vector<1x16x256xf32> to vector<16x256xf32>
    %106 = vector.shape_cast %103 : vector<16x256xf32> to vector<1x16x256xf32>
    tpu.vector_store %arg7[%c0_16, %c0_17, %c0_18], %106 {strides = array<i32>} : memref<1x16x256xf32, #tpu.memory_space<vmem>>, vector<1x16x256xf32>,
    %cst_19 = arith.constant dense<0.000000e+00> : vector<16xf32>
    %107 = vector.multi_reduction <add>, %103, %cst_19 [1] : vector<16x256xf32> to vector<16xf32>
    %108 = vector.shape_cast %107 : vector<16xf32> to vector<16x1xf32>
    %cst_20 = arith.constant 2.560000e+02 : f32
    %109 = vector.broadcast %cst_20 : f32 to vector<16x1xf32>
    %110 = arith.divf %108, %109 : vector<16x1xf32>
    %c0_21 = arith.constant 0 : index
    %c0_22 = arith.constant 0 : index
    %c0_23 = arith.constant 0 : index
    %111 = vector.load %arg8[%c0_21, %c0_22, %c0_23] : memref<1x16x1xf32, #tpu.memory_space<vmem>>, vector<1x16x1xf32>
    %112 = vector.shape_cast %111 : vector<1x16x1xf32> to vector<16x1xf32>
    %113 = vector.shape_cast %110 : vector<16x1xf32> to vector<1x16x1xf32>
    tpu.vector_store %arg8[%c0_21, %c0_22, %c0_23], %113 {strides = array<i32>} : memref<1x16x1xf32, #tpu.memory_space<vmem>>, vector<1x16x1xf32>,
    return
  }
  func.func @transform_0(%arg0: i32) -> (i32, i32, i32) {
    %c0_i32 = arith.constant 0 : i32
    %c0_i32_0 = arith.constant 0 : i32
    %c0_i32_1 = arith.constant 0 : i32
    return %arg0, %c0_i32, %c0_i32_0 : i32, i32, i32
  }
  func.func @transform_1(%arg0: i32) -> (i32, i32) {
    %c0_i32 = arith.constant 0 : i32
    %c0_i32_0 = arith.constant 0 : i32
    %c0_i32_1 = arith.constant 0 : i32
    return %c0_i32, %c0_i32_0 : i32, i32
  }
  func.func @transform_2(%arg0: i32) -> (i32, i32, i32) {
    %c0_i32 = arith.constant 0 : i32
    %c0_i32_0 = arith.constant 0 : i32
    %c0_i32_1 = arith.constant 0 : i32
    %c0_i32_2 = arith.constant 0 : i32
    return %c0_i32, %c0_i32_0, %c0_i32_1 : i32, i32, i32
  }
  func.func @transform_3(%arg0: i32) -> (i32, i32, i32) {
    %c0_i32 = arith.constant 0 : i32
    %c0_i32_0 = arith.constant 0 : i32
    %c0_i32_1 = arith.constant 0 : i32
    %c0_i32_2 = arith.constant 0 : i32
    return %c0_i32, %c0_i32_0, %c0_i32_1 : i32, i32, i32
  }
  func.func @transform_4(%arg0: i32) -> (i32, i32) {
    %c0_i32 = arith.constant 0 : i32
    %c0_i32_0 = arith.constant 0 : i32
    %c0_i32_1 = arith.constant 0 : i32
    return %c0_i32, %c0_i32_0 : i32, i32
  }
  func.func @transform_5(%arg0: i32) -> (i32, i32) {
    %c0_i32 = arith.constant 0 : i32
    %c0_i32_0 = arith.constant 0 : i32
    %c0_i32_1 = arith.constant 0 : i32
    return %c0_i32, %c0_i32_0 : i32, i32
  }
  func.func @transform_6(%arg0: i32) -> (i32, i32, i32) {
    %c0_i32 = arith.constant 0 : i32
    %c0_i32_0 = arith.constant 0 : i32
    %c0_i32_1 = arith.constant 0 : i32
    return %arg0, %c0_i32, %c0_i32_0 : i32, i32, i32
  }
  func.func @transform_7(%arg0: i32) -> (i32, i32, i32) {
    %c0_i32 = arith.constant 0 : i32
    %c0_i32_0 = arith.constant 0 : i32
    %c0_i32_1 = arith.constant 0 : i32
    return %arg0, %c0_i32, %c0_i32_0 : i32, i32, i32
  }
}

module attributes {stable_mosaic.version = 11 : i64} {
  func.func @_pw_affine_kernel(%arg0: i32, %arg1: i32, %arg2: memref<1x16x256xf32, #tpu.memory_space<vmem>>, %arg3: memref<64x16xf32, #tpu.memory_space<vmem>>, %arg4: memref<64x1xf32, #tpu.memory_space<vmem>>, %arg5: memref<64x1xf32, #tpu.memory_space<vmem>>, %arg6: memref<1x64x256xf32, #tpu.memory_space<vmem>>) attributes {dimension_semantics = [#tpu.dimension_semantics<parallel>, #tpu.dimension_semantics<parallel>], iteration_bounds = array<i64: 2, 1>, scalar_prefetch = 0 : i64, scratch_operands = 0 : i64, tpu.core_type = #tpu.core_type<tc>, window_params = [{transform_indices = @transform_0, window_bounds = array<i64: 1, 16, 256>}, {pipeline_mode = #tpu.pipeline_mode<synchronous>, transform_indices = @transform_1, window_bounds = array<i64: 64, 16>}, {pipeline_mode = #tpu.pipeline_mode<synchronous>, transform_indices = @transform_2, window_bounds = array<i64: 64, 1>}, {pipeline_mode = #tpu.pipeline_mode<synchronous>, transform_indices = @transform_3, window_bounds = array<i64: 64, 1>}, {transform_indices = @transform_4, window_bounds = array<i64: 1, 64, 256>}]} {
    %c0 = arith.constant 0 : index
    %c0_0 = arith.constant 0 : index
    %0 = vector.load %arg3[%c0, %c0_0] : memref<64x16xf32, #tpu.memory_space<vmem>>, vector<64x16xf32>
    %c0_1 = arith.constant 0 : index
    %c0_2 = arith.constant 0 : index
    %c0_3 = arith.constant 0 : index
    %1 = vector.load %arg2[%c0_1, %c0_2, %c0_3] : memref<1x16x256xf32, #tpu.memory_space<vmem>>, vector<1x16x256xf32>
    %2 = vector.shape_cast %1 : vector<1x16x256xf32> to vector<16x256xf32>
    %cst = arith.constant dense<0.000000e+00> : vector<64x256xf32>
    %3 = tpu.matmul %0, %2, %cst {dimension_numbers = #tpu.dot_dimension_numbers<[1], [0], [0], [1], [0, 0, 1, 1], [], []>} : vector<64x16xf32>, vector<16x256xf32>, vector<64x256xf32> -> vector<64x256xf32>
    %c0_4 = arith.constant 0 : index
    %c0_5 = arith.constant 0 : index
    %4 = vector.load %arg4[%c0_4, %c0_5] : memref<64x1xf32, #tpu.memory_space<vmem>>, vector<64x1xf32>
    %5 = vector.broadcast %4 : vector<64x1xf32> to vector<64x256xf32>
    %6 = arith.mulf %3, %5 : vector<64x256xf32>
    %c0_6 = arith.constant 0 : index
    %c0_7 = arith.constant 0 : index
    %7 = vector.load %arg5[%c0_6, %c0_7] : memref<64x1xf32, #tpu.memory_space<vmem>>, vector<64x1xf32>
    %8 = vector.broadcast %7 : vector<64x1xf32> to vector<64x256xf32>
    %9 = arith.addf %6, %8 : vector<64x256xf32>
    %c0_8 = arith.constant 0 : index
    %c0_9 = arith.constant 0 : index
    %c0_10 = arith.constant 0 : index
    %10 = vector.load %arg6[%c0_8, %c0_9, %c0_10] : memref<1x64x256xf32, #tpu.memory_space<vmem>>, vector<1x64x256xf32>
    %11 = vector.shape_cast %10 : vector<1x64x256xf32> to vector<64x256xf32>
    %12 = vector.shape_cast %9 : vector<64x256xf32> to vector<1x64x256xf32>
    tpu.vector_store %arg6[%c0_8, %c0_9, %c0_10], %12 {strides = array<i32>} : memref<1x64x256xf32, #tpu.memory_space<vmem>>, vector<1x64x256xf32>,
    return
  }
  func.func @transform_0(%arg0: i32, %arg1: i32) -> (i32, i32, i32) {
    %c0_i32 = arith.constant 0 : i32
    %c0_i32_0 = arith.constant 0 : i32
    return %arg0, %c0_i32, %arg1 : i32, i32, i32
  }
  func.func @transform_1(%arg0: i32, %arg1: i32) -> (i32, i32) {
    %c0_i32 = arith.constant 0 : i32
    %c0_i32_0 = arith.constant 0 : i32
    %c0_i32_1 = arith.constant 0 : i32
    return %c0_i32, %c0_i32_0 : i32, i32
  }
  func.func @transform_2(%arg0: i32, %arg1: i32) -> (i32, i32) {
    %c0_i32 = arith.constant 0 : i32
    %c0_i32_0 = arith.constant 0 : i32
    %c0_i32_1 = arith.constant 0 : i32
    return %c0_i32, %c0_i32_0 : i32, i32
  }
  func.func @transform_3(%arg0: i32, %arg1: i32) -> (i32, i32) {
    %c0_i32 = arith.constant 0 : i32
    %c0_i32_0 = arith.constant 0 : i32
    %c0_i32_1 = arith.constant 0 : i32
    return %c0_i32, %c0_i32_0 : i32, i32
  }
  func.func @transform_4(%arg0: i32, %arg1: i32) -> (i32, i32, i32) {
    %c0_i32 = arith.constant 0 : i32
    %c0_i32_0 = arith.constant 0 : i32
    return %arg0, %c0_i32, %arg1 : i32, i32, i32
  }
}

module attributes {stable_mosaic.version = 11 : i64} {
  func.func @_gated_conv3_residual_kernel(%arg0: i32, %arg1: i32, %arg2: memref<1x4x16x1xf32, #tpu.memory_space<vmem>>, %arg3: memref<1x16x256xf32, #tpu.memory_space<vmem>>, %arg4: memref<1x16x256xf32, #tpu.memory_space<vmem>>, %arg5: memref<1x16x256xf32, #tpu.memory_space<vmem>>, %arg6: memref<1x16x256xf32, #tpu.memory_space<vmem>>, %arg7: memref<64x16xf32, #tpu.memory_space<vmem>>, %arg8: memref<64x1xf32, #tpu.memory_space<vmem>>, %arg9: memref<64x1xf32, #tpu.memory_space<vmem>>, %arg10: memref<1x64x256xf32, #tpu.memory_space<vmem>>, %arg11: memref<1x64x256xf32, #tpu.memory_space<vmem>>) attributes {dimension_semantics = [#tpu.dimension_semantics<parallel>, #tpu.dimension_semantics<parallel>], iteration_bounds = array<i64: 2, 1>, scalar_prefetch = 0 : i64, scratch_operands = 0 : i64, tpu.core_type = #tpu.core_type<tc>, window_params = [{transform_indices = @transform_0, window_bounds = array<i64: 1, 4, 16, 1>}, {transform_indices = @transform_1, window_bounds = array<i64: 1, 16, 256>}, {transform_indices = @transform_2, window_bounds = array<i64: 1, 16, 256>}, {transform_indices = @transform_3, window_bounds = array<i64: 1, 16, 256>}, {transform_indices = @transform_4, window_bounds = array<i64: 1, 16, 256>}, {pipeline_mode = #tpu.pipeline_mode<synchronous>, transform_indices = @transform_5, window_bounds = array<i64: 64, 16>}, {pipeline_mode = #tpu.pipeline_mode<synchronous>, transform_indices = @transform_6, window_bounds = array<i64: 64, 1>}, {pipeline_mode = #tpu.pipeline_mode<synchronous>, transform_indices = @transform_7, window_bounds = array<i64: 64, 1>}, {transform_indices = @transform_8, window_bounds = array<i64: 1, 64, 256>}, {transform_indices = @transform_9, window_bounds = array<i64: 1, 64, 256>}]} {
    %c0 = arith.constant 0 : index
    %c0_0 = arith.constant 0 : index
    %c0_1 = arith.constant 0 : index
    %c0_2 = arith.constant 0 : index
    %0 = vector.load %arg2[%c0, %c0_0, %c0_1, %c0_2] : memref<1x4x16x1xf32, #tpu.memory_space<vmem>>, vector<1x4x16x1xf32>
    %1 = vector.shape_cast %0 : vector<1x4x16x1xf32> to vector<4x16x1xf32>
    %2 = vector.extract_strided_slice %1 {offsets = [0, 0, 0], sizes = [1, 16, 1], strides = [1, 1, 1]} : vector<4x16x1xf32> to vector<1x16x1xf32>
    %3 = vector.shape_cast %2 : vector<1x16x1xf32> to vector<16x1xf32>
    %c0_3 = arith.constant 0 : index
    %c0_4 = arith.constant 0 : index
    %c0_5 = arith.constant 0 : index
    %4 = vector.load %arg3[%c0_3, %c0_4, %c0_5] : memref<1x16x256xf32, #tpu.memory_space<vmem>>, vector<1x16x256xf32>
    %5 = vector.shape_cast %4 : vector<1x16x256xf32> to vector<16x256xf32>
    %6 = vector.broadcast %3 : vector<16x1xf32> to vector<16x256xf32>
    %7 = arith.mulf %6, %5 : vector<16x256xf32>
    %8 = vector.extract_strided_slice %1 {offsets = [1, 0, 0], sizes = [1, 16, 1], strides = [1, 1, 1]} : vector<4x16x1xf32> to vector<1x16x1xf32>
    %9 = vector.shape_cast %8 : vector<1x16x1xf32> to vector<16x1xf32>
    %c0_6 = arith.constant 0 : index
    %c0_7 = arith.constant 0 : index
    %c0_8 = arith.constant 0 : index
    %10 = vector.load %arg4[%c0_6, %c0_7, %c0_8] : memref<1x16x256xf32, #tpu.memory_space<vmem>>, vector<1x16x256xf32>
    %11 = vector.shape_cast %10 : vector<1x16x256xf32> to vector<16x256xf32>
    %12 = vector.broadcast %9 : vector<16x1xf32> to vector<16x256xf32>
    %13 = arith.mulf %12, %11 : vector<16x256xf32>
    %14 = arith.addf %7, %13 : vector<16x256xf32>
    %15 = vector.extract_strided_slice %1 {offsets = [2, 0, 0], sizes = [1, 16, 1], strides = [1, 1, 1]} : vector<4x16x1xf32> to vector<1x16x1xf32>
    %16 = vector.shape_cast %15 : vector<1x16x1xf32> to vector<16x1xf32>
    %c0_9 = arith.constant 0 : index
    %c0_10 = arith.constant 0 : index
    %c0_11 = arith.constant 0 : index
    %17 = vector.load %arg5[%c0_9, %c0_10, %c0_11] : memref<1x16x256xf32, #tpu.memory_space<vmem>>, vector<1x16x256xf32>
    %18 = vector.shape_cast %17 : vector<1x16x256xf32> to vector<16x256xf32>
    %19 = vector.broadcast %16 : vector<16x1xf32> to vector<16x256xf32>
    %20 = arith.mulf %19, %18 : vector<16x256xf32>
    %21 = arith.addf %14, %20 : vector<16x256xf32>
    %22 = vector.extract_strided_slice %1 {offsets = [3, 0, 0], sizes = [1, 16, 1], strides = [1, 1, 1]} : vector<4x16x1xf32> to vector<1x16x1xf32>
    %23 = vector.shape_cast %22 : vector<1x16x1xf32> to vector<16x1xf32>
    %c0_12 = arith.constant 0 : index
    %c0_13 = arith.constant 0 : index
    %c0_14 = arith.constant 0 : index
    %24 = vector.load %arg6[%c0_12, %c0_13, %c0_14] : memref<1x16x256xf32, #tpu.memory_space<vmem>>, vector<1x16x256xf32>
    %25 = vector.shape_cast %24 : vector<1x16x256xf32> to vector<16x256xf32>
    %26 = vector.broadcast %23 : vector<16x1xf32> to vector<16x256xf32>
    %27 = arith.mulf %26, %25 : vector<16x256xf32>
    %28 = arith.addf %21, %27 : vector<16x256xf32>
    %c0_15 = arith.constant 0 : index
    %c0_16 = arith.constant 0 : index
    %29 = vector.load %arg7[%c0_15, %c0_16] : memref<64x16xf32, #tpu.memory_space<vmem>>, vector<64x16xf32>
    %cst = arith.constant dense<0.000000e+00> : vector<64x256xf32>
    %30 = tpu.matmul %29, %28, %cst {dimension_numbers = #tpu.dot_dimension_numbers<[1], [0], [0], [1], [0, 0, 1, 1], [], []>} : vector<64x16xf32>, vector<16x256xf32>, vector<64x256xf32> -> vector<64x256xf32>
    %c0_17 = arith.constant 0 : index
    %c0_18 = arith.constant 0 : index
    %31 = vector.load %arg8[%c0_17, %c0_18] : memref<64x1xf32, #tpu.memory_space<vmem>>, vector<64x1xf32>
    %32 = vector.broadcast %31 : vector<64x1xf32> to vector<64x256xf32>
    %33 = arith.mulf %30, %32 : vector<64x256xf32>
    %c0_19 = arith.constant 0 : index
    %c0_20 = arith.constant 0 : index
    %34 = vector.load %arg9[%c0_19, %c0_20] : memref<64x1xf32, #tpu.memory_space<vmem>>, vector<64x1xf32>
    %35 = vector.broadcast %34 : vector<64x1xf32> to vector<64x256xf32>
    %36 = arith.addf %33, %35 : vector<64x256xf32>
    %c0_21 = arith.constant 0 : index
    %c0_22 = arith.constant 0 : index
    %c0_23 = arith.constant 0 : index
    %37 = vector.load %arg10[%c0_21, %c0_22, %c0_23] : memref<1x64x256xf32, #tpu.memory_space<vmem>>, vector<1x64x256xf32>
    %38 = vector.shape_cast %37 : vector<1x64x256xf32> to vector<64x256xf32>
    %39 = arith.addf %36, %38 : vector<64x256xf32>
    %cst_24 = arith.constant 0.000000e+00 : f32
    %40 = vector.broadcast %cst_24 : f32 to vector<64x256xf32>
    %41 = arith.maximumf %39, %40 : vector<64x256xf32>
    %c0_25 = arith.constant 0 : index
    %c0_26 = arith.constant 0 : index
    %c0_27 = arith.constant 0 : index
    %42 = vector.load %arg11[%c0_25, %c0_26, %c0_27] : memref<1x64x256xf32, #tpu.memory_space<vmem>>, vector<1x64x256xf32>
    %43 = vector.shape_cast %42 : vector<1x64x256xf32> to vector<64x256xf32>
    %44 = vector.shape_cast %41 : vector<64x256xf32> to vector<1x64x256xf32>
    tpu.vector_store %arg11[%c0_25, %c0_26, %c0_27], %44 {strides = array<i32>} : memref<1x64x256xf32, #tpu.memory_space<vmem>>, vector<1x64x256xf32>,
    return
  }
  func.func @transform_0(%arg0: i32, %arg1: i32) -> (i32, i32, i32, i32) {
    %c0_i32 = arith.constant 0 : i32
    %c0_i32_0 = arith.constant 0 : i32
    %c0_i32_1 = arith.constant 0 : i32
    %c0_i32_2 = arith.constant 0 : i32
    return %arg0, %c0_i32, %c0_i32_0, %c0_i32_1 : i32, i32, i32, i32
  }
  func.func @transform_1(%arg0: i32, %arg1: i32) -> (i32, i32, i32) {
    %c0_i32 = arith.constant 0 : i32
    %c0_i32_0 = arith.constant 0 : i32
    return %arg0, %c0_i32, %arg1 : i32, i32, i32
  }
  func.func @transform_2(%arg0: i32, %arg1: i32) -> (i32, i32, i32) {
    %c0_i32 = arith.constant 0 : i32
    %c0_i32_0 = arith.constant 0 : i32
    return %arg0, %c0_i32, %arg1 : i32, i32, i32
  }
  func.func @transform_3(%arg0: i32, %arg1: i32) -> (i32, i32, i32) {
    %c0_i32 = arith.constant 0 : i32
    %c0_i32_0 = arith.constant 0 : i32
    return %arg0, %c0_i32, %arg1 : i32, i32, i32
  }
  func.func @transform_4(%arg0: i32, %arg1: i32) -> (i32, i32, i32) {
    %c0_i32 = arith.constant 0 : i32
    %c0_i32_0 = arith.constant 0 : i32
    return %arg0, %c0_i32, %arg1 : i32, i32, i32
  }
  func.func @transform_5(%arg0: i32, %arg1: i32) -> (i32, i32) {
    %c0_i32 = arith.constant 0 : i32
    %c0_i32_0 = arith.constant 0 : i32
    %c0_i32_1 = arith.constant 0 : i32
    return %c0_i32, %c0_i32_0 : i32, i32
  }
  func.func @transform_6(%arg0: i32, %arg1: i32) -> (i32, i32) {
    %c0_i32 = arith.constant 0 : i32
    %c0_i32_0 = arith.constant 0 : i32
    %c0_i32_1 = arith.constant 0 : i32
    return %c0_i32, %c0_i32_0 : i32, i32
  }
  func.func @transform_7(%arg0: i32, %arg1: i32) -> (i32, i32) {
    %c0_i32 = arith.constant 0 : i32
    %c0_i32_0 = arith.constant 0 : i32
    %c0_i32_1 = arith.constant 0 : i32
    return %c0_i32, %c0_i32_0 : i32, i32
  }
  func.func @transform_8(%arg0: i32, %arg1: i32) -> (i32, i32, i32) {
    %c0_i32 = arith.constant 0 : i32
    %c0_i32_0 = arith.constant 0 : i32
    return %arg0, %c0_i32, %arg1 : i32, i32, i32
  }
  func.func @transform_9(%arg0: i32, %arg1: i32) -> (i32, i32, i32) {
    %c0_i32 = arith.constant 0 : i32
    %c0_i32_0 = arith.constant 0 : i32
    return %arg0, %c0_i32, %arg1 : i32, i32, i32
  }
}

</mosaic_0001>

<bundles_post_ra>
// kernel: osblock_forward.13
= control target key start
LH: loop header
LB: loop body
LE: loop exit
PB: predicated region body
PF: predicated region fallthrough
CT: control target
= control target key end

     0   :  { %s521_s15 = smov 0   ;;  %s523_s16 = smov 0   ;;  %s579_s0 = inlined_call_operand.vmem [shape: f32[2,16,256], index: 0, kind: input, shape index: {}]   ;;  %s580_s1 = inlined_call_operand.vmem [shape: f32[16,16], index: 1, kind: input, shape index: {}]   ;;  %s581_s2 = inlined_call_operand.vmem [shape: f32[16,1], index: 2, kind: input, shape index: {}]   ;;  %s582_s3 = inlined_call_operand.vmem [shape: f32[16,1], index: 3, kind: input, shape index: {}]   ;;  %s583_s4 = inlined_call_operand.vmem [shape: f32[2,16,256], index: 4, kind: output, shape index: {}]  }
   0x1   :  { %s525_s17 = smov 0  }
   0x2 LB: > { %s26_s18 = sadd.s32 1, %s489_s16  ;;  %p427_p0 = scmp.ge.s32.totalorder %s493_s17, 1  ;;  %s493_s17 = sphi %s525_s17, %s14_s17   ;;  %s489_s16 = sphi %s523_s16, %s585_s16   ;;  %s485_s15 = sphi %s521_s15, %s584_s15  }
   0x3   : > { %p28_p1 = scmp.ge.s32.totalorder %s26_s18, 2  ;;  %p183_p2 = scmp.lt.s32.totalorder %s493_s17, 3 }
   0x5   : > { %s587_s18 = smov (%p28_p1, %s26_s18), 0  ;;  %p184_p3 = pnand %p427_p0, %p183_p2 }
   0x6   : > { %p218_p4 = scmp.lt.s32.totalorder (!%p184_p3), %s485_s15, 1 }
   0x7   : > { %187 = sbr.rel (%p184_p3) target bundleno = 160 (0xa0), region = 36 }
   0xc   : > { %v296_v0 = vld [vmem:[%s581_s2] sm:$0xff]  ;;  %v495_v1 = vmov 0   ;;  %s589_s15 = smov (!%p218_p4, %s485_s15), 1  ;;  %vm243_vm0 = vcmask 130048   ;;  %v238_v8 = vld [vmem:[%s580_s1 + $0x8] sm:$0xff] }
   0xd   : > { %469 = vset.pattern.permute.xlu0 %v495_v1  ;;  %470 = vset.pattern.permute.xlu1 %v495_v1  ;;  %v312_v2 = vld [vmem:[%s582_s3] sm:$0xff]  ;;  %s438_s23 = sshll.u32 %s589_s15, 5  ;;  %v297_v9 = vld [vmem:[%s581_s2 + $0x8] sm:$0xff] }
   0xe   : > { %300 = vperm.xlu0 %469, %v296_v0   ;;  %316 = vperm.xlu1 %470, %v312_v2   ;;  %s225_s26 = scalar_lea.vmem %s579_s0, %s438_s23  ;;  %v237_v7 = vld [vmem:[%s580_s1] sm:$0xff]  ;;  %v313_v10 = vld [vmem:[%s582_s3 + $0x8] sm:$0xff]  ;;  %s235_s11 = scalar_lea.vmem %s583_s4, %s438_s23 }
   0xf   : > { %v241_v3 = vld [vmem:[%s225_s26 + $0x10] sm:$0xff]  ;;  %v242_v4 = vld [vmem:[%s225_s26 + $0x18] sm:$0xff]  ;;  %v239_v5 = vld [vmem:[%s225_s26] sm:$0xff] }
  0x10   : > { %264 = vmatpush.msra.mxu0 %v241_v3  ;;  %440 = vmatpush.msra.mxu2 %v241_v3  ;;  %v240_v6 = vld [vmem:[%s225_s26 + $0x8] sm:$0xff] }
  0x11   : > { %287 = vmatpush.msra.mxu1 %v242_v4  ;;  %442 = vmatpush.msra.mxu3 %v242_v4 }
  0x12   : > { %265 = vmatpush.msra.mxu0 %v239_v5  ;;  %441 = vmatpush.msra.mxu2 %v239_v5 }
  0x13   : > { %288 = vmatpush.msra.mxu1 %v240_v6  ;;  %443 = vmatpush.msra.mxu3 %v240_v6 }
  0x14   : > { %432 = vmatmul.msk.f32.vlgmr.msra.gmra.mxu0 %vm243_vm0, %v237_v7  ;;  %433 = vmatmul.msk.f32.vlgmr.msra.gmra.mxu2 %vm243_vm0, %v238_v8 }
  0x15   : > { %434 = vmatmul.msk.f32.vlgmr.msra.gmra.mxu1 %vm243_vm0, %v237_v7  ;;  %435 = vmatmul.msk.f32.vlgmr.msra.gmra.mxu3 %vm243_vm0, %v238_v8 }
  0x16   : > { %305 = vperm.xlu0 %469, %v297_v9   ;;  %321 = vperm.xlu1 %470, %v313_v10  }
  0x80   : > { %v301_v11 = vpop.permute.xlu0 %300  ;;  %v317_v12 = vpop.permute.xlu1 %316 }
  0x88   : > { %v306_v20 = vpop.permute.xlu0 %305  ;;  %v322_v25 = vpop.permute.xlu1 %321 }
  0x91   : > { %v267_v13 = vpop.f32.mrf.mxu0 }
  0x92   : > { %v308_v14 = vmul.f32 %v301_v11, %v267_v13  ;;  %v290_v15 = vpop.f32.mrf.mxu1 }
  0x93   : > { %v309_v16 = vmul.f32 %v301_v11, %v290_v15 }
  0x94   : > { %v324_v17 = vadd.f32 %v317_v12, %v308_v14 }
  0x95   : > { %v325_v18 = vadd.f32 %v317_v12, %v309_v16 }
  0x96   : > { %v328_v19 = vmax.f32 %v324_v17, 0.0 }
  0x97   : > { %v329_v21 = vmax.f32 %v325_v18, 0.0  ;;  %v270_v22 = vpop.f32.mrf.mxu2 }
  0x98   : > { %332 = vst [vmem:[%s235_s11] sm:$0xff] %v328_v19  ;;  %v310_v23 = vmul.f32 %v306_v20, %v270_v22  ;;  %v293_v24 = vpop.f32.mrf.mxu3 }
  0x99   : > { %333 = vst [vmem:[%s235_s11 + $0x8] sm:$0xff] %v329_v21  ;;  %v311_v26 = vmul.f32 %v306_v20, %v293_v24 }
  0x9a   : > { %v326_v27 = vadd.f32 %v322_v25, %v310_v23 }
  0x9b   : > { %v327_v28 = vadd.f32 %v322_v25, %v311_v26 }
  0x9c   : > { %v330_v29 = vmax.f32 %v326_v27, 0.0 }
  0x9d   : > { %v331_v30 = vmax.f32 %v327_v28, 0.0 }
  0x9e   : > { %334 = vst [vmem:[%s235_s11 + $0x10] sm:$0xff] %v330_v29 }
  0x9f   : > { %335 = vst [vmem:[%s235_s11 + $0x18] sm:$0xff] %v331_v30 }
  0xa0 PF: > { %s14_s17 = sadd.s32 1, %s493_s17   ;;  %s584_s15 = smov %s489_s16 }
  0xa1   : > { %p11_p5 = scmp.ge.s32.totalorder %s14_s17, 4   ;;  %s585_s16 = smov %s587_s18 }
  0xa3   :  { %13 = sbr.rel (!%p11_p5) target bundleno = 2 (0x2), region = 66 }

// kernel: osblock_forward.23
= control target key start
LH: loop header
LB: loop body
LE: loop exit
PB: predicated region body
PF: predicated region fallthrough
CT: control target
= control target key end

     0   :  { %s978_s24 = smov 0   ;;  %s1417_s0 = inlined_call_operand.vmem [shape: f32[2,16,256], index: 0, kind: input, shape index: {}]   ;;  %s1418_s1 = inlined_call_operand.vmem [shape: f32[16,16], index: 1, kind: input, shape index: {}]   ;;  %s1419_s2 = inlined_call_operand.vmem [shape: f32[9,16,1], index: 2, kind: input, shape index: {}]   ;;  %s1420_s3 = inlined_call_operand.vmem [shape: f32[9,1,256], index: 3, kind: input, shape index: {}]   ;;  %s1421_s4 = inlined_call_operand.vmem [shape: f32[16,1], index: 4, kind: input, shape index: {}]   ;;  %s1422_s5 = inlined_call_operand.vmem [shape: f32[16,1], index: 5, kind: input, shape index: {}]   ;;  %s1423_s6 = inlined_call_operand.vmem [shape: f32[2,16,256], index: 6, kind: output, shape index: {0}]   ;;  %s1424_s7 = inlined_call_operand.vmem [shape: f32[2,16,1], index: 7, kind: output, shape index: {1}]  }
   0x1 LB: > { %s873_s25 = sadd.s32 4294967295, %s926_s24   ;;  %p877_p0 = scmp.ge.s32.totalorder %s926_s24, 1  ;;  %s926_s24 = sphi %s978_s24, %s18_s24  }
   0x2   : > { %p240_p1 = scmp.lt.s32.totalorder %s926_s24, 3 }
   0x4   : > { %p241_p2 = pnand %p877_p0, %p240_p1 }
   0x5   : > { %p277_p3 = scmp.lt.s32.totalorder (!%p241_p2), %s873_s25, 1  ;;  %s929_s29 = smov (!%p241_p2), 16  }
   0x6   : > { %244 = sbr.rel (%p241_p2) target bundleno = 496 (0x1f0), region = 44  ;;  %s930_s30 = smov (!%p241_p2), 17  }
   0x7   : > { %s931_s8 = smov (!%p241_p2), 15   ;;  %s932_s10 = smov (!%p241_p2), 112  }
   0x8   : > { %s933_s11 = smov (!%p241_p2), 1   ;;  %s935_s13 = smov (!%p241_p2), 127  }
   0x9   : > { %s936_s14 = smov (!%p241_p2), 113  }
   0xb   : > { %v359_v0 = vld [vmem:[%s1419_s2 + $0x40] sm:$0xff]  ;;  %v928_v1 = vmov 0   ;;  %v353_v2 = vld [vmem:[%s1419_s2 + $0x10] sm:$0xff]  ;;  %s1426_s25 = smov (!%p277_p3, %s873_s25), 1  ;;  %vm298_vm0 = vcmask 130048   ;;  %v293_v9 = vld [vmem:[%s1418_s1 + $0x8] sm:$0xff]  ;;  %v386_v59 = vlaneseq }
   0xc   : > { %917 = vset.pattern.permute.xlu0 %v928_v1  ;;  %916 = vset.pattern.permute.xlu1 %v928_v1  ;;  %v351_v3 = vld [vmem:[%s1419_s2] sm:$0xff]  ;;  %s890_s9 = sshll.u32 %s1426_s25, 5  ;;  %v352_v11 = vld [vmem:[%s1419_s2 + $0x8] sm:$0xff]  ;;  %v357_v13 = vld [vmem:[%s1419_s2 + $0x30] sm:$0xff]  ;;  %vm782_vm10 = vcmask 7168  }
   0xd   : > { %551 = vperm.xlu0 %917, %v359_v0   ;;  %444 = vperm.xlu1 %916, %v353_v2   ;;  %s281_s12 = scalar_lea.vmem %s1417_s0, %s890_s9  ;;  %v292_v8 = vld [vmem:[%s1418_s1] sm:$0xff]  ;;  %v364_v12 = vld [vmem:[%s1419_s2 + $0x68] sm:$0xff]  ;;  %v354_v14 = vld [vmem:[%s1419_s2 + $0x18] sm:$0xff]  ;;  %v1165_v61 = vand.u32 127, %v386_v59  ;;  %s286_s23 = scalar_lea.vmem %s1423_s6, %s890_s9 }
   0xe   : > { %915 = vset.pattern.permute.xlu2 %v928_v1  ;;  %v296_v4 = vld [vmem:[%s281_s12 + $0x10] sm:$0xff]  ;;  %v297_v5 = vld [vmem:[%s281_s12 + $0x18] sm:$0xff]  ;;  %v294_v6 = vld [vmem:[%s281_s12] sm:$0xff]  ;;  %s892_s9 = sshll.u32 %s1426_s25, 4 }
   0xf   : > { %404 = vperm.xlu2 %915, %v351_v3   ;;  %319 = vmatpush.msra.mxu0 %v296_v4  ;;  %v295_v7 = vld [vmem:[%s281_s12 + $0x8] sm:$0xff]  ;;  %v355_v10 = vld [vmem:[%s1419_s2 + $0x20] sm:$0xff]  ;;  %v366_v15 = vld [vmem:[%s1419_s2 + $0x78] sm:$0xff]  ;;  %s934_s12 = smov 111   ;;  %vm388_vm1 = vcmp.lt.s32.totalorder %v1165_v61, 17  ;;  %vm428_vm2 = vcmp.lt.s32.totalorder %v1165_v61, 16  ;;  %s291_s28 = scalar_lea.vmem %s1424_s7, %s892_s9 }
  0x10   : > { %342 = vmatpush.msra.mxu1 %v297_v5  ;;  %895 = vmatpush.msra.mxu3 %v297_v5  ;;  %v360_v16 = vld [vmem:[%s1419_s2 + $0x48] sm:$0xff]  ;;  %v361_v18 = vld [vmem:[%s1419_s2 + $0x50] sm:$0xff]  ;;  %v358_v19 = vld [vmem:[%s1419_s2 + $0x38] sm:$0xff]  ;;  %vm468_vm3 = vcmp.lt.s32.totalorder %v1165_v61, 15  ;;  %vm508_vm4 = vcmp.lt.s32.totalorder %v1165_v61, 1  ;;  %vm575_vm5 = vcmp.lt.s32.totalorder %v1165_v61, 127 }
  0x11   : > { %893 = vmatpush.msra.mxu2 %v296_v4  ;;  %320 = vmatpush.msra.mxu0 %v294_v6  ;;  %v356_v17 = vld [vmem:[%s1419_s2 + $0x28] sm:$0xff]  ;;  %v363_v20 = vld [vmem:[%s1419_s2 + $0x60] sm:$0xff]  ;;  %v362_v21 = vld [vmem:[%s1419_s2 + $0x58] sm:$0xff]  ;;  %vm655_vm6 = vcmp.lt.s32.totalorder %v1165_v61, 112  ;;  %vm615_vm7 = vcmp.lt.s32.totalorder %v1165_v61, 113  ;;  %vm695_vm8 = vcmp.lt.s32.totalorder %v1165_v61, 111 }
  0x12   : > { %343 = vmatpush.msra.mxu1 %v295_v7  ;;  %884 = vmatmul.msk.f32.vlgmr.msra.gmra.mxu0 %vm298_vm0, %v292_v8  ;;  %v367_v22 = vld [vmem:[%s1419_s2 + $0x80] sm:$0xff]  ;;  %v365_v23 = vld [vmem:[%s1419_s2 + $0x70] sm:$0xff]  ;;  %v1054_v24 = vld [vmem:[%s1420_s3 + $0x8] sm:$0x3] }
  0x13   : > { %886 = vmatmul.msk.f32.vlgmr.msra.gmra.mxu1 %vm298_vm0, %v292_v8  ;;  %896 = vmatpush.msra.mxu3 %v295_v7  ;;  %v541_v25 = vperm.slane %v1054_v24, 0  ;;  %v542_v26 = vperm.slane %v1054_v24, 1  ;;  %v368_v43 = vld [vmem:[%s1419_s2 + $0x88] sm:$0xff]  ;;  %v743_v47 = vld [vmem:[%s1422_s5] sm:$0xff] }
  0x14   : > { %894 = vmatpush.msra.mxu2 %v294_v6  ;;  %887 = vmatmul.msk.f32.vlgmr.msra.gmra.mxu3 %vm298_vm0, %v293_v9  ;;  %v728_v46 = vld [vmem:[%s1421_s4 + $0x8] sm:$0xff]  ;;  %v727_v55 = vld [vmem:[%s1421_s4] sm:$0xff] }
  0x15   : > { %885 = vmatmul.msk.f32.vlgmr.msra.gmra.mxu2 %vm298_vm0, %v293_v9  ;;  %484 = vperm.xlu1 %916, %v355_v10   ;;  %v744_v60 = vld [vmem:[%s1422_s5 + $0x8] sm:$0xff]  ;;  %v1170_v0 = vld [vmem:[%s1420_s3] sm:$0x3]  ;;  %v1176_v2 = vld [vmem:[%s1420_s3 + $0x2] sm:$0x3] }
  0x16   : > { %636 = vperm.xlu0 %917, %v364_v12   ;;  %v394_v3 = vperm.slane %v1170_v0, 0  ;;  %v395_v4 = vperm.slane %v1170_v0, 1  ;;  %v434_v7 = vperm.slane %v1176_v2, 0  ;;  %v435_v8 = vperm.slane %v1176_v2, 1 }
  0x17   : > { %409 = vperm.xlu2 %915, %v352_v11  }
  0x1d   : > { %524 = vperm.xlu1 %916, %v357_v13  }
  0x1e   : > { %676 = vperm.xlu0 %917, %v366_v15  }
  0x1f   : > { %449 = vperm.xlu2 %915, %v354_v14  }
  0x25   : > { %556 = vperm.xlu1 %916, %v360_v16  }
  0x27   : > { %489 = vperm.xlu2 %915, %v356_v17   ;;  %v1202_v17 = vld [vmem:[%s1420_s3 + $0x4] sm:$0x3] }
  0x2d   : > { %591 = vperm.xlu1 %916, %v361_v18  }
  0x2f   : > { %529 = vperm.xlu2 %915, %v358_v19  }
  0x35   : > { %631 = vperm.xlu1 %916, %v363_v20  }
  0x37   : > { %596 = vperm.xlu2 %915, %v362_v21  }
  0x3d   : > { %711 = vperm.xlu1 %916, %v367_v22  }
  0x3f   : > { %671 = vperm.xlu2 %915, %v365_v23  }
  0x69   : > { %v1075_v34 = vpop.permute.xlu2 %404 }
  0x71   : > { %v1085_v37 = vpop.permute.xlu2 %409 }
  0x79   : > { %v1094_v38 = vpop.permute.xlu2 %449 }
  0x7f   : > { %v552_v27 = vpop.permute.xlu0 %551  ;;  %v1104_v40 = vpop.permute.xlu1 %444 }
  0x81   : > { %v1102_v39 = vpop.permute.xlu2 %489 }
  0x87   : > { %v1114_v42 = vpop.permute.xlu1 %484 }
  0x88   : > { %v1149_v52 = vpop.permute.xlu0 %636 }
  0x89   : > { %v1112_v41 = vpop.permute.xlu2 %529 }
  0x8f   : > { %v322_v28 = vpop.f32.mrf.mxu0  ;;  %v1127_v45 = vpop.permute.xlu1 %524 }
  0x90   : > { %v345_v29 = vpop.f32.mrf.mxu1  ;;  %v545_v30 = vmul.f32 %v541_v25, %v322_v28  ;;  %378 = vrot.lane.b32.xlu0 %v322_v28, %s930_s30  ;;  %v1158_v57 = vpop.permute.xlu0 %676 }
  0x91   : > { %424 = vrot.lane.b32.xlu2 %v345_v29, %s929_s29  ;;  %382 = vrot.lane.b32.xlu1 %v345_v29, %s930_s30  ;;  %v546_v31 = vmul.f32 %v542_v26, %v345_v29  ;;  %v1125_v44 = vpop.permute.xlu2 %596 }
  0x92   : > { %v1065_v32 = vmul.f32 %v552_v27, %v545_v30 }
  0x93   : > { %v1067_v33 = vmul.f32 %v552_v27, %v546_v31  ;;  %v474_v27 = vperm.slane %v1202_v17, 0 }
  0x97   : > { %v1077_v35 = vpop.f32.mrf.mxu3  ;;  %v1141_v49 = vpop.permute.xlu1 %556 }
  0x98   : > { %420 = vrot.lane.b32.xlu0 %v322_v28, %s929_s29  ;;  %v1083_v36 = vpop.f32.mrf.mxu2 }
  0x99   : > { %464 = vrot.lane.b32.xlu2 %v345_v29, %s931_s8  ;;  %651 = vrot.lane.b32.xlu1 %v345_v29, %s932_s10  ;;  %v1139_v48 = vpop.permute.xlu2 %671 }
  0x9f   : > { %v1145_v50 = vpop.permute.xlu1 %591 }
  0xa0   : > { %460 = vrot.lane.b32.xlu0 %v322_v28, %s931_s8 }
  0xa1   : > { %504 = vrot.lane.b32.xlu2 %v345_v29, %s933_s11  ;;  %687 = vrot.lane.b32.xlu1 %v322_v28, %s934_s12 }
  0xa7   : > { %v1153_v54 = vpop.permute.xlu1 %631 }
  0xa8   : > { %500 = vrot.lane.b32.xlu0 %v322_v28, %s933_s11 }
  0xa9   : > { %384 = vrot.lane.b32.xlu1 %v1077_v35, %s930_s30  ;;  %567 = vrot.lane.b32.xlu2 %v322_v28, %s935_s13 }
  0xaf   : > { %v1160_v58 = vpop.permute.xlu1 %711 }
  0xb0   : > { %607 = vrot.lane.b32.xlu0 %v322_v28, %s936_s14 }
  0xb1   : > { %422 = vrot.lane.b32.xlu1 %v1083_v36, %s929_s29  ;;  %571 = vrot.lane.b32.xlu2 %v345_v29, %s935_s13 }
  0xb8   : > { %691 = vrot.lane.b32.xlu0 %v345_v29, %s934_s12 }
  0xb9   : > { %462 = vrot.lane.b32.xlu1 %v1083_v36, %s931_s8  ;;  %611 = vrot.lane.b32.xlu2 %v345_v29, %s936_s14 }
  0xc0   : > { %380 = vrot.lane.b32.xlu0 %v1083_v36, %s930_s30 }
  0xc1   : > { %502 = vrot.lane.b32.xlu1 %v1083_v36, %s933_s11  ;;  %647 = vrot.lane.b32.xlu2 %v322_v28, %s932_s10  ;;  %v475_v28 = vperm.slane %v1202_v17, 1 }
  0xc8   : > { %426 = vrot.lane.b32.xlu0 %v1077_v35, %s929_s29 }
  0xc9   : > { %569 = vrot.lane.b32.xlu1 %v1083_v36, %s935_s13  ;;  %653 = vrot.lane.b32.xlu2 %v1077_v35, %s932_s10 }
  0xd0   : > { %466 = vrot.lane.b32.xlu0 %v1077_v35, %s931_s8 }
  0xd1   : > { %609 = vrot.lane.b32.xlu1 %v1083_v36, %s936_s14  ;;  %689 = vrot.lane.b32.xlu2 %v1083_v36, %s934_s12 }
  0xd8   : > { %506 = vrot.lane.b32.xlu0 %v1077_v35, %s933_s11 }
  0xd9   : > { %693 = vrot.lane.b32.xlu1 %v1077_v35, %s934_s12  ;;  %716 = vperm.xlu2 %915, %v368_v43  }
  0xe0   : > { %573 = vrot.lane.b32.xlu0 %v1077_v35, %s935_s13 }
  0xe1   : > { %736 = vperm.xlu1 %916, %v728_v46   ;;  %747 = vperm.xlu2 %915, %v743_v47   ;;  %v1222_v47 = vld [vmem:[%s1420_s3 + $0x6] sm:$0x3] }
  0xe8   : > { %613 = vrot.lane.b32.xlu0 %v1077_v35, %s936_s14 }
  0xeb   : > { %v425_v51 = vpop.permute.xlu2 %424 }
  0xf0   : > { %649 = vrot.lane.b32.xlu0 %v1083_v36, %s932_s10 }
  0xf3   : > { %v465_v53 = vpop.permute.xlu2 %464 }
  0xf8   : > { %731 = vperm.xlu0 %917, %v727_v55  }
  0xfb   : > { %v505_v56 = vpop.permute.xlu2 %504 }
 0x100   : > { %752 = vperm.xlu0 %917, %v744_v60  }
 0x102   : > { %v379_v63 = vpop.permute.xlu0 %378 }
 0x103   : > { %v568_v62 = vpop.permute.xlu2 %567  ;;  %v383_v1 = vpop.permute.xlu1 %382 }
 0x104   : > { %v389_v5 = vsel %vm388_vm1, %v379_v63, %v383_v1  ;;  %v391_v6 = vsel %vm388_vm1, %v383_v1, %v379_v63  ;;  %v514_v63 = vperm.slane %v1222_v47, 0  ;;  %v515_v1 = vperm.slane %v1222_v47, 1 }
 0x105   : > { %v398_v9 = vmul.f32 %v394_v3, %v391_v6  ;;  %v399_v10 = vmul.f32 %v395_v4, %v389_v5 }
 0x107   : > { %v412_v18 = vmul.f32 %v1075_v34, %v398_v9  ;;  %v413_v19 = vmul.f32 %v1075_v34, %v399_v10  ;;  %v1240_v10 = vld [vmem:[%s1420_s3 + $0xe] sm:$0x3] }
 0x10a   : > { %v421_v12 = vpop.permute.xlu0 %420 }
 0x10b   : > { %v572_v11 = vpop.permute.xlu2 %571  ;;  %v429_v13 = vsel %vm428_vm2, %v421_v12, %v425_v51  ;;  %v431_v14 = vsel %vm428_vm2, %v425_v51, %v421_v12  ;;  %v652_v29 = vpop.permute.xlu1 %651 }
 0x10c   : > { %v438_v15 = vmul.f32 %v434_v7, %v431_v14  ;;  %v439_v16 = vmul.f32 %v435_v8, %v429_v13  ;;  %v576_v14 = vsel %vm575_vm5, %v568_v62, %v572_v11 }
 0x10e   : > { %v452_v20 = vmul.f32 %v1104_v40, %v438_v15  ;;  %v453_v21 = vmul.f32 %v1104_v40, %v439_v16  ;;  %v578_v15 = vsel %vm575_vm5, %v572_v11, %v568_v62 }
 0x110   : > { %v456_v22 = vadd.f32 %v452_v20, %v412_v18  ;;  %v457_v23 = vadd.f32 %v453_v21, %v413_v19  ;;  %v1257_v19 = vld [vmem:[%s1420_s3 + $0xc] sm:$0x3] }
 0x112   : > { %v461_v30 = vpop.permute.xlu0 %460 }
 0x113   : > { %v469_v31 = vsel %vm468_vm3, %v461_v30, %v465_v53  ;;  %v471_v34 = vsel %vm468_vm3, %v465_v53, %v461_v30  ;;  %v612_v43 = vpop.permute.xlu2 %611  ;;  %v1230_v53 = vld [vmem:[%s1420_s3 + $0xa] sm:$0x3]  ;;  %v688_v9 = vpop.permute.xlu1 %687 }
 0x114   : > { %v478_v40 = vmul.f32 %v474_v27, %v471_v34  ;;  %v479_v46 = vmul.f32 %v475_v28, %v469_v31  ;;  %v581_v6 = vperm.slane %v1230_v53, 0  ;;  %v621_v34 = vperm.slane %v1257_v19, 0 }
 0x116   : > { %v492_v51 = vmul.f32 %v1114_v42, %v478_v40  ;;  %v493_v55 = vmul.f32 %v1114_v42, %v479_v46  ;;  %v582_v42 = vperm.slane %v1230_v53, 1  ;;  %v585_v11 = vmul.f32 %v581_v6, %v576_v14 }
 0x117   : > { %v622_v40 = vperm.slane %v1257_v19, 1 }
 0x118   : > { %v496_v59 = vadd.f32 %v492_v51, %v456_v22  ;;  %v497_v60 = vadd.f32 %v493_v55, %v457_v23  ;;  %v586_v22 = vmul.f32 %v582_v42, %v578_v15  ;;  %v662_v23 = vperm.slane %v1240_v10, 1 }
 0x11a   : > { %v501_v5 = vpop.permute.xlu0 %500 }
 0x11b   : > { %v509_v12 = vsel %vm508_vm4, %v501_v5, %v505_v56  ;;  %v511_v13 = vsel %vm508_vm4, %v505_v56, %v501_v5  ;;  %v661_v56 = vperm.slane %v1240_v10, 0  ;;  %v648_v20 = vpop.permute.xlu2 %647  ;;  %v385_v15 = vpop.permute.xlu1 %384 }
 0x11c   : > { %v518_v16 = vmul.f32 %v514_v63, %v511_v13  ;;  %v519_v18 = vmul.f32 %v515_v1, %v509_v12  ;;  %v656_v46 = vsel %vm655_vm6, %v648_v20, %v652_v29  ;;  %v599_v12 = vmul.f32 %v1145_v50, %v585_v11 }
 0x11d   : > { %v665_v14 = vmul.f32 %v661_v56, %v656_v46 }
 0x11e   : > { %v532_v21 = vmul.f32 %v1127_v45, %v518_v16  ;;  %v533_v62 = vmul.f32 %v1127_v45, %v519_v18  ;;  %v658_v45 = vsel %vm655_vm6, %v652_v29, %v648_v20 }
 0x11f   : > { %v666_v29 = vmul.f32 %v662_v23, %v658_v45  ;;  %v679_v11 = vmul.f32 %v1139_v48, %v665_v14 }
 0x120   : > { %v536_v30 = vadd.f32 %v532_v21, %v496_v59  ;;  %v537_v31 = vadd.f32 %v533_v62, %v497_v60  ;;  %v600_v59 = vmul.f32 %v1145_v50, %v586_v22  ;;  %v1294_v50 = vld [vmem:[%s1420_s3 + $0x10] sm:$0x3] }
 0x121   : > { %v701_v21 = vperm.slane %v1294_v50, 0  ;;  %v702_v62 = vperm.slane %v1294_v50, 1  ;;  %v680_v22 = vmul.f32 %v1139_v48, %v666_v29 }
 0x122   : > { %v563_v51 = vadd.f32 %v1065_v32, %v536_v30  ;;  %v564_v55 = vadd.f32 %v1067_v33, %v537_v31  ;;  %v608_v5 = vpop.permute.xlu0 %607 }
 0x123   : > { %v616_v60 = vsel %vm615_vm7, %v608_v5, %v612_v43  ;;  %v618_v13 = vsel %vm615_vm7, %v612_v43, %v608_v5 }
 0x124   : > { %v625_v32 = vmul.f32 %v621_v34, %v616_v60  ;;  %v626_v33 = vmul.f32 %v622_v40, %v618_v13  ;;  %v604_v16 = vadd.f32 %v600_v59, %v564_v55  ;;  %v603_v43 = vadd.f32 %v599_v12, %v563_v51  ;;  %v423_v60 = vpop.permute.xlu1 %422 }
 0x126   : > { %v639_v18 = vmul.f32 %v1153_v54, %v625_v32  ;;  %v640_v20 = vmul.f32 %v1153_v54, %v626_v33 }
 0x128   : > { %v643_v30 = vadd.f32 %v639_v18, %v603_v43  ;;  %v644_v31 = vadd.f32 %v640_v20, %v604_v16  ;;  %v654_v20 = vpop.permute.xlu2 %653 }
 0x12a   : > { %v692_v46 = vpop.permute.xlu0 %691  ;;  %v684_v45 = vadd.f32 %v680_v22, %v644_v31  ;;  %v683_v55 = vadd.f32 %v679_v11, %v643_v30 }
 0x12b   : > { %v696_v51 = vsel %vm695_vm8, %v688_v9, %v692_v46  ;;  %v698_v54 = vsel %vm695_vm8, %v692_v46, %v688_v9 }
 0x12c   : > { %v705_v5 = vmul.f32 %v701_v21, %v696_v51  ;;  %v706_v12 = vmul.f32 %v702_v62, %v698_v54  ;;  %v463_v32 = vpop.permute.xlu1 %462 }
 0x12e   : > { %v719_v59 = vmul.f32 %v1160_v58, %v705_v5  ;;  %v720_v48 = vmul.f32 %v1160_v58, %v706_v12 }
 0x130   : > { %v1313_v13 = vadd.f32 %v720_v48, %v684_v45  ;;  %v1315_v14 = vadd.f32 %v719_v59, %v683_v55 }
 0x132   : > { %v381_v29 = vpop.permute.xlu0 %380 }
 0x133   : > { %v390_v58 = vsel %vm388_vm1, %v381_v29, %v385_v15  ;;  %v392_v30 = vsel %vm388_vm1, %v385_v15, %v381_v29  ;;  %v690_v29 = vpop.permute.xlu2 %689 }
 0x134   : > { %v503_v9 = vpop.permute.xlu1 %502  ;;  %v400_v54 = vmul.f32 %v394_v3, %v392_v30  ;;  %v401_v5 = vmul.f32 %v395_v4, %v390_v58 }
 0x136   : > { %v414_v4 = vmul.f32 %v1085_v37, %v400_v54  ;;  %v415_v48 = vmul.f32 %v1085_v37, %v401_v5  ;;  %v547_v37 = vmul.f32 %v541_v25, %v1083_v36 }
 0x13a   : > { %v427_v33 = vpop.permute.xlu0 %426 }
 0x13b   : > { %v430_v11 = vsel %vm428_vm2, %v423_v60, %v427_v33  ;;  %v432_v22 = vsel %vm428_vm2, %v427_v33, %v423_v60 }
 0x13c   : > { %v570_v18 = vpop.permute.xlu1 %569  ;;  %v440_v31 = vmul.f32 %v434_v7, %v432_v22  ;;  %v441_v46 = vmul.f32 %v435_v8, %v430_v11 }
 0x13e   : > { %v454_v12 = vmul.f32 %v1094_v38, %v440_v31  ;;  %v455_v59 = vmul.f32 %v1094_v38, %v441_v46  ;;  %v717_v31 = vpop.permute.xlu2 %716 }
 0x142   : > { %v467_v16 = vpop.permute.xlu0 %466 }
 0x143   : > { %v470_v45 = vsel %vm468_vm3, %v463_v32, %v467_v16  ;;  %v472_v55 = vsel %vm468_vm3, %v467_v16, %v463_v32  ;;  %v459_v32 = vadd.f32 %v455_v59, %v415_v48 }
 0x144   : > { %v480_v7 = vmul.f32 %v474_v27, %v472_v55  ;;  %v481_v8 = vmul.f32 %v475_v28, %v470_v45  ;;  %v610_v60 = vpop.permute.xlu1 %609  ;;  %v458_v28 = vadd.f32 %v454_v12, %v414_v4 }
 0x146   : > { %v494_v27 = vmul.f32 %v1102_v39, %v480_v7  ;;  %v495_v17 = vmul.f32 %v1102_v39, %v481_v8  ;;  %v548_v39 = vmul.f32 %v542_v26, %v1077_v35  ;;  %v561_v35 = vmul.f32 %v1141_v49, %v547_v37 }
 0x148   : > { %v498_v16 = vadd.f32 %v494_v27, %v458_v28  ;;  %v562_v36 = vmul.f32 %v1141_v49, %v548_v39 }
 0x14a   : > { %v507_v43 = vpop.permute.xlu0 %506 }
 0x14b   : > { %v510_v15 = vsel %vm508_vm4, %v503_v9, %v507_v43  ;;  %v512_v2 = vsel %vm508_vm4, %v507_v43, %v503_v9  ;;  %v499_v9 = vadd.f32 %v495_v17, %v459_v32 }
 0x14c   : > { %v520_v0 = vmul.f32 %v514_v63, %v512_v2  ;;  %v521_v3 = vmul.f32 %v515_v1, %v510_v15  ;;  %v694_v58 = vpop.permute.xlu1 %693 }
 0x14d   : > { %v697_v49 = vsel %vm695_vm8, %v690_v29, %v694_v58 }
 0x14e   : > { %v534_v38 = vmul.f32 %v1112_v41, %v520_v0  ;;  %v535_v33 = vmul.f32 %v1112_v41, %v521_v3  ;;  %v748_v3 = vpop.permute.xlu2 %747 }
 0x150   : > { %v538_v22 = vadd.f32 %v534_v38, %v498_v16  ;;  %v539_v25 = vadd.f32 %v535_v33, %v499_v9 }
 0x152   : > { %v574_v51 = vpop.permute.xlu0 %573  ;;  %v565_v53 = vadd.f32 %v561_v35, %v538_v22 }
 0x153   : > { %v577_v47 = vsel %vm575_vm5, %v570_v18, %v574_v51  ;;  %v579_v63 = vsel %vm575_vm5, %v574_v51, %v570_v18 }
 0x154   : > { %v587_v18 = vmul.f32 %v581_v6, %v577_v47  ;;  %v588_v11 = vmul.f32 %v582_v42, %v579_v63  ;;  %v566_v42 = vadd.f32 %v562_v36, %v539_v25  ;;  %v937_v47 = vmov 256.0  }
 0x155   : > { %918 = vrcp.f32 %v937_v47 }
 0x156   : > { %v601_v30 = vmul.f32 %v1125_v44, %v587_v18  ;;  %v602_v6 = vmul.f32 %v1125_v44, %v588_v11  ;;  %v699_v44 = vsel %vm695_vm8, %v694_v58, %v690_v29 }
 0x157   : > { %v708_v61 = vmul.f32 %v702_v62, %v699_v44 }
 0x158   : > { %v605_v54 = vadd.f32 %v601_v30, %v565_v53 }
 0x15a   : > { %v614_v1 = vpop.permute.xlu0 %613 }
 0x15b   : > { %v617_v41 = vsel %vm615_vm7, %v610_v60, %v614_v1  ;;  %v619_v43 = vsel %vm615_vm7, %v614_v1, %v610_v60  ;;  %v737_v60 = vpop.permute.xlu1 %736  ;;  %v919_v63 = vpop.eup %918 }
 0x15c   : > { %v627_v24 = vmul.f32 %v621_v34, %v617_v41  ;;  %v628_v26 = vmul.f32 %v622_v40, %v619_v43  ;;  %v774_v1 = vmul.f32 256.0, %v919_v63  ;;  %vm778_vm9 = vweird.f32 %v919_v63 }
 0x15e   : > { %v641_v45 = vmul.f32 %v1149_v52, %v627_v24  ;;  %v642_v34 = vmul.f32 %v1149_v52, %v628_v26  ;;  %v606_v52 = vadd.f32 %v602_v6, %v566_v42  ;;  %v775_v37 = vsub.f32 1.0, %v774_v1 }
 0x160   : > { %v645_v2 = vadd.f32 %v641_v45, %v605_v54  ;;  %v646_v7 = vadd.f32 %v642_v34, %v606_v52  ;;  %v776_v39 = vmul.f32 %v919_v63, %v775_v37 }
 0x162   : > { %v650_v46 = vpop.permute.xlu0 %649  ;;  %v777_v16 = vadd.f32 %v919_v63, %v776_v39 }
 0x163   : > { %v657_v19 = vsel %vm655_vm6, %v650_v46, %v654_v20  ;;  %v659_v40 = vsel %vm655_vm6, %v654_v20, %v650_v46  ;;  %v707_v20 = vmul.f32 %v701_v21, %v697_v49 }
 0x164   : > { %v667_v55 = vmul.f32 %v661_v56, %v657_v19  ;;  %v668_v51 = vmul.f32 %v662_v23, %v659_v40  ;;  %v722_v23 = vmul.f32 %v717_v31, %v708_v61  ;;  %v779_v9 = vsel %vm778_vm9, %v919_v63, %v777_v16 }
 0x165   : > { %v721_v10 = vmul.f32 %v717_v31, %v707_v20 }
 0x166   : > { %v681_v5 = vmul.f32 %v1158_v57, %v667_v55  ;;  %v682_v15 = vmul.f32 %v1158_v57, %v668_v51 }
 0x168   : > { %v685_v8 = vadd.f32 %v681_v5, %v645_v2  ;;  %v686_v56 = vadd.f32 %v682_v15, %v646_v7 }
 0x16a   : > { %v732_v12 = vpop.permute.xlu0 %731  ;;  %v725_v48 = vadd.f32 %v721_v10, %v685_v8  ;;  %v726_v21 = vadd.f32 %v722_v23, %v686_v56 }
 0x16b   : > { %v739_v59 = vmul.f32 %v732_v12, %v1315_v14  ;;  %v740_v0 = vmul.f32 %v732_v12, %v1313_v13 }
 0x16c   : > { %v741_v29 = vmul.f32 %v737_v60, %v725_v48  ;;  %v742_v27 = vmul.f32 %v737_v60, %v726_v21 }
 0x16d   : > { %v755_v57 = vadd.f32 %v748_v3, %v739_v59  ;;  %v756_v4 = vadd.f32 %v748_v3, %v740_v0 }
 0x16f   : > { %v759_v50 = vmax.f32 %v755_v57, 0.0  ;;  %v760_v62 = vmax.f32 %v756_v4, 0.0 }
 0x171   : > { %764 = vst [vmem:[%s286_s23 + $0x8] sm:$0xff] %v760_v62  ;;  %v767_v17 = vadd.f32 %v760_v62, %v759_v50 }
 0x172   : > { %v753_v14 = vpop.permute.xlu0 %752  ;;  %763 = vst [vmem:[%s286_s23] sm:$0xff] %v759_v50 }
 0x173   : > { %v757_v13 = vadd.f32 %v753_v14, %v741_v29  ;;  %v758_v28 = vadd.f32 %v753_v14, %v742_v27  ;;  %768 = vadd.xlane.f32.xlu1 %v767_v17 }
 0x175   : > { %v761_v32 = vmax.f32 %v757_v13, 0.0  ;;  %v762_v38 = vmax.f32 %v758_v28, 0.0 }
 0x177   : > { %765 = vst [vmem:[%s286_s23 + $0x10] sm:$0xff] %v761_v32  ;;  %v770_v33 = vadd.f32 %v762_v38, %v761_v32 }
 0x178   : > { %766 = vst [vmem:[%s286_s23 + $0x18] sm:$0xff] %v762_v38 }
 0x179   : > { %771 = vadd.xlane.f32.xlu2 %v770_v33 }
 0x1e6   : > { %v769_v41 = vpop.xlane.xlu1 %768 }
 0x1e7   : > { %v780_v43 = vmul.f32 %v779_v9, %v769_v41 }
 0x1e9   : > { %783 = vst.msk [vmem:[%s291_s28] sm:$0xff] %vm782_vm10, %v780_v43 }
 0x1ec   : > { %v772_v18 = vpop.xlane.xlu2 %771 }
 0x1ed   : > { %v781_v11 = vmul.f32 %v779_v9, %v772_v18 }
 0x1ef   : > { %784 = vst.msk [vmem:[%s291_s28 + $0x8] sm:$0xff] %vm782_vm10, %v781_v11 }
 0x1f0 PF: > { %s18_s24 = sadd.s32 1, %s926_s24  }
 0x1f1   : > { %p15_p4 = scmp.ge.s32.totalorder %s18_s24, 4  }
 0x1f3   :  { %17 = sbr.rel (!%p15_p4) target bundleno = 1 (0x1), region = 86 }

// kernel: osblock_forward.20
= control target key start
LH: loop header
LB: loop body
LE: loop exit
PB: predicated region body
PF: predicated region fallthrough
CT: control target
= control target key end

     0   :  { %13 = vsyncpa [#allocation3], 0  ;;  %s1597_s0 = inlined_call_operand.vmem [shape: f32[2,16,256], index: 0, kind: input, shape index: {}]   ;;  %s1598_s1 = inlined_call_operand.vmem [shape: f32[16,16], index: 1, kind: input, shape index: {}]   ;;  %s1599_s2 = inlined_call_operand.vmem [shape: f32[9,16,1], index: 2, kind: input, shape index: {}]   ;;  %s1600_s3 = inlined_call_operand.vmem [shape: f32[9,1,256], index: 3, kind: input, shape index: {}]   ;;  %s1601_s4 = inlined_call_operand.vmem [shape: f32[16,1], index: 4, kind: input, shape index: {}]   ;;  %s1602_s5 = inlined_call_operand.vmem [shape: f32[16,1], index: 5, kind: input, shape index: {}]   ;;  %s1603_s6 = inlined_call_operand.vmem [shape: f32[2,16,256], index: 6, kind: output, shape index: {0}]   ;;  %s1604_s7 = inlined_call_operand.hbm [shape: f32[2,16,1], index: 7, kind: output, shape index: {1}]  }
   0x1   :  { %15 = vsyncpa [#allocation3 + $0x1], 0  ;;  %s1091_s24 = smov 0   ;;  %s1093_s25 = smov 0  }
   0x2   :  { %s1095_s26 = smov 0   ;;  %s1097_s27 = smov 0  }
   0x3 LB: > { %s1112_s28 = sadd.s32 4294967295, %s1037_s27   ;;  %s894_s29 = sadd.s32 4294967294, %s1037_s27   ;;  %s1037_s27 = sphi %s1097_s27, %s1610_s27   ;;  %s1033_s26 = sphi %s1095_s26, %s1609_s26   ;;  %s1029_s25 = sphi %s1093_s25, %s1608_s25   ;;  %s1025_s24 = sphi %s1091_s24, %s1607_s24  }
   0x4   : > { %s1116_s30 = sadd.s32 1, %s1037_s27   ;;  %s185_s8 = sadd.s32 1, %s1033_s26 }
   0x5   : > { %s182_s9 = ssub.s32 %s1037_s27, %s1116_s30  ;;  %p195_p0 = scmp.ne.s32.totalorder %s1033_s26, %s1029_s25 }
   0x6   : > { %p183_p1 = scmp.eq.s32.totalorder %s182_s9, 0  ;;  %p196_p2 = scmp.eq.s32.totalorder %s1112_s28, 1 }
   0x7   : > { %p201_p3 = scmp.ne.s32.totalorder %s1029_s25, %s1025_s24  ;;  %p202_p4 = scmp.eq.s32.totalorder %s894_s29, 1 }
   0x8   : > { %s1127_s10 = scalar_select %p183_p1, %s1033_s26, %s185_s8  }
   0x9   : > { %p1129_p5 = por %p196_p2, %p195_p0  ;;  %p1133_p6 = por %p202_p4, %p201_p3 }
   0xa   : > { %p897_p7 = scmp.ge.s32.totalorder %s1037_s27, 1  ;;  %p243_p8 = scmp.lt.s32.totalorder %s1037_s27, 3 }
   0xc   : > { %p244_p9 = pnand %p897_p7, %p243_p8 }
   0xd   : > { %p280_p10 = scmp.lt.s32.totalorder (!%p244_p9), %s1112_s28, 1  ;;  %s1040_s22 = smov (!%p244_p9), 16  }
   0xe   : > { %247 = sbr.rel (%p244_p9) target bundleno = 509 (0x1fd), region = 44  ;;  %s1042_s29 = smov (!%p244_p9), 15  }
   0xf   : > { %s1043_s8 = smov (!%p244_p9), 112   ;;  %s1044_s9 = smov (!%p244_p9), 1  }
  0x10   : > { %s1045_s13 = smov (!%p244_p9), 111   ;;  %s1046_s14 = smov (!%p244_p9), 127  }
  0x11   : > { %s1047_s15 = smov (!%p244_p9), 113  }
  0x13   : > { %v357_v0 = vld [vmem:[%s1599_s2 + $0x40] sm:$0xff]  ;;  %v1039_v1 = vmov 0   ;;  %v351_v2 = vld [vmem:[%s1599_s2 + $0x10] sm:$0xff]  ;;  %s1147_s17 = scalar_select %p280_p10, %s1112_s28, 1  ;;  %vm296_vm0 = vcmask 130048   ;;  %v291_v9 = vld [vmem:[%s1598_s1 + $0x8] sm:$0xff]  ;;  %v384_v59 = vlaneseq }
  0x14   : > { %972 = vset.pattern.permute.xlu0 %v1039_v1  ;;  %971 = vset.pattern.permute.xlu1 %v1039_v1  ;;  %v349_v3 = vld [vmem:[%s1599_s2] sm:$0xff]  ;;  %v350_v11 = vld [vmem:[%s1599_s2 + $0x8] sm:$0xff]  ;;  %v355_v13 = vld [vmem:[%s1599_s2 + $0x30] sm:$0xff]  ;;  %vm780_vm10 = vcmask 7168  }
  0x15   : > { %549 = vperm.xlu0 %972, %v357_v0   ;;  %442 = vperm.xlu1 %971, %v351_v2   ;;  %s912_s20 = sshll.u32 %s1147_s17, 5  ;;  %v290_v8 = vld [vmem:[%s1598_s1] sm:$0xff]  ;;  %v362_v12 = vld [vmem:[%s1599_s2 + $0x68] sm:$0xff]  ;;  %v352_v14 = vld [vmem:[%s1599_s2 + $0x18] sm:$0xff]  ;;  %v1320_v61 = vand.u32 127, %v384_v59  ;;  %s277_s17 = sand.u32 1, %s1029_s25  }
  0x16   : > { %970 = vset.pattern.permute.xlu2 %v1039_v1  ;;  %s284_s23 = scalar_lea.vmem %s1597_s0, %s912_s20  ;;  %v353_v10 = vld [vmem:[%s1599_s2 + $0x20] sm:$0xff]  ;;  %v364_v15 = vld [vmem:[%s1599_s2 + $0x78] sm:$0xff]  ;;  %v358_v16 = vld [vmem:[%s1599_s2 + $0x48] sm:$0xff]  ;;  %s789_s16 = scalar_lea.sflag [#allocation3], %s277_s17 }
  0x17   : > { %402 = vperm.xlu2 %970, %v349_v3   ;;  %v294_v4 = vld [vmem:[%s284_s23 + $0x10] sm:$0xff]  ;;  %v295_v5 = vld [vmem:[%s284_s23 + $0x18] sm:$0xff]  ;;  %v292_v6 = vld [vmem:[%s284_s23] sm:$0xff]  ;;  %vm386_vm1 = vcmp.lt.s32.totalorder %v1320_v61, 17  ;;  %vm426_vm2 = vcmp.lt.s32.totalorder %v1320_v61, 16  ;;  %vm466_vm3 = vcmp.lt.s32.totalorder %v1320_v61, 15 }
  0x18   : > { %317 = vmatpush.msra.mxu0 %v294_v4  ;;  %340 = vmatpush.msra.mxu1 %v295_v5  ;;  %v293_v7 = vld [vmem:[%s284_s23 + $0x8] sm:$0xff]  ;;  %v359_v18 = vld [vmem:[%s1599_s2 + $0x50] sm:$0xff]  ;;  %v356_v19 = vld [vmem:[%s1599_s2 + $0x38] sm:$0xff]  ;;  %s1041_s23 = smov 17   ;;  %vm506_vm4 = vcmp.lt.s32.totalorder %v1320_v61, 1  ;;  %vm573_vm5 = vcmp.lt.s32.totalorder %v1320_v61, 127 }
  0x19   : > { %917 = vmatpush.msra.mxu3 %v295_v5  ;;  %915 = vmatpush.msra.mxu2 %v294_v4  ;;  %v354_v17 = vld [vmem:[%s1599_s2 + $0x28] sm:$0xff]  ;;  %v361_v20 = vld [vmem:[%s1599_s2 + $0x60] sm:$0xff]  ;;  %v360_v21 = vld [vmem:[%s1599_s2 + $0x58] sm:$0xff]  ;;  %vm653_vm6 = vcmp.lt.s32.totalorder %v1320_v61, 112  ;;  %vm613_vm7 = vcmp.lt.s32.totalorder %v1320_v61, 113  ;;  %vm693_vm8 = vcmp.lt.s32.totalorder %v1320_v61, 111 }
  0x1a   : > { %318 = vmatpush.msra.mxu0 %v292_v6  ;;  %341 = vmatpush.msra.mxu1 %v293_v7  ;;  %v365_v22 = vld [vmem:[%s1599_s2 + $0x80] sm:$0xff]  ;;  %v363_v23 = vld [vmem:[%s1599_s2 + $0x70] sm:$0xff]  ;;  %v1209_v24 = vld [vmem:[%s1600_s3 + $0x8] sm:$0x3] }
  0x1b   : > { %903 = vmatmul.msk.f32.vlgmr.msra.gmra.mxu0 %vm296_vm0, %v290_v8  ;;  %905 = vmatmul.msk.f32.vlgmr.msra.gmra.mxu1 %vm296_vm0, %v290_v8  ;;  %v539_v25 = vperm.slane %v1209_v24, 0  ;;  %v540_v26 = vperm.slane %v1209_v24, 1  ;;  %v366_v43 = vld [vmem:[%s1599_s2 + $0x88] sm:$0xff]  ;;  %v741_v47 = vld [vmem:[%s1602_s5] sm:$0xff] }
  0x1c   : > { %918 = vmatpush.msra.mxu3 %v293_v7  ;;  %916 = vmatpush.msra.mxu2 %v292_v6  ;;  %v726_v46 = vld [vmem:[%s1601_s4 + $0x8] sm:$0xff]  ;;  %v725_v55 = vld [vmem:[%s1601_s4] sm:$0xff] }
  0x1d   : > { %906 = vmatmul.msk.f32.vlgmr.msra.gmra.mxu3 %vm296_vm0, %v291_v9  ;;  %904 = vmatmul.msk.f32.vlgmr.msra.gmra.mxu2 %vm296_vm0, %v291_v9  ;;  %v742_v60 = vld [vmem:[%s1602_s5 + $0x8] sm:$0xff]  ;;  %v1325_v0 = vld [vmem:[%s1600_s3] sm:$0x3]  ;;  %v1331_v2 = vld [vmem:[%s1600_s3 + $0x2] sm:$0x3] }
  0x1e   : > { %482 = vperm.xlu1 %971, %v353_v10   ;;  %634 = vperm.xlu0 %972, %v362_v12   ;;  %v392_v3 = vperm.slane %v1325_v0, 0  ;;  %v393_v4 = vperm.slane %v1325_v0, 1  ;;  %v432_v7 = vperm.slane %v1331_v2, 0  ;;  %v433_v8 = vperm.slane %v1331_v2, 1 }
  0x1f   : > { %407 = vperm.xlu2 %970, %v350_v11  }
  0x26   : > { %522 = vperm.xlu1 %971, %v355_v13   ;;  %674 = vperm.xlu0 %972, %v364_v15  }
  0x27   : > { %447 = vperm.xlu2 %970, %v352_v14  }
  0x2e   : > { %554 = vperm.xlu1 %971, %v358_v16  }
  0x2f   : > { %487 = vperm.xlu2 %970, %v354_v17   ;;  %v1357_v17 = vld [vmem:[%s1600_s3 + $0x4] sm:$0x3] }
  0x36   : > { %589 = vperm.xlu1 %971, %v359_v18  }
  0x37   : > { %527 = vperm.xlu2 %970, %v356_v19  }
  0x3e   : > { %629 = vperm.xlu1 %971, %v361_v20  }
  0x3f   : > { %594 = vperm.xlu2 %970, %v360_v21  }
  0x46   : > { %709 = vperm.xlu1 %971, %v365_v22  }
  0x47   : > { %669 = vperm.xlu2 %970, %v363_v23  }
  0x71   : > { %v1230_v34 = vpop.permute.xlu2 %402 }
  0x79   : > { %v1240_v37 = vpop.permute.xlu2 %407 }
  0x81   : > { %v1249_v38 = vpop.permute.xlu2 %447 }
  0x87   : > { %v550_v27 = vpop.permute.xlu0 %549  ;;  %v1259_v40 = vpop.permute.xlu1 %442 }
  0x89   : > { %v1257_v39 = vpop.permute.xlu2 %487 }
  0x90   : > { %v1269_v42 = vpop.permute.xlu1 %482  ;;  %v1304_v52 = vpop.permute.xlu0 %634 }
  0x91   : > { %v1267_v41 = vpop.permute.xlu2 %527 }
  0x98   : > { %v320_v28 = vpop.f32.mrf.mxu0  ;;  %v343_v29 = vpop.f32.mrf.mxu1 }
  0x99   : > { %422 = vrot.lane.b32.xlu2 %v343_v29, %s1040_s22  ;;  %380 = vrot.lane.b32.xlu1 %v343_v29, %s1041_s23  ;;  %v543_v30 = vmul.f32 %v539_v25, %v320_v28  ;;  %v544_v31 = vmul.f32 %v540_v26, %v343_v29  ;;  %v1280_v44 = vpop.permute.xlu2 %594  ;;  %v1282_v45 = vpop.permute.xlu1 %522 }
  0x9a   : > { %376 = vrot.lane.b32.xlu0 %v320_v28, %s1041_s23  ;;  %v1313_v57 = vpop.permute.xlu0 %674 }
  0x9b   : > { %v1220_v32 = vmul.f32 %v550_v27, %v543_v30  ;;  %v1222_v33 = vmul.f32 %v550_v27, %v544_v31  ;;  %v472_v27 = vperm.slane %v1357_v17, 0 }
  0xa0   : > { %v1232_v35 = vpop.f32.mrf.mxu3  ;;  %v1238_v36 = vpop.f32.mrf.mxu2 }
  0xa1   : > { %462 = vrot.lane.b32.xlu2 %v343_v29, %s1042_s29  ;;  %649 = vrot.lane.b32.xlu1 %v343_v29, %s1043_s8  ;;  %v1294_v48 = vpop.permute.xlu2 %669  ;;  %v1296_v49 = vpop.permute.xlu1 %554 }
  0xa2   : > { %418 = vrot.lane.b32.xlu0 %v320_v28, %s1040_s22 }
  0xa9   : > { %502 = vrot.lane.b32.xlu2 %v343_v29, %s1044_s9  ;;  %685 = vrot.lane.b32.xlu1 %v320_v28, %s1045_s13  ;;  %v1300_v50 = vpop.permute.xlu1 %589 }
  0xaa   : > { %458 = vrot.lane.b32.xlu0 %v320_v28, %s1042_s29 }
  0xb1   : > { %382 = vrot.lane.b32.xlu1 %v1232_v35, %s1041_s23  ;;  %565 = vrot.lane.b32.xlu2 %v320_v28, %s1046_s14  ;;  %v1308_v54 = vpop.permute.xlu1 %629 }
  0xb2   : > { %498 = vrot.lane.b32.xlu0 %v320_v28, %s1044_s9 }
  0xb9   : > { %420 = vrot.lane.b32.xlu1 %v1238_v36, %s1040_s22  ;;  %569 = vrot.lane.b32.xlu2 %v343_v29, %s1046_s14  ;;  %v1315_v58 = vpop.permute.xlu1 %709 }
  0xba   : > { %605 = vrot.lane.b32.xlu0 %v320_v28, %s1047_s15 }
  0xc1   : > { %460 = vrot.lane.b32.xlu1 %v1238_v36, %s1042_s29  ;;  %609 = vrot.lane.b32.xlu2 %v343_v29, %s1047_s15 }
  0xc2   : > { %689 = vrot.lane.b32.xlu0 %v343_v29, %s1045_s13 }
  0xc9   : > { %500 = vrot.lane.b32.xlu1 %v1238_v36, %s1044_s9  ;;  %645 = vrot.lane.b32.xlu2 %v320_v28, %s1043_s8  ;;  %v473_v28 = vperm.slane %v1357_v17, 1 }
  0xca   : > { %378 = vrot.lane.b32.xlu0 %v1238_v36, %s1041_s23  ;;  %s914_s23 = sshll.u32 %s1112_s28, 4 }
  0xd1   : > { %567 = vrot.lane.b32.xlu1 %v1238_v36, %s1046_s14  ;;  %651 = vrot.lane.b32.xlu2 %v1232_v35, %s1043_s8 }
  0xd2   : > { %424 = vrot.lane.b32.xlu0 %v1232_v35, %s1040_s22  ;;  %s289_s22 = scalar_lea.vmem %s1603_s6, %s912_s20  ;;  %s898_s20 = sshll.u32 %s277_s17, 4 }
  0xd9   : > { %607 = vrot.lane.b32.xlu1 %v1238_v36, %s1047_s15  ;;  %687 = vrot.lane.b32.xlu2 %v1238_v36, %s1045_s13 }
  0xda   : > { %464 = vrot.lane.b32.xlu0 %v1232_v35, %s1042_s29 }
  0xe1   : > { %691 = vrot.lane.b32.xlu1 %v1232_v35, %s1045_s13  ;;  %714 = vperm.xlu2 %970, %v366_v43   ;;  %s803_s13 = scalar_lea.hbm %s1604_s7, %s914_s23 }
  0xe2   : > { %504 = vrot.lane.b32.xlu0 %v1232_v35, %s1044_s9 }
  0xe9   : > { %734 = vperm.xlu1 %971, %v726_v46   ;;  %745 = vperm.xlu2 %970, %v741_v47   ;;  %v1377_v47 = vld [vmem:[%s1600_s3 + $0x6] sm:$0x3] }
  0xea   : > { %571 = vrot.lane.b32.xlu0 %v1232_v35, %s1046_s14  ;;  %s279_s14 = scalar_lea.vmem [#allocation2], %s898_s20 }
  0xf2   : > { %611 = vrot.lane.b32.xlu0 %v1232_v35, %s1047_s15  ;;  %s806_s15 = sshll.u32 %s803_s13, 4  ;;  %s807_s15 = int_to_ptr.hbm [resolvable:$true] %s806_s15 }
  0xf3   : > { %v423_v51 = vpop.permute.xlu2 %422  ;;  %s989_s18 = sshra.s32 %s807_s15, 4  ;;  %s990_s18 = int_to_ptr.hbm [resolvable:$true] %s989_s18 }
  0xf4   : > { %s991_s28 = scalar_lea.hbm %s990_s18, 16  ;;  %p996_p0 = scmp.lt.s32.totalorder %s990_s18, %s1604_s7 }
  0xf5   : > { %p992_p11 = scmp.ne.s32.totalorder %s990_s18, %s991_s28 }
  0xf7   : > { %p993_p12 = pnand %p992_p11, %p1129_p5 }
  0xf9   : > { %p994_p13 = pneg %p993_p12 }
  0xfa   : > { %647 = vrot.lane.b32.xlu0 %v1238_v36, %s1043_s8  ;;  %s804_s8 = sshll.u32 %s279_s14, 4  ;;  %s805_s8 = int_to_ptr.vmem [resolvable:$true] %s804_s8 }
  0xfb   : > { %v463_v53 = vpop.permute.xlu2 %462 }
 0x102   : > { %729 = vperm.xlu0 %972, %v725_v55  }
 0x103   : > { %v503_v56 = vpop.permute.xlu2 %502 }
 0x10a   : > { %750 = vperm.xlu0 %972, %v742_v60  }
 0x10b   : > { %v566_v62 = vpop.permute.xlu2 %565  ;;  %v381_v1 = vpop.permute.xlu1 %380 }
 0x10c   : > { %v377_v63 = vpop.permute.xlu0 %376 }
 0x10d   : > { %v387_v5 = vsel %vm386_vm1, %v377_v63, %v381_v1  ;;  %v389_v6 = vsel %vm386_vm1, %v381_v1, %v377_v63  ;;  %v512_v63 = vperm.slane %v1377_v47, 0  ;;  %v513_v1 = vperm.slane %v1377_v47, 1 }
 0x10e   : > { %v396_v9 = vmul.f32 %v392_v3, %v389_v6  ;;  %v397_v10 = vmul.f32 %v393_v4, %v387_v5 }
 0x110   : > { %v410_v18 = vmul.f32 %v1230_v34, %v396_v9  ;;  %v411_v19 = vmul.f32 %v1230_v34, %v397_v10  ;;  %v1395_v10 = vld [vmem:[%s1600_s3 + $0xe] sm:$0x3] }
 0x113   : > { %v570_v11 = vpop.permute.xlu2 %569  ;;  %v650_v29 = vpop.permute.xlu1 %649 }
 0x114   : > { %v419_v12 = vpop.permute.xlu0 %418 }
 0x115   : > { %v427_v13 = vsel %vm426_vm2, %v419_v12, %v423_v51  ;;  %v429_v14 = vsel %vm426_vm2, %v423_v51, %v419_v12 }
 0x116   : > { %v436_v15 = vmul.f32 %v432_v7, %v429_v14  ;;  %v437_v16 = vmul.f32 %v433_v8, %v427_v13  ;;  %v574_v14 = vsel %vm573_vm5, %v566_v62, %v570_v11 }
 0x118   : > { %v450_v20 = vmul.f32 %v1259_v40, %v436_v15  ;;  %v451_v21 = vmul.f32 %v1259_v40, %v437_v16  ;;  %v576_v15 = vsel %vm573_vm5, %v570_v11, %v566_v62 }
 0x11a   : > { %v454_v22 = vadd.f32 %v450_v20, %v410_v18  ;;  %v455_v23 = vadd.f32 %v451_v21, %v411_v19  ;;  %v1412_v19 = vld [vmem:[%s1600_s3 + $0xc] sm:$0x3] }
 0x11b   : > { %v610_v43 = vpop.permute.xlu2 %609  ;;  %v686_v9 = vpop.permute.xlu1 %685 }
 0x11c   : > { %v459_v30 = vpop.permute.xlu0 %458 }
 0x11d   : > { %v467_v31 = vsel %vm466_vm3, %v459_v30, %v463_v53  ;;  %v469_v34 = vsel %vm466_vm3, %v463_v53, %v459_v30  ;;  %v1385_v53 = vld [vmem:[%s1600_s3 + $0xa] sm:$0x3] }
 0x11e   : > { %v476_v40 = vmul.f32 %v472_v27, %v469_v34  ;;  %v477_v46 = vmul.f32 %v473_v28, %v467_v31  ;;  %v579_v6 = vperm.slane %v1385_v53, 0  ;;  %v619_v34 = vperm.slane %v1412_v19, 0 }
 0x120   : > { %v490_v51 = vmul.f32 %v1269_v42, %v476_v40  ;;  %v491_v55 = vmul.f32 %v1269_v42, %v477_v46  ;;  %v580_v42 = vperm.slane %v1385_v53, 1  ;;  %v583_v11 = vmul.f32 %v579_v6, %v574_v14 }
 0x121   : > { %v620_v40 = vperm.slane %v1412_v19, 1 }
 0x122   : > { %v494_v59 = vadd.f32 %v490_v51, %v454_v22  ;;  %v495_v60 = vadd.f32 %v491_v55, %v455_v23  ;;  %v584_v22 = vmul.f32 %v580_v42, %v576_v15  ;;  %v660_v23 = vperm.slane %v1395_v10, 1 }
 0x123   : > { %v646_v20 = vpop.permute.xlu2 %645  ;;  %v383_v15 = vpop.permute.xlu1 %382 }
 0x124   : > { %v499_v5 = vpop.permute.xlu0 %498  ;;  %v654_v46 = vsel %vm653_vm6, %v646_v20, %v650_v29 }
 0x125   : > { %v507_v12 = vsel %vm506_vm4, %v499_v5, %v503_v56  ;;  %v509_v13 = vsel %vm506_vm4, %v503_v56, %v499_v5  ;;  %v659_v56 = vperm.slane %v1395_v10, 0 }
 0x126   : > { %v516_v16 = vmul.f32 %v512_v63, %v509_v13  ;;  %v517_v18 = vmul.f32 %v513_v1, %v507_v12  ;;  %v597_v12 = vmul.f32 %v1300_v50, %v583_v11 }
 0x127   : > { %v663_v14 = vmul.f32 %v659_v56, %v654_v46 }
 0x128   : > { %v530_v21 = vmul.f32 %v1282_v45, %v516_v16  ;;  %v531_v62 = vmul.f32 %v1282_v45, %v517_v18  ;;  %v656_v45 = vsel %vm653_vm6, %v650_v29, %v646_v20 }
 0x129   : > { %v664_v29 = vmul.f32 %v660_v23, %v656_v45  ;;  %v677_v11 = vmul.f32 %v1294_v48, %v663_v14 }
 0x12a   : > { %v534_v30 = vadd.f32 %v530_v21, %v494_v59  ;;  %v535_v31 = vadd.f32 %v531_v62, %v495_v60  ;;  %v598_v59 = vmul.f32 %v1300_v50, %v584_v22  ;;  %v1449_v50 = vld [vmem:[%s1600_s3 + $0x10] sm:$0x3] }
 0x12b   : > { %v699_v21 = vperm.slane %v1449_v50, 0  ;;  %v700_v62 = vperm.slane %v1449_v50, 1  ;;  %v678_v22 = vmul.f32 %v1294_v48, %v664_v29 }
 0x12c   : > { %v561_v51 = vadd.f32 %v1220_v32, %v534_v30  ;;  %v562_v55 = vadd.f32 %v1222_v33, %v535_v31  ;;  %v606_v5 = vpop.permute.xlu0 %605 }
 0x12d   : > { %v614_v60 = vsel %vm613_vm7, %v606_v5, %v610_v43  ;;  %v616_v13 = vsel %vm613_vm7, %v610_v43, %v606_v5 }
 0x12e   : > { %v623_v32 = vmul.f32 %v619_v34, %v614_v60  ;;  %v624_v33 = vmul.f32 %v620_v40, %v616_v13  ;;  %v602_v16 = vadd.f32 %v598_v59, %v562_v55  ;;  %v601_v43 = vadd.f32 %v597_v12, %v561_v51  ;;  %v421_v60 = vpop.permute.xlu1 %420 }
 0x130   : > { %v637_v18 = vmul.f32 %v1308_v54, %v623_v32  ;;  %v638_v20 = vmul.f32 %v1308_v54, %v624_v33 }
 0x132   : > { %v641_v30 = vadd.f32 %v637_v18, %v601_v43  ;;  %v642_v31 = vadd.f32 %v638_v20, %v602_v16  ;;  %v652_v20 = vpop.permute.xlu2 %651 }
 0x134   : > { %v690_v46 = vpop.permute.xlu0 %689  ;;  %v682_v45 = vadd.f32 %v678_v22, %v642_v31  ;;  %v681_v55 = vadd.f32 %v677_v11, %v641_v30 }
 0x135   : > { %v694_v51 = vsel %vm693_vm8, %v686_v9, %v690_v46  ;;  %v696_v54 = vsel %vm693_vm8, %v690_v46, %v686_v9 }
 0x136   : > { %v703_v5 = vmul.f32 %v699_v21, %v694_v51  ;;  %v704_v12 = vmul.f32 %v700_v62, %v696_v54  ;;  %v461_v32 = vpop.permute.xlu1 %460 }
 0x138   : > { %v717_v59 = vmul.f32 %v1315_v58, %v703_v5  ;;  %v718_v48 = vmul.f32 %v1315_v58, %v704_v12 }
 0x13a   : > { %v1468_v13 = vadd.f32 %v718_v48, %v682_v45  ;;  %v1470_v14 = vadd.f32 %v717_v59, %v681_v55 }
 0x13c   : > { %v379_v29 = vpop.permute.xlu0 %378 }
 0x13d   : > { %v388_v58 = vsel %vm386_vm1, %v379_v29, %v383_v15  ;;  %v390_v30 = vsel %vm386_vm1, %v383_v15, %v379_v29  ;;  %v688_v29 = vpop.permute.xlu2 %687 }
 0x13e   : > { %v501_v9 = vpop.permute.xlu1 %500  ;;  %v398_v54 = vmul.f32 %v392_v3, %v390_v30  ;;  %v399_v5 = vmul.f32 %v393_v4, %v388_v58 }
 0x140   : > { %v412_v4 = vmul.f32 %v1240_v37, %v398_v54  ;;  %v413_v48 = vmul.f32 %v1240_v37, %v399_v5  ;;  %v545_v37 = vmul.f32 %v539_v25, %v1238_v36 }
 0x144   : > { %v425_v33 = vpop.permute.xlu0 %424 }
 0x145   : > { %v428_v11 = vsel %vm426_vm2, %v421_v60, %v425_v33  ;;  %v430_v22 = vsel %vm426_vm2, %v425_v33, %v421_v60 }
 0x146   : > { %v568_v18 = vpop.permute.xlu1 %567  ;;  %v438_v31 = vmul.f32 %v432_v7, %v430_v22  ;;  %v439_v46 = vmul.f32 %v433_v8, %v428_v11 }
 0x148   : > { %v452_v12 = vmul.f32 %v1249_v38, %v438_v31  ;;  %v453_v59 = vmul.f32 %v1249_v38, %v439_v46  ;;  %v715_v31 = vpop.permute.xlu2 %714 }
 0x14c   : > { %v465_v16 = vpop.permute.xlu0 %464 }
 0x14d   : > { %v468_v45 = vsel %vm466_vm3, %v461_v32, %v465_v16  ;;  %v470_v55 = vsel %vm466_vm3, %v465_v16, %v461_v32  ;;  %v457_v32 = vadd.f32 %v453_v59, %v413_v48 }
 0x14e   : > { %v478_v7 = vmul.f32 %v472_v27, %v470_v55  ;;  %v479_v8 = vmul.f32 %v473_v28, %v468_v45  ;;  %v608_v60 = vpop.permute.xlu1 %607  ;;  %v456_v28 = vadd.f32 %v452_v12, %v412_v4 }
 0x150   : > { %v492_v27 = vmul.f32 %v1257_v39, %v478_v7  ;;  %v493_v17 = vmul.f32 %v1257_v39, %v479_v8  ;;  %v546_v39 = vmul.f32 %v540_v26, %v1232_v35  ;;  %v559_v35 = vmul.f32 %v1296_v49, %v545_v37 }
 0x152   : > { %v496_v16 = vadd.f32 %v492_v27, %v456_v28  ;;  %v560_v36 = vmul.f32 %v1296_v49, %v546_v39 }
 0x154   : > { %v505_v43 = vpop.permute.xlu0 %504 }
 0x155   : > { %v508_v15 = vsel %vm506_vm4, %v501_v9, %v505_v43  ;;  %v510_v2 = vsel %vm506_vm4, %v505_v43, %v501_v9  ;;  %v497_v9 = vadd.f32 %v493_v17, %v457_v32 }
 0x156   : > { %v518_v0 = vmul.f32 %v512_v63, %v510_v2  ;;  %v519_v3 = vmul.f32 %v513_v1, %v508_v15  ;;  %v692_v58 = vpop.permute.xlu1 %691 }
 0x157   : > { %v695_v49 = vsel %vm693_vm8, %v688_v29, %v692_v58 }
 0x158   : > { %v532_v38 = vmul.f32 %v1267_v41, %v518_v0  ;;  %v533_v33 = vmul.f32 %v1267_v41, %v519_v3  ;;  %v746_v3 = vpop.permute.xlu2 %745 }
 0x15a   : > { %v536_v22 = vadd.f32 %v532_v38, %v496_v16  ;;  %v537_v25 = vadd.f32 %v533_v33, %v497_v9 }
 0x15c   : > { %v572_v51 = vpop.permute.xlu0 %571  ;;  %v563_v53 = vadd.f32 %v559_v35, %v536_v22 }
 0x15d   : > { %v575_v47 = vsel %vm573_vm5, %v568_v18, %v572_v51  ;;  %v577_v63 = vsel %vm573_vm5, %v572_v51, %v568_v18 }
 0x15e   : > { %v585_v18 = vmul.f32 %v579_v6, %v575_v47  ;;  %v586_v11 = vmul.f32 %v580_v42, %v577_v63  ;;  %v564_v42 = vadd.f32 %v560_v36, %v537_v25  ;;  %v1048_v47 = vmov 256.0  }
 0x15f   : > { %973 = vrcp.f32 %v1048_v47 }
 0x160   : > { %v599_v30 = vmul.f32 %v1280_v44, %v585_v18  ;;  %v600_v6 = vmul.f32 %v1280_v44, %v586_v11  ;;  %v697_v44 = vsel %vm693_vm8, %v692_v58, %v688_v29 }
 0x161   : > { %v706_v61 = vmul.f32 %v700_v62, %v697_v44 }
 0x162   : > { %v603_v54 = vadd.f32 %v599_v30, %v563_v53 }
 0x164   : > { %v612_v1 = vpop.permute.xlu0 %611 }
 0x165   : > { %v615_v41 = vsel %vm613_vm7, %v608_v60, %v612_v1  ;;  %v617_v43 = vsel %vm613_vm7, %v612_v1, %v608_v60  ;;  %v735_v60 = vpop.permute.xlu1 %734  ;;  %v974_v63 = vpop.eup %973 }
 0x166   : > { %v625_v24 = vmul.f32 %v619_v34, %v615_v41  ;;  %v626_v26 = vmul.f32 %v620_v40, %v617_v43  ;;  %v772_v1 = vmul.f32 256.0, %v974_v63  ;;  %vm776_vm9 = vweird.f32 %v974_v63 }
 0x168   : > { %v639_v45 = vmul.f32 %v1304_v52, %v625_v24  ;;  %v640_v34 = vmul.f32 %v1304_v52, %v626_v26  ;;  %v604_v52 = vadd.f32 %v600_v6, %v564_v42  ;;  %v773_v37 = vsub.f32 1.0, %v772_v1 }
 0x16a   : > { %v643_v2 = vadd.f32 %v639_v45, %v603_v54  ;;  %v644_v7 = vadd.f32 %v640_v34, %v604_v52  ;;  %v774_v39 = vmul.f32 %v974_v63, %v773_v37 }
 0x16c   : > { %v648_v46 = vpop.permute.xlu0 %647  ;;  %v775_v16 = vadd.f32 %v974_v63, %v774_v39 }
 0x16d   : > { %v655_v19 = vsel %vm653_vm6, %v648_v46, %v652_v20  ;;  %v657_v40 = vsel %vm653_vm6, %v652_v20, %v648_v46  ;;  %v705_v20 = vmul.f32 %v699_v21, %v695_v49 }
 0x16e   : > { %v665_v55 = vmul.f32 %v659_v56, %v655_v19  ;;  %v666_v51 = vmul.f32 %v660_v23, %v657_v40  ;;  %v720_v23 = vmul.f32 %v715_v31, %v706_v61  ;;  %v777_v9 = vsel %vm776_vm9, %v974_v63, %v775_v16 }
 0x16f   : > { %v719_v10 = vmul.f32 %v715_v31, %v705_v20 }
 0x170   : > { %v679_v5 = vmul.f32 %v1313_v57, %v665_v55  ;;  %v680_v15 = vmul.f32 %v1313_v57, %v666_v51 }
 0x172   : > { %v683_v8 = vadd.f32 %v679_v5, %v643_v2  ;;  %v684_v56 = vadd.f32 %v680_v15, %v644_v7 }
 0x174   : > { %v730_v12 = vpop.permute.xlu0 %729  ;;  %v723_v48 = vadd.f32 %v719_v10, %v683_v8  ;;  %v724_v21 = vadd.f32 %v720_v23, %v684_v56 }
 0x175   : > { %v737_v59 = vmul.f32 %v730_v12, %v1470_v14  ;;  %v738_v0 = vmul.f32 %v730_v12, %v1468_v13 }
 0x176   : > { %v739_v29 = vmul.f32 %v735_v60, %v723_v48  ;;  %v740_v27 = vmul.f32 %v735_v60, %v724_v21 }
 0x177   : > { %v753_v57 = vadd.f32 %v746_v3, %v737_v59  ;;  %v754_v4 = vadd.f32 %v746_v3, %v738_v0 }
 0x179   : > { %v757_v50 = vmax.f32 %v753_v57, 0.0  ;;  %v758_v62 = vmax.f32 %v754_v4, 0.0 }
 0x17b   : > { %762 = vst [vmem:[%s289_s22 + $0x8] sm:$0xff] %v758_v62  ;;  %v765_v17 = vadd.f32 %v758_v62, %v757_v50 }
 0x17c   : > { %v751_v14 = vpop.permute.xlu0 %750  ;;  %761 = vst [vmem:[%s289_s22] sm:$0xff] %v757_v50 }
 0x17d   : > { %v755_v13 = vadd.f32 %v751_v14, %v739_v29  ;;  %v756_v28 = vadd.f32 %v751_v14, %v740_v27  ;;  %766 = vadd.xlane.f32.xlu1 %v765_v17 }
 0x17f   : > { %v759_v32 = vmax.f32 %v755_v13, 0.0  ;;  %v760_v38 = vmax.f32 %v756_v28, 0.0 }
 0x181   : > { %763 = vst [vmem:[%s289_s22 + $0x10] sm:$0xff] %v759_v32  ;;  %v768_v33 = vadd.f32 %v760_v38, %v759_v32 }
 0x182   : > { %764 = vst [vmem:[%s289_s22 + $0x18] sm:$0xff] %v760_v38  ;;  %s995_s22 = scalar_lea.hbm %s1604_s7, 32 }
 0x183   : > { %769 = vadd.xlane.f32.xlu2 %v768_v33  ;;  %p997_p1 = scmp.lt.s32.totalorder %s995_s22, %s991_s28 }
 0x185   : > { %p998_p2 = por %p997_p1, %p996_p0 }
 0x187   : > { %p999_p3 = pnand %p998_p2, %p994_p13 }
 0x1f0   : > { %v767_v41 = vpop.xlane.xlu1 %766 }
 0x1f1   : > { %v778_v43 = vmul.f32 %v777_v9, %v767_v41 }
 0x1f3   : > { %781 = vst.msk [vmem:[%s279_s14] sm:$0xff] %vm780_vm10, %v778_v43 }
 0x1f6   : > { %v770_v18 = vpop.xlane.xlu2 %769 }
 0x1f7   : > { %v779_v11 = vmul.f32 %v777_v9, %v770_v18 }
 0x1f9   : > { %782 = vst.msk [vmem:[%s279_s14 + $0x8] sm:$0xff] %vm780_vm10, %v779_v11 }
 0x1fa   : > { %1002 = shalt.err (!%p999_p3)
}
 0x1fb   : > { %s1049_s17 = smov 128   ;;  %s1050_s29 = smov 8  }
 0x1fc   : > { %919 = dma.vmem_to_hbm [thread:$0]  (%p1129_p5), %s805_s8, 256, %s807_s15, %s789_s16, %s1049_s17, %s1049_s17, %s1050_s29  }
 0x1fd PF: > { %p925_p4 = scmp.ge.s32.totalorder %s1037_s27, 2  ;;  %s829_s9 = sand.u32 1, %s1025_s24  }
 0x1fe   : > { %s830_s13 = scalar_lea.sflag [#allocation3], %s829_s9 }
 0x1ff   : > { %p922_p7 = pnand %p925_p4, %p1133_p6 }
 0x201   : > { %p923_p8 = pneg %p922_p7 }
 0x203   : > { %1020 = dma.done.wait (%p923_p8), %s830_s13, 256  }
 0x204   : > { %1022 = vsyncadd (%p923_p8), %s830_s13, 4294967040  ;;  %p18_p9 = scmp.ge.s32.totalorder %s1116_s30, 4   ;;  %s1607_s24 = smov %s1029_s25 }
 0x205   : > { %s1608_s25 = smov %s1033_s26  ;;  %s1609_s26 = smov %s1127_s10 }
 0x206   : > { %s1610_s27 = smov %s1116_s30  ;;  %20 = sbr.rel (!%p18_p9) target bundleno = 3 (0x3), region = 91 }
 0x20b   :  { %836 = vsyncpa [#allocation3], 1 }
 0x20c   :  { %838 = vsyncpa [#allocation3 + $0x1], 1 }

// kernel: osblock_forward.24
= control target key start
LH: loop header
LB: loop body
LE: loop exit
PB: predicated region body
PF: predicated region fallthrough
CT: control target
= control target key end

     0   :  { %s698_s15 = smov 0   ;;  %s700_s16 = smov 0   ;;  %s849_s0 = inlined_call_operand.vmem [shape: f32[2,16,256], index: 0, kind: input, shape index: {}]   ;;  %s850_s1 = inlined_call_operand.vmem [shape: f32[64,16], index: 1, kind: input, shape index: {}]   ;;  %s851_s2 = inlined_call_operand.vmem [shape: f32[64,1], index: 2, kind: input, shape index: {}]   ;;  %s852_s3 = inlined_call_operand.vmem [shape: f32[64,1], index: 3, kind: input, shape index: {}]   ;;  %s853_s4 = inlined_call_operand.vmem [shape: f32[2,64,256], index: 4, kind: output, shape index: {}]  }
   0x1   :  { %s702_s17 = smov 0  }
   0x2 LB: > { %s26_s18 = sadd.s32 1, %s666_s16  ;;  %p591_p0 = scmp.ge.s32.totalorder %s670_s17, 1  ;;  %s670_s17 = sphi %s702_s17, %s14_s17   ;;  %s666_s16 = sphi %s700_s16, %s855_s16   ;;  %s662_s15 = sphi %s698_s15, %s854_s15  }
   0x3   : > { %p28_p1 = scmp.ge.s32.totalorder %s26_s18, 2  ;;  %p183_p2 = scmp.lt.s32.totalorder %s670_s17, 3 }
   0x5   : > { %s857_s18 = smov (%p28_p1, %s26_s18), 0  ;;  %p184_p3 = pnand %p591_p0, %p183_p2 }
   0x6   : > { %p218_p4 = scmp.lt.s32.totalorder (!%p184_p3), %s662_s15, 1 }
   0x7   : > { %187 = sbr.rel (%p184_p3) target bundleno = 184 (0xb8), region = 36 }
   0xc   : > { %v358_v0 = vld [vmem:[%s851_s2 + $0x10] sm:$0xff]  ;;  %v356_v1 = vld [vmem:[%s851_s2] sm:$0xff]  ;;  %v672_v2 = vmov 0   ;;  %s859_s15 = smov (!%p218_p4, %s662_s15), 1  ;;  %v359_v8 = vld [vmem:[%s851_s2 + $0x18] sm:$0xff]  ;;  %vm249_vm0 = vcmask 130048  }
   0xd   : > { %646 = vset.pattern.permute.xlu1 %v672_v2  ;;  %645 = vset.pattern.permute.xlu0 %v672_v2  ;;  %v360_v3 = vld [vmem:[%s851_s2 + $0x20] sm:$0xff]  ;;  %s614_s25 = sshll.u32 %s859_s15, 5  ;;  %v357_v9 = vld [vmem:[%s851_s2 + $0x8] sm:$0xff]  ;;  %v363_v13 = vld [vmem:[%s851_s2 + $0x38] sm:$0xff]  ;;  %s615_s27 = sshll.u32 %s859_s15, 7 }
   0xe   : > { %376 = vperm.xlu1 %646, %v358_v0   ;;  %366 = vperm.xlu0 %645, %v356_v1   ;;  %s225_s28 = scalar_lea.vmem %s849_s0, %s614_s25  ;;  %v237_v10 = vld [vmem:[%s850_s1] sm:$0xff]  ;;  %v361_v12 = vld [vmem:[%s851_s2 + $0x28] sm:$0xff]  ;;  %v362_v14 = vld [vmem:[%s851_s2 + $0x30] sm:$0xff]  ;;  %s818_s30 = scalar_lea.vmem %s853_s4, %s615_s27 }
   0xf   : > { %647 = vset.pattern.permute.xlu2 %v672_v2  ;;  %v247_v4 = vld [vmem:[%s225_s28 + $0x10] sm:$0xff]  ;;  %v248_v5 = vld [vmem:[%s225_s28 + $0x18] sm:$0xff]  ;;  %v245_v6 = vld [vmem:[%s225_s28] sm:$0xff] }
  0x10   : > { %386 = vperm.xlu2 %647, %v360_v3   ;;  %288 = vmatpush.msra.mxu0 %v247_v4  ;;  %v246_v7 = vld [vmem:[%s225_s28 + $0x8] sm:$0xff]  ;;  %v241_v11 = vld [vmem:[%s850_s1 + $0x20] sm:$0xff]  ;;  %v422_v18 = vld [vmem:[%s852_s3 + $0x10] sm:$0xff] }
  0x11   : > { %616 = vmatpush.msra.mxu2 %v247_v4  ;;  %329 = vmatpush.msra.mxu1 %v248_v5  ;;  %v238_v15 = vld [vmem:[%s850_s1 + $0x8] sm:$0xff]  ;;  %v420_v17 = vld [vmem:[%s852_s3] sm:$0xff]  ;;  %v239_v20 = vld [vmem:[%s850_s1 + $0x10] sm:$0xff] }
  0x12   : > { %618 = vmatpush.msra.mxu3 %v248_v5  ;;  %289 = vmatpush.msra.mxu0 %v245_v6  ;;  %v242_v16 = vld [vmem:[%s850_s1 + $0x28] sm:$0xff]  ;;  %v243_v21 = vld [vmem:[%s850_s1 + $0x30] sm:$0xff]  ;;  %v423_v22 = vld [vmem:[%s852_s3 + $0x18] sm:$0xff] }
  0x13   : > { %617 = vmatpush.msra.mxu2 %v245_v6  ;;  %330 = vmatpush.msra.mxu1 %v246_v7  ;;  %v421_v19 = vld [vmem:[%s852_s3 + $0x8] sm:$0xff]  ;;  %v424_v24 = vld [vmem:[%s852_s3 + $0x20] sm:$0xff]  ;;  %v240_v25 = vld [vmem:[%s850_s1 + $0x18] sm:$0xff] }
  0x14   : > { %619 = vmatpush.msra.mxu3 %v246_v7  ;;  %596 = vmatmul.msk.f32.vlgmr.msra.gmra.mxu0 %vm249_vm0, %v237_v10  ;;  %v425_v23 = vld [vmem:[%s852_s3 + $0x28] sm:$0xff]  ;;  %v244_v26 = vld [vmem:[%s850_s1 + $0x38] sm:$0xff]  ;;  %v426_v27 = vld [vmem:[%s852_s3 + $0x30] sm:$0xff] }
  0x15   : > { %600 = vmatmul.msk.f32.vlgmr.msra.gmra.mxu2 %vm249_vm0, %v241_v11  ;;  %604 = vmatmul.msk.f32.vlgmr.msra.gmra.mxu1 %vm249_vm0, %v237_v10  ;;  %v427_v28 = vld [vmem:[%s852_s3 + $0x38] sm:$0xff] }
  0x16   : > { %381 = vperm.xlu1 %646, %v359_v8   ;;  %371 = vperm.xlu0 %645, %v357_v9  }
  0x17   : > { %608 = vmatmul.msk.f32.vlgmr.msra.gmra.mxu3 %vm249_vm0, %v241_v11 }
  0x18   : > { %391 = vperm.xlu2 %647, %v361_v12  }
  0x1c   : > { %597 = vmatmul.msk.f32.gmra.mxu0 %vm249_vm0, %v238_v15 }
  0x1d   : > { %601 = vmatmul.msk.f32.gmra.mxu2 %vm249_vm0, %v242_v16  ;;  %605 = vmatmul.msk.f32.gmra.mxu1 %vm249_vm0, %v238_v15 }
  0x1e   : > { %401 = vperm.xlu1 %646, %v363_v13   ;;  %396 = vperm.xlu0 %645, %v362_v14  }
  0x1f   : > { %609 = vmatmul.msk.f32.gmra.mxu3 %vm249_vm0, %v242_v16 }
  0x20   : > { %430 = vperm.xlu2 %647, %v420_v17  }
  0x24   : > { %598 = vmatmul.msk.f32.gmra.mxu0 %vm249_vm0, %v239_v20 }
  0x25   : > { %602 = vmatmul.msk.f32.gmra.mxu2 %vm249_vm0, %v243_v21  ;;  %606 = vmatmul.msk.f32.gmra.mxu1 %vm249_vm0, %v239_v20 }
  0x26   : > { %440 = vperm.xlu1 %646, %v422_v18   ;;  %435 = vperm.xlu0 %645, %v421_v19  }
  0x27   : > { %610 = vmatmul.msk.f32.gmra.mxu3 %vm249_vm0, %v243_v21 }
  0x28   : > { %445 = vperm.xlu2 %647, %v423_v22  }
  0x2c   : > { %599 = vmatmul.msk.f32.gmra.mxu0 %vm249_vm0, %v240_v25 }
  0x2d   : > { %603 = vmatmul.msk.f32.gmra.mxu2 %vm249_vm0, %v244_v26  ;;  %607 = vmatmul.msk.f32.gmra.mxu1 %vm249_vm0, %v240_v25 }
  0x2e   : > { %455 = vperm.xlu1 %646, %v425_v23   ;;  %450 = vperm.xlu0 %645, %v424_v24  }
  0x2f   : > { %611 = vmatmul.msk.f32.gmra.mxu3 %vm249_vm0, %v244_v26 }
  0x30   : > { %460 = vperm.xlu2 %647, %v426_v27  }
  0x36   : > { %465 = vperm.xlu0 %645, %v427_v28  }
  0x6a   : > { %v387_v31 = vpop.permute.xlu2 %386 }
  0x72   : > { %v392_v34 = vpop.permute.xlu2 %391 }
  0x7a   : > { %v431_v40 = vpop.permute.xlu2 %430 }
  0x80   : > { %v377_v29 = vpop.permute.xlu1 %376  ;;  %v367_v30 = vpop.permute.xlu0 %366 }
  0x82   : > { %v446_v59 = vpop.permute.xlu2 %445 }
  0x88   : > { %v810_v32 = vpop.permute.xlu1 %381  ;;  %v372_v33 = vpop.permute.xlu0 %371 }
  0x8a   : > { %v461_v12 = vpop.permute.xlu2 %460 }
  0x90   : > { %v812_v35 = vpop.permute.xlu1 %401  ;;  %v397_v36 = vpop.permute.xlu0 %396 }
  0x91   : > { %v291_v37 = vpop.f32.mrf.mxu0 }
  0x92   : > { %v404_v38 = vmul.f32 %v367_v30, %v291_v37  ;;  %v332_v39 = vpop.f32.mrf.mxu1 }
  0x93   : > { %v405_v41 = vmul.f32 %v367_v30, %v332_v39 }
  0x94   : > { %v468_v42 = vadd.f32 %v431_v40, %v404_v38 }
  0x95   : > { %v469_v43 = vadd.f32 %v431_v40, %v405_v41 }
  0x96   : > { %484 = vst [vmem:[%s818_s30] sm:$0xff] %v468_v42 }
  0x97   : > { %485 = vst [vmem:[%s818_s30 + $0x8] sm:$0xff] %v469_v43 }
  0x98   : > { %v436_v44 = vpop.permute.xlu0 %435  ;;  %v441_v45 = vpop.permute.xlu1 %440 }
  0x99   : > { %v303_v46 = vpop.f32.mrf.mxu2  ;;  %v294_v48 = vpop.f32.mrf.mxu0 }
  0x9a   : > { %v344_v47 = vpop.f32.mrf.mxu3  ;;  %v406_v49 = vmul.f32 %v372_v33, %v294_v48  ;;  %v335_v50 = vpop.f32.mrf.mxu1  ;;  %v412_v52 = vmul.f32 %v387_v31, %v303_v46 }
  0x9b   : > { %v407_v51 = vmul.f32 %v372_v33, %v335_v50  ;;  %v413_v53 = vmul.f32 %v387_v31, %v344_v47 }
  0x9c   : > { %v470_v54 = vadd.f32 %v436_v44, %v406_v49 }
  0x9d   : > { %v471_v55 = vadd.f32 %v436_v44, %v407_v51 }
  0x9e   : > { %486 = vst [vmem:[%s818_s30 + $0x10] sm:$0xff] %v470_v54 }
  0x9f   : > { %487 = vst [vmem:[%s818_s30 + $0x18] sm:$0xff] %v471_v55 }
  0xa0   : > { %v451_v56 = vpop.permute.xlu0 %450  ;;  %v456_v63 = vpop.permute.xlu1 %455 }
  0xa1   : > { %v476_v57 = vadd.f32 %v451_v56, %v412_v52  ;;  %v477_v58 = vadd.f32 %v451_v56, %v413_v53  ;;  %v306_v60 = vpop.f32.mrf.mxu2  ;;  %v297_v1 = vpop.f32.mrf.mxu0 }
  0xa2   : > { %v414_v61 = vmul.f32 %v392_v34, %v306_v60  ;;  %v347_v62 = vpop.f32.mrf.mxu3  ;;  %v408_v3 = vmul.f32 %v377_v29, %v297_v1  ;;  %v338_v4 = vpop.f32.mrf.mxu1 }
  0xa3   : > { %492 = vst [vmem:[%s818_s30 + $0x40] sm:$0xff] %v476_v57  ;;  %v415_v0 = vmul.f32 %v392_v34, %v347_v62  ;;  %v409_v6 = vmul.f32 %v377_v29, %v338_v4 }
  0xa4   : > { %493 = vst [vmem:[%s818_s30 + $0x48] sm:$0xff] %v477_v58  ;;  %v478_v2 = vadd.f32 %v456_v63, %v414_v61  ;;  %v472_v7 = vadd.f32 %v441_v45, %v408_v3 }
  0xa5   : > { %v479_v5 = vadd.f32 %v456_v63, %v415_v0  ;;  %v473_v8 = vadd.f32 %v441_v45, %v409_v6 }
  0xa6   : > { %494 = vst [vmem:[%s818_s30 + $0x50] sm:$0xff] %v478_v2 }
  0xa7   : > { %495 = vst [vmem:[%s818_s30 + $0x58] sm:$0xff] %v479_v5 }
  0xa8   : > { %488 = vst [vmem:[%s818_s30 + $0x20] sm:$0xff] %v472_v7  ;;  %v466_v25 = vpop.permute.xlu0 %465 }
  0xa9   : > { %489 = vst [vmem:[%s818_s30 + $0x28] sm:$0xff] %v473_v8  ;;  %v309_v9 = vpop.f32.mrf.mxu2  ;;  %v300_v14 = vpop.f32.mrf.mxu0 }
  0xaa   : > { %v416_v10 = vmul.f32 %v397_v36, %v309_v9  ;;  %v350_v11 = vpop.f32.mrf.mxu3  ;;  %v410_v16 = vmul.f32 %v810_v32, %v300_v14  ;;  %v341_v17 = vpop.f32.mrf.mxu1 }
  0xab   : > { %v417_v13 = vmul.f32 %v397_v36, %v350_v11  ;;  %v411_v19 = vmul.f32 %v810_v32, %v341_v17 }
  0xac   : > { %v480_v15 = vadd.f32 %v461_v12, %v416_v10  ;;  %v474_v20 = vadd.f32 %v446_v59, %v410_v16 }
  0xad   : > { %v481_v18 = vadd.f32 %v461_v12, %v417_v13  ;;  %v475_v21 = vadd.f32 %v446_v59, %v411_v19 }
  0xae   : > { %496 = vst [vmem:[%s818_s30 + $0x60] sm:$0xff] %v480_v15 }
  0xaf   : > { %497 = vst [vmem:[%s818_s30 + $0x68] sm:$0xff] %v481_v18 }
  0xb0   : > { %490 = vst [vmem:[%s818_s30 + $0x30] sm:$0xff] %v474_v20 }
  0xb1   : > { %491 = vst [vmem:[%s818_s30 + $0x38] sm:$0xff] %v475_v21  ;;  %v312_v22 = vpop.f32.mrf.mxu2 }
  0xb2   : > { %v418_v23 = vmul.f32 %v812_v35, %v312_v22  ;;  %v353_v24 = vpop.f32.mrf.mxu3 }
  0xb3   : > { %v419_v26 = vmul.f32 %v812_v35, %v353_v24 }
  0xb4   : > { %v482_v27 = vadd.f32 %v466_v25, %v418_v23 }
  0xb5   : > { %v483_v28 = vadd.f32 %v466_v25, %v419_v26 }
  0xb6   : > { %498 = vst [vmem:[%s818_s30 + $0x70] sm:$0xff] %v482_v27 }
  0xb7   : > { %499 = vst [vmem:[%s818_s30 + $0x78] sm:$0xff] %v483_v28 }
  0xb8 PF: > { %s14_s17 = sadd.s32 1, %s670_s17   ;;  %s854_s15 = smov %s666_s16 }
  0xb9   : > { %p11_p5 = scmp.ge.s32.totalorder %s14_s17, 4   ;;  %s855_s16 = smov %s857_s18 }
  0xbb   :  { %13 = sbr.rel (!%p11_p5) target bundleno = 2 (0x2), region = 66 }

// kernel: osblock_forward.25
= control target key start
LH: loop header
LB: loop body
LE: loop exit
PB: predicated region body
PF: predicated region fallthrough
CT: control target
= control target key end

     0   :  { %s1257_s30 = smov 0   ;;  %s1259_s10 = smov 0   ;;  %s1450_s0 = inlined_call_operand.vmem [shape: f32[2,4,16,1], index: 0, kind: input, shape index: {}]   ;;  %s1451_s1 = inlined_call_operand.vmem [shape: f32[2,16,256], index: 1, kind: input, shape index: {}]   ;;  %s1452_s2 = inlined_call_operand.vmem [shape: f32[2,16,256], index: 2, kind: input, shape index: {}]   ;;  %s1453_s3 = inlined_call_operand.vmem [shape: f32[2,16,256], index: 3, kind: input, shape index: {}]   ;;  %s1454_s4 = inlined_call_operand.vmem [shape: f32[2,16,256], index: 4, kind: input, shape index: {}]   ;;  %s1455_s5 = inlined_call_operand.vmem [shape: f32[64,16], index: 5, kind: input, shape index: {}]   ;;  %s1456_s6 = inlined_call_operand.vmem [shape: f32[64,1], index: 6, kind: input, shape index: {}]   ;;  %s1457_s7 = inlined_call_operand.vmem [shape: f32[64,1], index: 7, kind: input, shape index: {}]   ;;  %s1458_s8 = inlined_call_operand.vmem [shape: f32[2,64,256], index: 8, kind: input, shape index: {}]   ;;  %s1459_s9 = inlined_call_operand.vmem [shape: f32[2,64,256], index: 9, kind: output, shape index: {}]  }
   0x1   :  { %s1261_s11 = smov 0  }
   0x2 LB: > { %s31_s12 = sadd.s32 1, %s1200_s10  ;;  %p1110_p0 = scmp.ge.s32.totalorder %s1204_s11, 1  ;;  %s1204_s11 = sphi %s1261_s11, %s19_s11   ;;  %s1200_s10 = sphi %s1259_s10, %s1461_s10   ;;  %s1196_s30 = sphi %s1257_s30, %s1460_s30  }
   0x3   : > { %p33_p1 = scmp.ge.s32.totalorder %s31_s12, 2  ;;  %p386_p2 = scmp.lt.s32.totalorder %s1204_s11, 3 }
   0x5   : > { %s1463_s12 = smov (%p33_p1, %s31_s12), 0  ;;  %p387_p3 = pnand %p1110_p0, %p386_p2 }
   0x6   : > { %p471_p4 = scmp.lt.s32.totalorder (!%p387_p3), %s1196_s30, 1 }
   0x7   : > { %390 = sbr.rel (%p387_p3) target bundleno = 322 (0x142), region = 56 }
   0xc   : > { %v1206_v0 = vmov 0   ;;  %s1465_s30 = smov (!%p471_p4, %s1196_s30), 1  ;;  %v743_v7 = vld [vmem:[%s1456_s6] sm:$0xff]  ;;  %v746_v10 = vld [vmem:[%s1456_s6 + $0x18] sm:$0xff]  ;;  %v744_v11 = vld [vmem:[%s1456_s6 + $0x8] sm:$0xff]  ;;  %vm636_vm0 = vcmask 130048  }
   0xd   : > { %1181 = vset.pattern.permute.xlu2 %v1206_v0  ;;  %1180 = vset.pattern.permute.xlu1 %v1206_v0  ;;  %s1143_s13 = sshll.u32 %s1465_s30, 6  ;;  %v745_v12 = vld [vmem:[%s1456_s6 + $0x10] sm:$0xff]  ;;  %v747_v14 = vld [vmem:[%s1456_s6 + $0x20] sm:$0xff]  ;;  %v748_v15 = vld [vmem:[%s1456_s6 + $0x28] sm:$0xff]  ;;  %s1144_s15 = sshll.u32 %s1465_s30, 5 }
   0xe   : > { %1179 = vset.pattern.permute.xlu0 %v1206_v0  ;;  %s475_s16 = scalar_lea.vmem %s1450_s0, %s1143_s13  ;;  %v749_v13 = vld [vmem:[%s1456_s6 + $0x30] sm:$0xff]  ;;  %v808_v16 = vld [vmem:[%s1457_s7 + $0x8] sm:$0xff]  ;;  %v750_v17 = vld [vmem:[%s1456_s6 + $0x38] sm:$0xff]  ;;  %s494_s18 = scalar_lea.vmem %s1452_s2, %s1144_s15 }
   0xf   : > { %v541_v1 = vld [vmem:[%s475_s16 + $0x28] sm:$0xff]  ;;  %v536_v3 = vld [vmem:[%s475_s16] sm:$0xff]  ;;  %v539_v5 = vld [vmem:[%s475_s16 + $0x18] sm:$0xff]  ;;  %s484_s21 = scalar_lea.vmem %s1451_s1, %s1144_s15  ;;  %s504_s24 = scalar_lea.vmem %s1453_s3, %s1144_s15 }
  0x10   : > { %v537_v2 = vld [vmem:[%s475_s16 + $0x8] sm:$0xff]  ;;  %595 = vperm.xlu2 %1181, %v541_v1   ;;  %550 = vperm.xlu1 %1180, %v536_v3   ;;  %v540_v4 = vld [vmem:[%s475_s16 + $0x20] sm:$0xff]  ;;  %v538_v6 = vld [vmem:[%s475_s16 + $0x10] sm:$0xff]  ;;  %s514_s27 = scalar_lea.vmem %s1454_s4, %s1144_s15 }
  0x11   : > { %555 = vperm.xlu0 %1179, %v537_v2   ;;  %v543_v8 = vld [vmem:[%s475_s16 + $0x38] sm:$0xff]  ;;  %v542_v9 = vld [vmem:[%s475_s16 + $0x30] sm:$0xff]  ;;  %v807_v18 = vld [vmem:[%s1457_s7] sm:$0xff] }
  0x12   : > { %v811_v19 = vld [vmem:[%s1457_s7 + $0x20] sm:$0xff]  ;;  %v809_v20 = vld [vmem:[%s1457_s7 + $0x10] sm:$0xff]  ;;  %v810_v21 = vld [vmem:[%s1457_s7 + $0x18] sm:$0xff] }
  0x13   : > { %v814_v22 = vld [vmem:[%s1457_s7 + $0x38] sm:$0xff]  ;;  %v812_v23 = vld [vmem:[%s1457_s7 + $0x28] sm:$0xff]  ;;  %v813_v24 = vld [vmem:[%s1457_s7 + $0x30] sm:$0xff] }
  0x14   : > { %v564_v28 = vld [vmem:[%s494_s18 + $0x10] sm:$0xff]  ;;  %v565_v29 = vld [vmem:[%s494_s18 + $0x18] sm:$0xff]  ;;  %v562_v33 = vld [vmem:[%s494_s18] sm:$0xff] }
  0x15   : > { %v546_v30 = vld [vmem:[%s484_s21 + $0x10] sm:$0xff]  ;;  %v547_v31 = vld [vmem:[%s484_s21 + $0x18] sm:$0xff]  ;;  %v563_v36 = vld [vmem:[%s494_s18 + $0x8] sm:$0xff] }
  0x16   : > { %v544_v38 = vld [vmem:[%s484_s21] sm:$0xff]  ;;  %v545_v41 = vld [vmem:[%s484_s21 + $0x8] sm:$0xff]  ;;  %v586_v43 = vld [vmem:[%s504_s24 + $0x10] sm:$0xff] }
  0x17   : > { %v587_v44 = vld [vmem:[%s504_s24 + $0x18] sm:$0xff]  ;;  %v584_v46 = vld [vmem:[%s504_s24] sm:$0xff]  ;;  %v608_v51 = vld [vmem:[%s514_s27 + $0x10] sm:$0xff] }
  0x18   : > { %590 = vperm.xlu2 %1181, %v540_v4   ;;  %568 = vperm.xlu1 %1180, %v538_v6   ;;  %v609_v52 = vld [vmem:[%s514_s27 + $0x18] sm:$0xff]  ;;  %v585_v55 = vld [vmem:[%s504_s24 + $0x8] sm:$0xff]  ;;  %v606_v58 = vld [vmem:[%s514_s27] sm:$0xff] }
  0x19   : > { %573 = vperm.xlu0 %1179, %v539_v5   ;;  %v607_v59 = vld [vmem:[%s514_s27 + $0x8] sm:$0xff]  ;;  %s1148_s27 = sshll.u32 %s1465_s30, 7 }
  0x1a   : > { %s1394_s13 = scalar_lea.vmem %s1458_s8, %s1148_s27  ;;  %s1401_s15 = scalar_lea.vmem %s1459_s9, %s1148_s27 }
  0x20   : > { %753 = vperm.xlu2 %1181, %v743_v7   ;;  %612 = vperm.xlu1 %1180, %v542_v9  }
  0x21   : > { %617 = vperm.xlu0 %1179, %v543_v8  }
  0x28   : > { %768 = vperm.xlu2 %1181, %v746_v10   ;;  %763 = vperm.xlu1 %1180, %v745_v12  }
  0x29   : > { %758 = vperm.xlu0 %1179, %v744_v11  }
  0x30   : > { %783 = vperm.xlu2 %1181, %v749_v13   ;;  %778 = vperm.xlu1 %1180, %v748_v15   ;;  %v628_v13 = vld [vmem:[%s1455_s5] sm:$0xff]  ;;  %v629_v15 = vld [vmem:[%s1455_s5 + $0x8] sm:$0xff] }
  0x31   : > { %773 = vperm.xlu0 %1179, %v747_v14   ;;  %v632_v14 = vld [vmem:[%s1455_s5 + $0x20] sm:$0xff] }
  0x38   : > { %822 = vperm.xlu2 %1181, %v808_v16   ;;  %817 = vperm.xlu1 %1180, %v807_v18   ;;  %v633_v16 = vld [vmem:[%s1455_s5 + $0x28] sm:$0xff]  ;;  %v634_v18 = vld [vmem:[%s1455_s5 + $0x30] sm:$0xff] }
  0x39   : > { %788 = vperm.xlu0 %1179, %v750_v17   ;;  %v630_v17 = vld [vmem:[%s1455_s5 + $0x10] sm:$0xff] }
  0x40   : > { %837 = vperm.xlu2 %1181, %v811_v19   ;;  %832 = vperm.xlu1 %1180, %v810_v21   ;;  %v631_v19 = vld [vmem:[%s1455_s5 + $0x18] sm:$0xff] }
  0x41   : > { %827 = vperm.xlu0 %1179, %v809_v20   ;;  %v635_v20 = vld [vmem:[%s1455_s5 + $0x38] sm:$0xff] }
  0x48   : > { %852 = vperm.xlu2 %1181, %v814_v22   ;;  %847 = vperm.xlu1 %1180, %v813_v24  }
  0x49   : > { %842 = vperm.xlu0 %1179, %v812_v23  }
  0x6a   : > { %v596_v27 = vpop.permute.xlu2 %595 }
  0x6b   : > { %v600_v53 = vmul.f32 %v596_v27, %v586_v43  ;;  %v601_v54 = vmul.f32 %v596_v27, %v587_v44 }
  0x72   : > { %v591_v56 = vpop.permute.xlu2 %590 }
  0x73   : > { %v598_v60 = vmul.f32 %v591_v56, %v584_v46  ;;  %v599_v4 = vmul.f32 %v591_v56, %v585_v55  ;;  %v873_v56 = vld [vmem:[%s1394_s13 + $0x10] sm:$0xff] }
  0x7a   : > { %v754_v21 = vpop.permute.xlu2 %753 }
  0x82   : > { %v551_v26 = vpop.permute.xlu1 %550  ;;  %v1382_v23 = vpop.permute.xlu2 %768 }
  0x83   : > { %v556_v25 = vpop.permute.xlu0 %555  ;;  %v558_v47 = vmul.f32 %v551_v26, %v544_v38  ;;  %v559_v50 = vmul.f32 %v551_v26, %v545_v41 }
  0x84   : > { %v560_v39 = vmul.f32 %v556_v25, %v546_v30  ;;  %v561_v40 = vmul.f32 %v556_v25, %v547_v31 }
  0x8a   : > { %v569_v37 = vpop.permute.xlu1 %568  ;;  %v1386_v26 = vpop.permute.xlu2 %783 }
  0x8b   : > { %v574_v32 = vpop.permute.xlu0 %573  ;;  %v576_v42 = vmul.f32 %v569_v37, %v562_v33  ;;  %v577_v45 = vmul.f32 %v569_v37, %v563_v36  ;;  %v872_v37 = vld [vmem:[%s1394_s13 + $0x8] sm:$0xff] }
  0x8c   : > { %v578_v34 = vmul.f32 %v574_v32, %v564_v28  ;;  %v579_v35 = vmul.f32 %v574_v32, %v565_v29 }
  0x8d   : > { %v580_v57 = vadd.f32 %v576_v42, %v558_v47  ;;  %v581_v61 = vadd.f32 %v577_v45, %v559_v50 }
  0x8e   : > { %v582_v48 = vadd.f32 %v578_v34, %v560_v39  ;;  %v583_v49 = vadd.f32 %v579_v35, %v561_v40  ;;  %v871_v34 = vld [vmem:[%s1394_s13] sm:$0xff] }
  0x8f   : > { %v602_v9 = vadd.f32 %v598_v60, %v580_v57  ;;  %v603_v10 = vadd.f32 %v599_v4, %v581_v61  ;;  %v874_v60 = vld [vmem:[%s1394_s13 + $0x18] sm:$0xff] }
  0x90   : > { %v604_v2 = vadd.f32 %v600_v53, %v582_v48  ;;  %v605_v3 = vadd.f32 %v601_v54, %v583_v49  ;;  %v879_v48 = vld [vmem:[%s1394_s13 + $0x40] sm:$0xff] }
  0x92   : > { %v613_v1 = vpop.permute.xlu1 %612  ;;  %v823_v29 = vpop.permute.xlu2 %822 }
  0x93   : > { %v618_v62 = vpop.permute.xlu0 %617  ;;  %v620_v5 = vmul.f32 %v613_v1, %v606_v58  ;;  %v621_v6 = vmul.f32 %v613_v1, %v607_v59 }
  0x94   : > { %v622_v63 = vmul.f32 %v618_v62, %v608_v51  ;;  %v623_v0 = vmul.f32 %v618_v62, %v609_v52  ;;  %v880_v52 = vld [vmem:[%s1394_s13 + $0x48] sm:$0xff] }
  0x95   : > { %v624_v11 = vadd.f32 %v620_v5, %v602_v9  ;;  %v625_v12 = vadd.f32 %v621_v6, %v603_v10  ;;  %v881_v10 = vld [vmem:[%s1394_s13 + $0x50] sm:$0xff] }
  0x96   : > { %v626_v7 = vadd.f32 %v622_v63, %v604_v2  ;;  %v627_v8 = vadd.f32 %v623_v0, %v605_v3 }
  0x98   : > { %675 = vmatpush.msra.mxu0 %v626_v7  ;;  %1150 = vmatpush.msra.mxu2 %v626_v7 }
  0x99   : > { %716 = vmatpush.msra.mxu1 %v627_v8  ;;  %1152 = vmatpush.msra.mxu3 %v627_v8 }
  0x9a   : > { %676 = vmatpush.msra.mxu0 %v624_v11  ;;  %1151 = vmatpush.msra.mxu2 %v624_v11  ;;  %v1384_v24 = vpop.permute.xlu1 %763  ;;  %v838_v46 = vpop.permute.xlu2 %837 }
  0x9b   : > { %717 = vmatpush.msra.mxu1 %v625_v12  ;;  %1153 = vmatpush.msra.mxu3 %v625_v12  ;;  %v759_v22 = vpop.permute.xlu0 %758 }
  0x9c   : > { %1125 = vmatmul.msk.f32.vlgmr.msra.gmra.mxu0 %vm636_vm0, %v628_v13  ;;  %1129 = vmatmul.msk.f32.vlgmr.msra.gmra.mxu2 %vm636_vm0, %v632_v14 }
  0x9d   : > { %1133 = vmatmul.msk.f32.vlgmr.msra.gmra.mxu1 %vm636_vm0, %v628_v13  ;;  %1137 = vmatmul.msk.f32.vlgmr.msra.gmra.mxu3 %vm636_vm0, %v632_v14  ;;  %v882_v14 = vld [vmem:[%s1394_s13 + $0x58] sm:$0xff] }
  0xa2   : > { %v779_v27 = vpop.permute.xlu1 %778 }
  0xa3   : > { %v774_v25 = vpop.permute.xlu0 %773 }
  0xa4   : > { %1126 = vmatmul.msk.f32.gmra.mxu0 %vm636_vm0, %v629_v15  ;;  %1130 = vmatmul.msk.f32.gmra.mxu2 %vm636_vm0, %v633_v16 }
  0xa5   : > { %1134 = vmatmul.msk.f32.gmra.mxu1 %vm636_vm0, %v629_v15  ;;  %1138 = vmatmul.msk.f32.gmra.mxu3 %vm636_vm0, %v633_v16 }
  0xaa   : > { %v818_v33 = vpop.permute.xlu1 %817 }
  0xab   : > { %v1389_v28 = vpop.permute.xlu0 %788 }
  0xac   : > { %1127 = vmatmul.msk.f32.gmra.mxu0 %vm636_vm0, %v630_v17  ;;  %1131 = vmatmul.msk.f32.gmra.mxu2 %vm636_vm0, %v634_v18 }
  0xad   : > { %1135 = vmatmul.msk.f32.gmra.mxu1 %vm636_vm0, %v630_v17  ;;  %1139 = vmatmul.msk.f32.gmra.mxu3 %vm636_vm0, %v634_v18  ;;  %v875_v18 = vld [vmem:[%s1394_s13 + $0x20] sm:$0xff] }
  0xb2   : > { %v833_v1 = vpop.permute.xlu1 %832 }
  0xb3   : > { %v828_v40 = vpop.permute.xlu0 %827 }
  0xb4   : > { %1128 = vmatmul.msk.f32.gmra.mxu0 %vm636_vm0, %v631_v19  ;;  %1132 = vmatmul.msk.f32.gmra.mxu2 %vm636_vm0, %v635_v20 }
  0xb5   : > { %1136 = vmatmul.msk.f32.gmra.mxu1 %vm636_vm0, %v631_v19  ;;  %1140 = vmatmul.msk.f32.gmra.mxu3 %vm636_vm0, %v635_v20 }
  0xbb   : > { %v843_v8 = vpop.permute.xlu0 %842 }
 0x119   : > { %v678_v30 = vpop.f32.mrf.mxu0 }
 0x11a   : > { %v791_v31 = vmul.f32 %v754_v21, %v678_v30  ;;  %v719_v32 = vpop.f32.mrf.mxu1 }
 0x11b   : > { %v792_v35 = vmul.f32 %v754_v21, %v719_v32 }
 0x11c   : > { %v855_v36 = vadd.f32 %v818_v33, %v791_v31 }
 0x11d   : > { %v856_v38 = vadd.f32 %v818_v33, %v792_v35 }
 0x11e   : > { %v887_v39 = vadd.f32 %v871_v34, %v855_v36  ;;  %v848_v36 = vpop.permute.xlu1 %847 }
 0x11f   : > { %v888_v41 = vadd.f32 %v872_v37, %v856_v38  ;;  %v690_v42 = vpop.f32.mrf.mxu2  ;;  %v883_v38 = vld [vmem:[%s1394_s13 + $0x60] sm:$0xff] }
 0x120   : > { %v903_v43 = vmax.f32 %v887_v39, 0.0  ;;  %v799_v44 = vmul.f32 %v774_v25, %v690_v42  ;;  %v731_v45 = vpop.f32.mrf.mxu3  ;;  %v884_v42 = vld [vmem:[%s1394_s13 + $0x68] sm:$0xff] }
 0x121   : > { %v904_v47 = vmax.f32 %v888_v41, 0.0  ;;  %v800_v49 = vmul.f32 %v774_v25, %v731_v45  ;;  %v681_v50 = vpop.f32.mrf.mxu0 }
 0x122   : > { %919 = vst [vmem:[%s1401_s15] sm:$0xff] %v903_v43  ;;  %v863_v51 = vadd.f32 %v838_v46, %v799_v44  ;;  %v793_v53 = vmul.f32 %v759_v22, %v681_v50  ;;  %v722_v54 = vpop.f32.mrf.mxu1  ;;  %v878_v50 = vld [vmem:[%s1394_s13 + $0x38] sm:$0xff] }
 0x123   : > { %920 = vst [vmem:[%s1401_s15 + $0x8] sm:$0xff] %v904_v47  ;;  %v864_v55 = vadd.f32 %v838_v46, %v800_v49  ;;  %v794_v57 = vmul.f32 %v759_v22, %v722_v54  ;;  %v876_v22 = vld [vmem:[%s1394_s13 + $0x28] sm:$0xff]  ;;  %v877_v46 = vld [vmem:[%s1394_s13 + $0x30] sm:$0xff] }
 0x124   : > { %v895_v58 = vadd.f32 %v879_v48, %v863_v51  ;;  %v857_v59 = vadd.f32 %v823_v29, %v793_v53 }
 0x125   : > { %v896_v61 = vadd.f32 %v880_v52, %v864_v55  ;;  %v858_v62 = vadd.f32 %v823_v29, %v794_v57 }
 0x126   : > { %v911_v63 = vmax.f32 %v895_v58, 0.0  ;;  %v889_v0 = vadd.f32 %v873_v56, %v857_v59  ;;  %v853_v59 = vpop.permute.xlu2 %852 }
 0x127   : > { %v912_v2 = vmax.f32 %v896_v61, 0.0  ;;  %v890_v3 = vadd.f32 %v874_v60, %v858_v62  ;;  %v693_v4 = vpop.f32.mrf.mxu2  ;;  %v885_v61 = vld [vmem:[%s1394_s13 + $0x70] sm:$0xff] }
 0x128   : > { %927 = vst [vmem:[%s1401_s15 + $0x40] sm:$0xff] %v911_v63  ;;  %v905_v5 = vmax.f32 %v889_v0, 0.0  ;;  %v801_v6 = vmul.f32 %v779_v27, %v693_v4  ;;  %v734_v7 = vpop.f32.mrf.mxu3  ;;  %v886_v0 = vld [vmem:[%s1394_s13 + $0x78] sm:$0xff] }
 0x129   : > { %928 = vst [vmem:[%s1401_s15 + $0x48] sm:$0xff] %v912_v2  ;;  %v906_v9 = vmax.f32 %v890_v3, 0.0  ;;  %v802_v11 = vmul.f32 %v779_v27, %v734_v7  ;;  %v684_v12 = vpop.f32.mrf.mxu0 }
 0x12a   : > { %921 = vst [vmem:[%s1401_s15 + $0x10] sm:$0xff] %v905_v5  ;;  %v865_v13 = vadd.f32 %v843_v8, %v801_v6  ;;  %v795_v15 = vmul.f32 %v1384_v24, %v684_v12  ;;  %v725_v16 = vpop.f32.mrf.mxu1 }
 0x12b   : > { %922 = vst [vmem:[%s1401_s15 + $0x18] sm:$0xff] %v906_v9  ;;  %v866_v17 = vadd.f32 %v843_v8, %v802_v11  ;;  %v796_v19 = vmul.f32 %v1384_v24, %v725_v16 }
 0x12c   : > { %v897_v20 = vadd.f32 %v881_v10, %v865_v13  ;;  %v859_v21 = vadd.f32 %v828_v40, %v795_v15 }
 0x12d   : > { %v898_v25 = vadd.f32 %v882_v14, %v866_v17  ;;  %v860_v27 = vadd.f32 %v828_v40, %v796_v19 }
 0x12e   : > { %v913_v29 = vmax.f32 %v897_v20, 0.0  ;;  %v891_v30 = vadd.f32 %v875_v18, %v859_v21 }
 0x12f   : > { %v914_v31 = vmax.f32 %v898_v25, 0.0  ;;  %v892_v32 = vadd.f32 %v876_v22, %v860_v27  ;;  %v696_v33 = vpop.f32.mrf.mxu2 }
 0x130   : > { %929 = vst [vmem:[%s1401_s15 + $0x50] sm:$0xff] %v913_v29  ;;  %v907_v34 = vmax.f32 %v891_v30, 0.0  ;;  %v803_v24 = vmul.f32 %v1386_v26, %v696_v33  ;;  %v737_v35 = vpop.f32.mrf.mxu3 }
 0x131   : > { %930 = vst [vmem:[%s1401_s15 + $0x58] sm:$0xff] %v914_v31  ;;  %v908_v37 = vmax.f32 %v892_v32, 0.0  ;;  %v804_v39 = vmul.f32 %v1386_v26, %v737_v35  ;;  %v687_v40 = vpop.f32.mrf.mxu0 }
 0x132   : > { %923 = vst [vmem:[%s1401_s15 + $0x20] sm:$0xff] %v907_v34  ;;  %v867_v41 = vadd.f32 %v848_v36, %v803_v24  ;;  %v797_v43 = vmul.f32 %v1382_v23, %v687_v40  ;;  %v728_v44 = vpop.f32.mrf.mxu1 }
 0x133   : > { %924 = vst [vmem:[%s1401_s15 + $0x28] sm:$0xff] %v908_v37  ;;  %v868_v45 = vadd.f32 %v848_v36, %v804_v39  ;;  %v798_v47 = vmul.f32 %v1382_v23, %v728_v44 }
 0x134   : > { %v899_v48 = vadd.f32 %v883_v38, %v867_v41  ;;  %v861_v49 = vadd.f32 %v833_v1, %v797_v43 }
 0x135   : > { %v900_v51 = vadd.f32 %v884_v42, %v868_v45  ;;  %v862_v26 = vadd.f32 %v833_v1, %v798_v47 }
 0x136   : > { %v915_v52 = vmax.f32 %v899_v48, 0.0  ;;  %v893_v53 = vadd.f32 %v877_v46, %v861_v49 }
 0x137   : > { %v916_v54 = vmax.f32 %v900_v51, 0.0  ;;  %v894_v55 = vadd.f32 %v878_v50, %v862_v26  ;;  %v699_v56 = vpop.f32.mrf.mxu2 }
 0x138   : > { %931 = vst [vmem:[%s1401_s15 + $0x60] sm:$0xff] %v915_v52  ;;  %v909_v57 = vmax.f32 %v893_v53, 0.0  ;;  %v805_v58 = vmul.f32 %v1389_v28, %v699_v56  ;;  %v740_v23 = vpop.f32.mrf.mxu3 }
 0x139   : > { %932 = vst [vmem:[%s1401_s15 + $0x68] sm:$0xff] %v916_v54  ;;  %v910_v60 = vmax.f32 %v894_v55, 0.0  ;;  %v806_v62 = vmul.f32 %v1389_v28, %v740_v23 }
 0x13a   : > { %925 = vst [vmem:[%s1401_s15 + $0x30] sm:$0xff] %v909_v57  ;;  %v869_v63 = vadd.f32 %v853_v59, %v805_v58 }
 0x13b   : > { %926 = vst [vmem:[%s1401_s15 + $0x38] sm:$0xff] %v910_v60  ;;  %v870_v1 = vadd.f32 %v853_v59, %v806_v62 }
 0x13c   : > { %v901_v2 = vadd.f32 %v885_v61, %v869_v63 }
 0x13d   : > { %v902_v3 = vadd.f32 %v886_v0, %v870_v1 }
 0x13e   : > { %v917_v4 = vmax.f32 %v901_v2, 0.0 }
 0x13f   : > { %v918_v5 = vmax.f32 %v902_v3, 0.0 }
 0x140   : > { %933 = vst [vmem:[%s1401_s15 + $0x70] sm:$0xff] %v917_v4 }
 0x141   : > { %934 = vst [vmem:[%s1401_s15 + $0x78] sm:$0xff] %v918_v5 }
 0x142 PF: > { %s19_s11 = sadd.s32 1, %s1204_s11   ;;  %s1460_s30 = smov %s1200_s10 }
 0x143   : > { %p16_p5 = scmp.ge.s32.totalorder %s19_s11, 4   ;;  %s1461_s10 = smov %s1463_s12 }
 0x145   :  { %18 = sbr.rel (!%p16_p5) target bundleno = 2 (0x2), region = 101 }

</bundles_post_ra>
